<compile_context>
chip_gen: v6e
topology: v6e:2x2x1
jax: 0.10.0
libtpu: 0.0.40
codegen_flags: <defaults>
</compile_context>

<pallas_src>
import functools

import jax
import jax.numpy as jnp
import numpy as np
from jax.experimental import pallas as pl
from jax.experimental.pallas import tpu as pltpu

GROUPS = 8
EPS = 1e-5

# ---------------------------------------------------------------------------
# pltpu.roll direction probe (run once, eagerly, outside jit).
# ---------------------------------------------------------------------------
_ROLL_MODE_CACHE = None


def _detect_roll_mode():
    """'jnp' if pltpu.roll(x, s) == jnp.roll(x, s), 'rev' if opposite direction,
    'concat' to fall back to slice+concat lane shifts."""
    global _ROLL_MODE_CACHE
    if _ROLL_MODE_CACHE is not None:
        return _ROLL_MODE_CACHE
    mode = "concat"
    try:
        x = jnp.arange(8 * 128, dtype=jnp.float32).reshape(8, 128)

        def probe(x_ref, o_ref):
            o_ref[...] = pltpu.roll(x_ref[...], 3, 1)

        out = pl.pallas_call(
            probe, out_shape=jax.ShapeDtypeStruct((8, 128), jnp.float32))(x)
        out = np.asarray(jax.block_until_ready(out))
        xn = np.asarray(x)
        if np.array_equal(out, np.roll(xn, 3, axis=1)):
            mode = "jnp"
        elif np.array_equal(out, np.roll(xn, -3, axis=1)):
            mode = "rev"
    except Exception:
        mode = "concat"
    _ROLL_MODE_CACHE = mode
    return mode


# ---------------------------------------------------------------------------
# Kernel
# ---------------------------------------------------------------------------
def block_kernel(x_ref, w1_ref, w2_ref, pc_ref, film_ref, avg_ref, mask_ref,
                 out_ref, *, H, W, cout, identity_shortcut, roll_mode):
    HW = H * W
    n = pl.program_id(0)

    x = x_ref[0]                        # (Cin_pad, HW) f32
    masks = mask_ref[...]               # (9, HW)       f32 {0,1} per-tap boundary masks
    avg = avg_ref[...]                  # (C, C)        group-averaging matrix (incl. 1/(HW*gsz))
    pc = pc_ref[...]                    # (C, 8)        packed per-channel params
    b1, g1, be1 = pc[:, 0:1], pc[:, 1:2], pc[:, 2:3]
    b2, g2, be2 = pc[:, 3:4], pc[:, 4:5], pc[:, 5:6]
    bs = pc[:, 6:7]

    def shift_lanes(a, off):
        # b[:, p] = a[:, (p + off) % HW]; wrapped lanes are killed by the masks.
        if off == 0:
            return a
        k = off % HW
        if roll_mode == "jnp":
            return pltpu.roll(a, HW - k, 1)          # == jnp.roll(a, -off)
        if roll_mode == "rev":
            return pltpu.roll(a, k, 1)
        return jnp.concatenate([a[:, k:], a[:, :k]], axis=1)

    def conv3x3_fused(src, w_ref):
        # src: (K, HW) f32; w_ref: (R, 9*K) bf16, columns tap-major / channel-minor.
        # Build the im2col stack (mask in f32, single bf16 cast) -> one MXU matmul.
        pieces = []
        t = 0
        for dy in (-1, 0, 1):
            for dx in (-1, 0, 1):
                p = shift_lanes(src, dy * W + dx)
                if dy != 0 or dx != 0:
                    p = p * masks[t:t + 1, :]
                pieces.append(p)
                t += 1
        patch = jnp.concatenate(pieces, axis=0).astype(jnp.bfloat16)   # (9K, HW)
        return jnp.dot(w_ref[...], patch, preferred_element_type=jnp.float32)

    def groupnorm_silu(h, gamma, beta):
        # Single-pass GN stats via ONE tiny avg matmul on stacked [s1 | s2].
        # TODO(synk): switch to a centered two-pass reduction for very large HW.
        s = jnp.concatenate(
            [jnp.sum(h, axis=1, keepdims=True),
             jnp.sum(h * h, axis=1, keepdims=True)], axis=1)           # (C, 2)
        stats = jnp.dot(avg, s, preferred_element_type=jnp.float32)    # (C, 2)
        mean = stats[:, 0:1]
        var = jnp.maximum(stats[:, 1:2] - mean * mean, 0.0)
        hn = (h - mean) * jax.lax.rsqrt(var + EPS)
        hn = hn * gamma + beta
        return hn * jax.nn.sigmoid(hn)                                 # SiLU

    # ---- conv1 (3x3 SAME) [+ fused 1x1 shortcut rows] -> GN(8) -> SiLU ----
    big = conv3x3_fused(x, w1_ref)                   # (cout or 2*cout, HW)
    h = groupnorm_silu(big[:cout] + b1, g1, be1)

    # ---- FiLM time conditioning: h * (1 + scale) + shift ----
    f = film_ref[n]                                  # (C, 2): [scale | shift]
    h = h * (1.0 + f[:, 0:1]) + f[:, 1:2]

    # ---- conv2 (3x3 SAME) -> GN(8) -> SiLU ----
    h2 = groupnorm_silu(conv3x3_fused(h, w2_ref) + b2, g2, be2)

    # ---- shortcut + residual add ----
    if identity_shortcut:
        sc = x[:cout]                                # exact f32 identity path
    else:
        sc = big[cout:] + bs                         # 1x1 conv, fused into conv1's matmul
    out_ref[0] = (h2 + sc).astype(out_ref.dtype)


# ---------------------------------------------------------------------------
# Parameters / wrapper
# ---------------------------------------------------------------------------
def init_params(key, cin, cout, tdim):
    ks = jax.random.split(key, 12)
    s = 0.1
    p = {
        'w1': s * jax.random.normal(ks[0], (3, 3, cin, cout), jnp.float32),
        'b1': s * jax.random.normal(ks[1], (cout,), jnp.float32),
        'w2': s * jax.random.normal(ks[2], (3, 3, cout, cout), jnp.float32),
        'b2': s * jax.random.normal(ks[3], (cout,), jnp.float32),
        'g1': 1.0 + s * jax.random.normal(ks[4], (cout,), jnp.float32),
        'be1': s * jax.random.normal(ks[5], (cout,), jnp.float32),
        'g2': 1.0 + s * jax.random.normal(ks[6], (cout,), jnp.float32),
        'be2': s * jax.random.normal(ks[7], (cout,), jnp.float32),
        'wt': s * jax.random.normal(ks[8], (tdim, 2 * cout), jnp.float32),
        'bt': s * jax.random.normal(ks[9], (2 * cout,), jnp.float32),
    }
    if cin != cout:
        p['ws'] = s * jax.random.normal(ks[10], (cin, cout), jnp.float32)
        p['bs'] = s * jax.random.normal(ks[11], (cout,), jnp.float32)
    return p


def _ceil_to(a, m):
    return ((a + m - 1) // m) * m


def block_forward(x_nchw, time_emb, p, *, roll_mode="concat",
                  unblocked_consts=True):
    N, Cin, H, W = x_nchw.shape
    Cout = p['w1'].shape[-1]
    HW = H * W
    identity = 'ws' not in p
    cin_pad = _ceil_to(Cin, 8)

    # NCHW -> (N, Cin_pad, H*W): free reshape + zero channel padding so the
    # 9-tap im2col stack stays 8-sublane aligned.
    x = x_nchw.reshape(N, Cin, HW).astype(jnp.float32)
    if cin_pad != Cin:
        x = jnp.pad(x, ((0, 0), (0, cin_pad - Cin), (0, 0)))

    # Tiny time-MLP (SiLU -> Linear) stays in plain XLA; per-image FiLM params
    # become a single (N, Cout, 2) VMEM resident indexed by program_id.
    te = jnp.dot(jax.nn.silu(time_emb.astype(jnp.float32)), p['wt'],
                 precision=jax.lax.Precision.HIGHEST) + p['bt']
    film = jnp.stack([te[:, :Cout], te[:, Cout:]], axis=-1)      # (N, Cout, 2)

    # conv1 weights, lane-dense (Cout, 9*cin_pad), tap-major / channel-minor.
    w1r = jnp.pad(p['w1'].reshape(9, Cin, Cout),
                  ((0, 0), (0, cin_pad - Cin), (0, 0)))
    w1k = jnp.transpose(w1r, (2, 0, 1)).reshape(Cout, 9 * cin_pad)
    if identity:
        w1_aug = w1k.astype(jnp.bfloat16)
        bs_col = jnp.zeros((Cout, 1), jnp.float32)
    else:
        # Fuse the 1x1 shortcut into conv1's matmul: Cout extra output rows
        # whose weights live only on the (unmasked, unshifted) centre tap.
        ws_pad = jnp.pad(p['ws'], ((0, cin_pad - Cin), (0, 0)))  # (cin_pad, Cout)
        sc_rows = jnp.zeros((Cout, 9 * cin_pad), jnp.float32)
        sc_rows = sc_rows.at[:, 4 * cin_pad:5 * cin_pad].set(ws_pad.T)
        w1_aug = jnp.concatenate([w1k, sc_rows], axis=0).astype(jnp.bfloat16)
        bs_col = p['bs'].reshape(Cout, 1).astype(jnp.float32)

    # conv2 weights, lane-dense (Cout, 9*Cout).
    w2k = jnp.transpose(p['w2'].reshape(9, Cout, Cout), (2, 0, 1))
    w2k = w2k.reshape(Cout, 9 * Cout).astype(jnp.bfloat16)

    # Packed per-channel params: [b1, g1, be1, b2, g2, be2, bs, 0]  (Cout, 8).
    def col(v):
        return v.reshape(Cout, 1).astype(jnp.float32)
    pc = jnp.concatenate([col(p['b1']), col(p['g1']), col(p['be1']),
                          col(p['b2']), col(p['g2']), col(p['be2']),
                          bs_col, jnp.zeros((Cout, 1), jnp.float32)], axis=1)

    # GroupNorm group-averaging matrix (includes the 1/(HW*gsize) factor).
    gsize = Cout // GROUPS
    idx = np.arange(Cout)
    same = (idx[:, None] // gsize) == (idx[None, :] // gsize)
    gavg = jnp.asarray(same.astype(np.float32) / float(HW * gsize))

    # Per-tap combined boundary masks, hoisted out of the kernel.
    rr = np.arange(HW) // W
    cc = np.arange(HW) % W
    m9 = np.ones((9, HW), np.float32)
    t = 0
    for dy in (-1, 0, 1):
        for dx in (-1, 0, 1):
            m = np.ones(HW, np.bool_)
            if dy == -1:
                m &= rr >= 1
            elif dy == 1:
                m &= rr <= H - 2
            if dx == -1:
                m &= cc >= 1
            elif dx == 1:
                m &= cc <= W - 2
            m9[t] = m.astype(np.float32)
            t += 1
    m9 = jnp.asarray(m9)

    kernel = functools.partial(block_kernel, H=H, W=W, cout=Cout,
                               identity_shortcut=identity, roll_mode=roll_mode)

    if unblocked_consts:
        # Grid-invariant params live whole in VMEM: single copy, no per-step
        # DMA, no double buffering.
        def const_spec(shape):
            del shape
            return pl.BlockSpec(memory_space=pltpu.MemorySpace.VMEM)
    else:
        # Fallback: blocked spec with a constant index map (double-buffered).
        def const_spec(shape):
            return pl.BlockSpec(shape, lambda n, _z=(0,) * len(shape): _z)

    out = pl.pallas_call(
        kernel,
        out_shape=jax.ShapeDtypeStruct((N, Cout, HW), jnp.float32),
        grid_spec=pltpu.PrefetchScalarGridSpec(
            num_scalar_prefetch=0,
            grid=(N,),
            in_specs=[
                pl.BlockSpec((1, cin_pad, HW), lambda n: (n, 0, 0)),   # x (pipelined)
                const_spec(w1_aug.shape),     # conv1 (+shortcut) taps
                const_spec(w2k.shape),        # conv2 taps
                const_spec(pc.shape),         # packed per-channel params
                const_spec(film.shape),       # FiLM scale/shift per image
                const_spec(gavg.shape),       # GN averaging matrix
                const_spec(m9.shape),         # per-tap boundary masks
            ],
            out_specs=pl.BlockSpec((1, Cout, HW), lambda n: (n, 0, 0)),
        ),
        compiler_params=pltpu.CompilerParams(
            dimension_semantics=("parallel",),
            vmem_limit_bytes=48 * 1024 * 1024),
    )(x, w1_aug, w2k, pc, film, gavg, m9)

    # TODO(synk): for large C*H*W (v7x's 64 MiB VMEM) add spatial tiling with a
    # 1-row halo + two-pass GroupNorm; currently one full (C, H*W) image per step.
    return out.reshape(N, Cout, H, W)


# ---------------------------------------------------------------------------
# Pure-JAX reference (matches the PyTorch forward) for verification.
# ---------------------------------------------------------------------------
def block_reference(x_nchw, time_emb, p):
    hi = jax.lax.Precision.HIGHEST
    x = jnp.transpose(x_nchw, (0, 2, 3, 1)).astype(jnp.float32)
    C = p['w1'].shape[-1]

    def conv3(u, w, b):
        y = jax.lax.conv_general_dilated(
            u, w, (1, 1), 'SAME',
            dimension_numbers=('NHWC', 'HWIO', 'NHWC'), precision=hi)
        return y + b

    def gn(u, gamma, beta):
        N, H, W, Cc = u.shape
        ug = u.reshape(N, H, W, GROUPS, Cc // GROUPS)
        mean = ug.mean(axis=(1, 2, 4), keepdims=True)
        var = ((ug - mean) ** 2).mean(axis=(1, 2, 4), keepdims=True)
        un = ((ug - mean) / jnp.sqrt(var + EPS)).reshape(N, H, W, Cc)
        return un * gamma + beta

    h = conv3(x, p['w1'], p['b1'])
    h = jax.nn.silu(gn(h, p['g1'], p['be1']))
    te = jnp.dot(jax.nn.silu(time_emb), p['wt'], precision=hi) + p['bt']
    scale = te[:, :C][:, None, None, :]
    shift = te[:, C:][:, None, None, :]
    h = h * (1.0 + scale) + shift
    h = conv3(h, p['w2'], p['b2'])
    h = jax.nn.silu(gn(h, p['g2'], p['be2']))
    if 'ws' in p:
        sc = jnp.einsum('nhwc,cd->nhwd', x, p['ws'], precision=hi) + p['bs']
    else:
        sc = x
    return jnp.transpose(h + sc, (0, 3, 1, 2))


if __name__ == "__main__":
    N, Cin, Cout, H, W, Tdim = 2, 4, 32, 16, 16, 32
    kx, kt, kp = jax.random.split(jax.random.PRNGKey(0), 3)
    x = jax.random.normal(kx, (N, Cin, H, W), jnp.float32)      # NCHW, like torch
    t_emb = jax.random.normal(kt, (N, Tdim), jnp.float32)
    params = init_params(kp, Cin, Cout, Tdim)

    roll_mode = _detect_roll_mode()   # 'jnp' expected; graceful fallback otherwise

    fwd = jax.jit(block_forward,
                  static_argnames=("roll_mode", "unblocked_consts"))
    try:
        out = jax.block_until_ready(
            fwd(x, t_emb, params, roll_mode=roll_mode, unblocked_consts=True))
    except Exception:
        # Builds without whole-array-in-VMEM input specs: blocked const specs.
        out = jax.block_until_ready(
            fwd(x, t_emb, params, roll_mode=roll_mode, unblocked_consts=False))

    ref = block_reference(x, t_emb, params)
    # bf16 MXU operands in the convs -> slightly looser tolerance than pure f32.
    np.testing.assert_allclose(np.asarray(out), np.asarray(ref),
                               rtol=5e-2, atol=5e-2)
    print("KERNEL_OK")
</pallas_src>

<mosaic_0001>
module attributes {stable_mosaic.version = 11 : i64} {
  func.func @probe(%arg0: memref<8x128xf32, #tpu.memory_space<vmem>>, %arg1: memref<8x128xf32, #tpu.memory_space<vmem>>) attributes {dimension_semantics = [], scalar_prefetch = 0 : i64, scratch_operands = 0 : i64, tpu.core_type = #tpu.core_type<tc>} {
    %c0 = arith.constant 0 : index
    %c0_0 = arith.constant 0 : index
    %0 = vector.load %arg0[%c0, %c0_0] : memref<8x128xf32, #tpu.memory_space<vmem>>, vector<8x128xf32>
    %c3_i32 = arith.constant 3 : i32
    %1 = tpu.dynamic_rotate %0 by %c3_i32 dim 1 : vector<8x128xf32>, i32 -> vector<8x128xf32>
    %c0_1 = arith.constant 0 : index
    %c0_2 = arith.constant 0 : index
    %2 = vector.load %arg1[%c0_1, %c0_2] : memref<8x128xf32, #tpu.memory_space<vmem>>, vector<8x128xf32>
    tpu.vector_store %arg1[%c0_1, %c0_2], %1 {strides = array<i32>} : memref<8x128xf32, #tpu.memory_space<vmem>>, vector<8x128xf32>,
    return
  }
}

module attributes {stable_mosaic.version = 11 : i64} {
  func.func @block_kernel(%arg0: i32, %arg1: memref<1x8x256xf32, #tpu.memory_space<vmem>>, %arg2: memref<64x72xbf16, #tpu.memory_space<vmem>>, %arg3: memref<32x288xbf16, #tpu.memory_space<vmem>>, %arg4: memref<32x8xf32, #tpu.memory_space<vmem>>, %arg5: memref<2x32x2xf32, #tpu.memory_space<vmem>>, %arg6: memref<32x32xf32, #tpu.memory_space<vmem>>, %arg7: memref<9x256xf32, #tpu.memory_space<vmem>>, %arg8: memref<1x32x256xf32, #tpu.memory_space<vmem>>) attributes {dimension_semantics = [#tpu.dimension_semantics<parallel>], iteration_bounds = array<i64: 2>, scalar_prefetch = 0 : i64, scratch_operands = 0 : i64, tpu.core_type = #tpu.core_type<tc>, window_params = [{transform_indices = @transform_0, window_bounds = array<i64: 1, 8, 256>}, {pipeline_mode = #tpu.pipeline_mode<synchronous>, transform_indices = @transform_1, window_bounds = array<i64: 64, 72>}, {pipeline_mode = #tpu.pipeline_mode<synchronous>, transform_indices = @transform_2, window_bounds = array<i64: 32, 288>}, {pipeline_mode = #tpu.pipeline_mode<synchronous>, transform_indices = @transform_3, window_bounds = array<i64: 32, 8>}, {pipeline_mode = #tpu.pipeline_mode<synchronous>, transform_indices = @transform_4, window_bounds = array<i64: 2, 32, 2>}, {pipeline_mode = #tpu.pipeline_mode<synchronous>, transform_indices = @transform_5, window_bounds = array<i64: 32, 32>}, {pipeline_mode = #tpu.pipeline_mode<synchronous>, transform_indices = @transform_6, window_bounds = array<i64: 9, 256>}, {transform_indices = @transform_7, window_bounds = array<i64: 1, 32, 256>}]} {
    %c0 = arith.constant 0 : index
    %c0_0 = arith.constant 0 : index
    %c0_1 = arith.constant 0 : index
    %0 = vector.load %arg1[%c0, %c0_0, %c0_1] : memref<1x8x256xf32, #tpu.memory_space<vmem>>, vector<1x8x256xf32>
    %1 = vector.shape_cast %0 : vector<1x8x256xf32> to vector<8x256xf32>
    %c0_2 = arith.constant 0 : index
    %c0_3 = arith.constant 0 : index
    %2 = vector.load %arg7[%c0_2, %c0_3] : memref<9x256xf32, #tpu.memory_space<vmem>>, vector<9x256xf32>
    %c0_4 = arith.constant 0 : index
    %c0_5 = arith.constant 0 : index
    %3 = vector.load %arg6[%c0_4, %c0_5] : memref<32x32xf32, #tpu.memory_space<vmem>>, vector<32x32xf32>
    %c0_6 = arith.constant 0 : index
    %c0_7 = arith.constant 0 : index
    %4 = vector.load %arg4[%c0_6, %c0_7] : memref<32x8xf32, #tpu.memory_space<vmem>>, vector<32x8xf32>
    %5 = vector.extract_strided_slice %4 {offsets = [0, 0], sizes = [32, 1], strides = [1, 1]} : vector<32x8xf32> to vector<32x1xf32>
    %6 = vector.extract_strided_slice %4 {offsets = [0, 1], sizes = [32, 1], strides = [1, 1]} : vector<32x8xf32> to vector<32x1xf32>
    %7 = vector.extract_strided_slice %4 {offsets = [0, 2], sizes = [32, 1], strides = [1, 1]} : vector<32x8xf32> to vector<32x1xf32>
    %8 = vector.extract_strided_slice %4 {offsets = [0, 3], sizes = [32, 1], strides = [1, 1]} : vector<32x8xf32> to vector<32x1xf32>
    %9 = vector.extract_strided_slice %4 {offsets = [0, 4], sizes = [32, 1], strides = [1, 1]} : vector<32x8xf32> to vector<32x1xf32>
    %10 = vector.extract_strided_slice %4 {offsets = [0, 5], sizes = [32, 1], strides = [1, 1]} : vector<32x8xf32> to vector<32x1xf32>
    %11 = vector.extract_strided_slice %4 {offsets = [0, 6], sizes = [32, 1], strides = [1, 1]} : vector<32x8xf32> to vector<32x1xf32>
    %12 = vector.extract_strided_slice %1 {offsets = [0, 239], sizes = [8, 17], strides = [1, 1]} : vector<8x256xf32> to vector<8x17xf32>
    %13 = vector.extract_strided_slice %1 {offsets = [0, 0], sizes = [8, 239], strides = [1, 1]} : vector<8x256xf32> to vector<8x239xf32>
    %14 = tpu.concatenate %12, %13 in 1 : vector<8x17xf32>, vector<8x239xf32> -> vector<8x256xf32>
    %15 = vector.extract_strided_slice %2 {offsets = [0, 0], sizes = [1, 256], strides = [1, 1]} : vector<9x256xf32> to vector<1x256xf32>
    %16 = vector.broadcast %15 : vector<1x256xf32> to vector<8x256xf32>
    %17 = arith.mulf %14, %16 : vector<8x256xf32>
    %18 = vector.extract_strided_slice %1 {offsets = [0, 240], sizes = [8, 16], strides = [1, 1]} : vector<8x256xf32> to vector<8x16xf32>
    %19 = vector.extract_strided_slice %1 {offsets = [0, 0], sizes = [8, 240], strides = [1, 1]} : vector<8x256xf32> to vector<8x240xf32>
    %20 = tpu.concatenate %18, %19 in 1 : vector<8x16xf32>, vector<8x240xf32> -> vector<8x256xf32>
    %21 = vector.extract_strided_slice %2 {offsets = [1, 0], sizes = [1, 256], strides = [1, 1]} : vector<9x256xf32> to vector<1x256xf32>
    %22 = vector.broadcast %21 : vector<1x256xf32> to vector<8x256xf32>
    %23 = arith.mulf %20, %22 : vector<8x256xf32>
    %24 = vector.extract_strided_slice %1 {offsets = [0, 241], sizes = [8, 15], strides = [1, 1]} : vector<8x256xf32> to vector<8x15xf32>
    %25 = vector.extract_strided_slice %1 {offsets = [0, 0], sizes = [8, 241], strides = [1, 1]} : vector<8x256xf32> to vector<8x241xf32>
    %26 = tpu.concatenate %24, %25 in 1 : vector<8x15xf32>, vector<8x241xf32> -> vector<8x256xf32>
    %27 = vector.extract_strided_slice %2 {offsets = [2, 0], sizes = [1, 256], strides = [1, 1]} : vector<9x256xf32> to vector<1x256xf32>
    %28 = vector.broadcast %27 : vector<1x256xf32> to vector<8x256xf32>
    %29 = arith.mulf %26, %28 : vector<8x256xf32>
    %30 = vector.extract_strided_slice %1 {offsets = [0, 255], sizes = [8, 1], strides = [1, 1]} : vector<8x256xf32> to vector<8x1xf32>
    %31 = vector.extract_strided_slice %1 {offsets = [0, 0], sizes = [8, 255], strides = [1, 1]} : vector<8x256xf32> to vector<8x255xf32>
    %32 = tpu.concatenate %30, %31 in 1 : vector<8x1xf32>, vector<8x255xf32> -> vector<8x256xf32>
    %33 = vector.extract_strided_slice %2 {offsets = [3, 0], sizes = [1, 256], strides = [1, 1]} : vector<9x256xf32> to vector<1x256xf32>
    %34 = vector.broadcast %33 : vector<1x256xf32> to vector<8x256xf32>
    %35 = arith.mulf %32, %34 : vector<8x256xf32>
    %36 = vector.extract_strided_slice %1 {offsets = [0, 1], sizes = [8, 255], strides = [1, 1]} : vector<8x256xf32> to vector<8x255xf32>
    %37 = vector.extract_strided_slice %1 {offsets = [0, 0], sizes = [8, 1], strides = [1, 1]} : vector<8x256xf32> to vector<8x1xf32>
    %38 = tpu.concatenate %36, %37 in 1 : vector<8x255xf32>, vector<8x1xf32> -> vector<8x256xf32>
    %39 = vector.extract_strided_slice %2 {offsets = [5, 0], sizes = [1, 256], strides = [1, 1]} : vector<9x256xf32> to vector<1x256xf32>
    %40 = vector.broadcast %39 : vector<1x256xf32> to vector<8x256xf32>
    %41 = arith.mulf %38, %40 : vector<8x256xf32>
    %42 = vector.extract_strided_slice %1 {offsets = [0, 15], sizes = [8, 241], strides = [1, 1]} : vector<8x256xf32> to vector<8x241xf32>
    %43 = vector.extract_strided_slice %1 {offsets = [0, 0], sizes = [8, 15], strides = [1, 1]} : vector<8x256xf32> to vector<8x15xf32>
    %44 = tpu.concatenate %42, %43 in 1 : vector<8x241xf32>, vector<8x15xf32> -> vector<8x256xf32>
    %45 = vector.extract_strided_slice %2 {offsets = [6, 0], sizes = [1, 256], strides = [1, 1]} : vector<9x256xf32> to vector<1x256xf32>
    %46 = vector.broadcast %45 : vector<1x256xf32> to vector<8x256xf32>
    %47 = arith.mulf %44, %46 : vector<8x256xf32>
    %48 = vector.extract_strided_slice %1 {offsets = [0, 16], sizes = [8, 240], strides = [1, 1]} : vector<8x256xf32> to vector<8x240xf32>
    %49 = vector.extract_strided_slice %1 {offsets = [0, 0], sizes = [8, 16], strides = [1, 1]} : vector<8x256xf32> to vector<8x16xf32>
    %50 = tpu.concatenate %48, %49 in 1 : vector<8x240xf32>, vector<8x16xf32> -> vector<8x256xf32>
    %51 = vector.extract_strided_slice %2 {offsets = [7, 0], sizes = [1, 256], strides = [1, 1]} : vector<9x256xf32> to vector<1x256xf32>
    %52 = vector.broadcast %51 : vector<1x256xf32> to vector<8x256xf32>
    %53 = arith.mulf %50, %52 : vector<8x256xf32>
    %54 = vector.extract_strided_slice %1 {offsets = [0, 17], sizes = [8, 239], strides = [1, 1]} : vector<8x256xf32> to vector<8x239xf32>
    %55 = vector.extract_strided_slice %1 {offsets = [0, 0], sizes = [8, 17], strides = [1, 1]} : vector<8x256xf32> to vector<8x17xf32>
    %56 = tpu.concatenate %54, %55 in 1 : vector<8x239xf32>, vector<8x17xf32> -> vector<8x256xf32>
    %57 = vector.extract_strided_slice %2 {offsets = [8, 0], sizes = [1, 256], strides = [1, 1]} : vector<9x256xf32> to vector<1x256xf32>
    %58 = vector.broadcast %57 : vector<1x256xf32> to vector<8x256xf32>
    %59 = arith.mulf %56, %58 : vector<8x256xf32>
    %60 = tpu.concatenate %17, %23, %29, %35, %1, %41, %47, %53, %59 in 0 : vector<8x256xf32>, vector<8x256xf32>, vector<8x256xf32>, vector<8x256xf32>, vector<8x256xf32>, vector<8x256xf32>, vector<8x256xf32>, vector<8x256xf32>, vector<8x256xf32> -> vector<72x256xf32>
    %61 = arith.truncf %60 : vector<72x256xf32> to vector<72x256xbf16>
    %c0_8 = arith.constant 0 : index
    %c0_9 = arith.constant 0 : index
    %62 = vector.load %arg2[%c0_8, %c0_9] : memref<64x72xbf16, #tpu.memory_space<vmem>>, vector<64x72xbf16>
    %cst = arith.constant dense<0.000000e+00> : vector<64x256xf32>
    %63 = tpu.matmul %62, %61, %cst {dimension_numbers = #tpu.dot_dimension_numbers<[1], [0], [0], [1], [0, 0, 1, 1], [], []>} : vector<64x72xbf16>, vector<72x256xbf16>, vector<64x256xf32> -> vector<64x256xf32>
    %64 = vector.extract_strided_slice %63 {offsets = [0, 0], sizes = [32, 256], strides = [1, 1]} : vector<64x256xf32> to vector<32x256xf32>
    %65 = vector.broadcast %5 : vector<32x1xf32> to vector<32x256xf32>
    %66 = arith.addf %64, %65 : vector<32x256xf32>
    %cst_10 = arith.constant dense<0.000000e+00> : vector<32xf32>
    %67 = vector.multi_reduction <add>, %66, %cst_10 [1] : vector<32x256xf32> to vector<32xf32>
    %68 = vector.shape_cast %67 : vector<32xf32> to vector<32x1xf32>
    %69 = arith.mulf %66, %66 : vector<32x256xf32>
    %cst_11 = arith.constant dense<0.000000e+00> : vector<32xf32>
    %70 = vector.multi_reduction <add>, %69, %cst_11 [1] : vector<32x256xf32> to vector<32xf32>
    %71 = vector.shape_cast %70 : vector<32xf32> to vector<32x1xf32>
    %72 = tpu.concatenate %68, %71 in 1 : vector<32x1xf32>, vector<32x1xf32> -> vector<32x2xf32>
    %cst_12 = arith.constant dense<0.000000e+00> : vector<32x2xf32>
    %73 = tpu.matmul %3, %72, %cst_12 {dimension_numbers = #tpu.dot_dimension_numbers<[1], [0], [0], [1], [0, 0, 1, 1], [], []>} : vector<32x32xf32>, vector<32x2xf32>, vector<32x2xf32> -> vector<32x2xf32>
    %74 = vector.extract_strided_slice %73 {offsets = [0, 0], sizes = [32, 1], strides = [1, 1]} : vector<32x2xf32> to vector<32x1xf32>
    %75 = vector.extract_strided_slice %73 {offsets = [0, 1], sizes = [32, 1], strides = [1, 1]} : vector<32x2xf32> to vector<32x1xf32>
    %76 = arith.mulf %74, %74 : vector<32x1xf32>
    %77 = arith.subf %75, %76 : vector<32x1xf32>
    %cst_13 = arith.constant 0.000000e+00 : f32
    %78 = vector.broadcast %cst_13 : f32 to vector<32x1xf32>
    %79 = arith.maximumf %77, %78 : vector<32x1xf32>
    %80 = vector.broadcast %74 : vector<32x1xf32> to vector<32x256xf32>
    %81 = arith.subf %66, %80 : vector<32x256xf32>
    %cst_14 = arith.constant 9.99999974E-6 : f32
    %82 = vector.broadcast %cst_14 : f32 to vector<32x1xf32>
    %83 = arith.addf %79, %82 : vector<32x1xf32>
    %84 = math.rsqrt %83 : vector<32x1xf32>
    %85 = vector.broadcast %84 : vector<32x1xf32> to vector<32x256xf32>
    %86 = arith.mulf %81, %85 : vector<32x256xf32>
    %87 = vector.broadcast %6 : vector<32x1xf32> to vector<32x256xf32>
    %88 = arith.mulf %86, %87 : vector<32x256xf32>
    %89 = vector.broadcast %7 : vector<32x1xf32> to vector<32x256xf32>
    %90 = arith.addf %88, %89 : vector<32x256xf32>
    %91 = arith.negf %90 : vector<32x256xf32>
    %92 = math.exp %91 : vector<32x256xf32>
    %cst_15 = arith.constant 1.000000e+00 : f32
    %93 = vector.broadcast %cst_15 : f32 to vector<32x256xf32>
    %94 = arith.addf %93, %92 : vector<32x256xf32>
    %95 = arith.divf %93, %94 : vector<32x256xf32>
    %96 = arith.mulf %90, %95 : vector<32x256xf32>
    %97 = arith.index_cast %arg0 : i32 to index
    %c0_16 = arith.constant 0 : index
    %c0_17 = arith.constant 0 : index
    %98 = vector.load %arg5[%97, %c0_16, %c0_17] : memref<2x32x2xf32, #tpu.memory_space<vmem>>, vector<1x32x2xf32>
    %99 = vector.shape_cast %98 : vector<1x32x2xf32> to vector<32x2xf32>
    %100 = vector.extract_strided_slice %99 {offsets = [0, 0], sizes = [32, 1], strides = [1, 1]} : vector<32x2xf32> to vector<32x1xf32>
    %cst_18 = arith.constant 1.000000e+00 : f32
    %101 = vector.broadcast %cst_18 : f32 to vector<32x1xf32>
    %102 = arith.addf %101, %100 : vector<32x1xf32>
    %103 = vector.broadcast %102 : vector<32x1xf32> to vector<32x256xf32>
    %104 = arith.mulf %96, %103 : vector<32x256xf32>
    %105 = vector.extract_strided_slice %99 {offsets = [0, 1], sizes = [32, 1], strides = [1, 1]} : vector<32x2xf32> to vector<32x1xf32>
    %106 = vector.broadcast %105 : vector<32x1xf32> to vector<32x256xf32>
    %107 = arith.addf %104, %106 : vector<32x256xf32>
    %108 = vector.extract_strided_slice %107 {offsets = [0, 239], sizes = [32, 17], strides = [1, 1]} : vector<32x256xf32> to vector<32x17xf32>
    %109 = vector.extract_strided_slice %107 {offsets = [0, 0], sizes = [32, 239], strides = [1, 1]} : vector<32x256xf32> to vector<32x239xf32>
    %110 = tpu.concatenate %108, %109 in 1 : vector<32x17xf32>, vector<32x239xf32> -> vector<32x256xf32>
    %111 = vector.extract_strided_slice %2 {offsets = [0, 0], sizes = [1, 256], strides = [1, 1]} : vector<9x256xf32> to vector<1x256xf32>
    %112 = vector.broadcast %111 : vector<1x256xf32> to vector<32x256xf32>
    %113 = arith.mulf %110, %112 : vector<32x256xf32>
    %114 = vector.extract_strided_slice %107 {offsets = [0, 240], sizes = [32, 16], strides = [1, 1]} : vector<32x256xf32> to vector<32x16xf32>
    %115 = vector.extract_strided_slice %107 {offsets = [0, 0], sizes = [32, 240], strides = [1, 1]} : vector<32x256xf32> to vector<32x240xf32>
    %116 = tpu.concatenate %114, %115 in 1 : vector<32x16xf32>, vector<32x240xf32> -> vector<32x256xf32>
    %117 = vector.extract_strided_slice %2 {offsets = [1, 0], sizes = [1, 256], strides = [1, 1]} : vector<9x256xf32> to vector<1x256xf32>
    %118 = vector.broadcast %117 : vector<1x256xf32> to vector<32x256xf32>
    %119 = arith.mulf %116, %118 : vector<32x256xf32>
    %120 = vector.extract_strided_slice %107 {offsets = [0, 241], sizes = [32, 15], strides = [1, 1]} : vector<32x256xf32> to vector<32x15xf32>
    %121 = vector.extract_strided_slice %107 {offsets = [0, 0], sizes = [32, 241], strides = [1, 1]} : vector<32x256xf32> to vector<32x241xf32>
    %122 = tpu.concatenate %120, %121 in 1 : vector<32x15xf32>, vector<32x241xf32> -> vector<32x256xf32>
    %123 = vector.extract_strided_slice %2 {offsets = [2, 0], sizes = [1, 256], strides = [1, 1]} : vector<9x256xf32> to vector<1x256xf32>
    %124 = vector.broadcast %123 : vector<1x256xf32> to vector<32x256xf32>
    %125 = arith.mulf %122, %124 : vector<32x256xf32>
    %126 = vector.extract_strided_slice %107 {offsets = [0, 255], sizes = [32, 1], strides = [1, 1]} : vector<32x256xf32> to vector<32x1xf32>
    %127 = vector.extract_strided_slice %107 {offsets = [0, 0], sizes = [32, 255], strides = [1, 1]} : vector<32x256xf32> to vector<32x255xf32>
    %128 = tpu.concatenate %126, %127 in 1 : vector<32x1xf32>, vector<32x255xf32> -> vector<32x256xf32>
    %129 = vector.extract_strided_slice %2 {offsets = [3, 0], sizes = [1, 256], strides = [1, 1]} : vector<9x256xf32> to vector<1x256xf32>
    %130 = vector.broadcast %129 : vector<1x256xf32> to vector<32x256xf32>
    %131 = arith.mulf %128, %130 : vector<32x256xf32>
    %132 = vector.extract_strided_slice %107 {offsets = [0, 1], sizes = [32, 255], strides = [1, 1]} : vector<32x256xf32> to vector<32x255xf32>
    %133 = vector.extract_strided_slice %107 {offsets = [0, 0], sizes = [32, 1], strides = [1, 1]} : vector<32x256xf32> to vector<32x1xf32>
    %134 = tpu.concatenate %132, %133 in 1 : vector<32x255xf32>, vector<32x1xf32> -> vector<32x256xf32>
    %135 = vector.extract_strided_slice %2 {offsets = [5, 0], sizes = [1, 256], strides = [1, 1]} : vector<9x256xf32> to vector<1x256xf32>
    %136 = vector.broadcast %135 : vector<1x256xf32> to vector<32x256xf32>
    %137 = arith.mulf %134, %136 : vector<32x256xf32>
    %138 = vector.extract_strided_slice %107 {offsets = [0, 15], sizes = [32, 241], strides = [1, 1]} : vector<32x256xf32> to vector<32x241xf32>
    %139 = vector.extract_strided_slice %107 {offsets = [0, 0], sizes = [32, 15], strides = [1, 1]} : vector<32x256xf32> to vector<32x15xf32>
    %140 = tpu.concatenate %138, %139 in 1 : vector<32x241xf32>, vector<32x15xf32> -> vector<32x256xf32>
    %141 = vector.extract_strided_slice %2 {offsets = [6, 0], sizes = [1, 256], strides = [1, 1]} : vector<9x256xf32> to vector<1x256xf32>
    %142 = vector.broadcast %141 : vector<1x256xf32> to vector<32x256xf32>
    %143 = arith.mulf %140, %142 : vector<32x256xf32>
    %144 = vector.extract_strided_slice %107 {offsets = [0, 16], sizes = [32, 240], strides = [1, 1]} : vector<32x256xf32> to vector<32x240xf32>
    %145 = vector.extract_strided_slice %107 {offsets = [0, 0], sizes = [32, 16], strides = [1, 1]} : vector<32x256xf32> to vector<32x16xf32>
    %146 = tpu.concatenate %144, %145 in 1 : vector<32x240xf32>, vector<32x16xf32> -> vector<32x256xf32>
    %147 = vector.extract_strided_slice %2 {offsets = [7, 0], sizes = [1, 256], strides = [1, 1]} : vector<9x256xf32> to vector<1x256xf32>
    %148 = vector.broadcast %147 : vector<1x256xf32> to vector<32x256xf32>
    %149 = arith.mulf %146, %148 : vector<32x256xf32>
    %150 = vector.extract_strided_slice %107 {offsets = [0, 17], sizes = [32, 239], strides = [1, 1]} : vector<32x256xf32> to vector<32x239xf32>
    %151 = vector.extract_strided_slice %107 {offsets = [0, 0], sizes = [32, 17], strides = [1, 1]} : vector<32x256xf32> to vector<32x17xf32>
    %152 = tpu.concatenate %150, %151 in 1 : vector<32x239xf32>, vector<32x17xf32> -> vector<32x256xf32>
    %153 = vector.extract_strided_slice %2 {offsets = [8, 0], sizes = [1, 256], strides = [1, 1]} : vector<9x256xf32> to vector<1x256xf32>
    %154 = vector.broadcast %153 : vector<1x256xf32> to vector<32x256xf32>
    %155 = arith.mulf %152, %154 : vector<32x256xf32>
    %156 = tpu.concatenate %113, %119, %125, %131, %107, %137, %143, %149, %155 in 0 : vector<32x256xf32>, vector<32x256xf32>, vector<32x256xf32>, vector<32x256xf32>, vector<32x256xf32>, vector<32x256xf32>, vector<32x256xf32>, vector<32x256xf32>, vector<32x256xf32> -> vector<288x256xf32>
    %157 = arith.truncf %156 : vector<288x256xf32> to vector<288x256xbf16>
    %c0_19 = arith.constant 0 : index
    %c0_20 = arith.constant 0 : index
    %158 = vector.load %arg3[%c0_19, %c0_20] : memref<32x288xbf16, #tpu.memory_space<vmem>>, vector<32x288xbf16>
    %cst_21 = arith.constant dense<0.000000e+00> : vector<32x256xf32>
    %159 = tpu.matmul %158, %157, %cst_21 {dimension_numbers = #tpu.dot_dimension_numbers<[1], [0], [0], [1], [0, 0, 1, 1], [], []>} : vector<32x288xbf16>, vector<288x256xbf16>, vector<32x256xf32> -> vector<32x256xf32>
    %160 = vector.broadcast %8 : vector<32x1xf32> to vector<32x256xf32>
    %161 = arith.addf %159, %160 : vector<32x256xf32>
    %cst_22 = arith.constant dense<0.000000e+00> : vector<32xf32>
    %162 = vector.multi_reduction <add>, %161, %cst_22 [1] : vector<32x256xf32> to vector<32xf32>
    %163 = vector.shape_cast %162 : vector<32xf32> to vector<32x1xf32>
    %164 = arith.mulf %161, %161 : vector<32x256xf32>
    %cst_23 = arith.constant dense<0.000000e+00> : vector<32xf32>
    %165 = vector.multi_reduction <add>, %164, %cst_23 [1] : vector<32x256xf32> to vector<32xf32>
    %166 = vector.shape_cast %165 : vector<32xf32> to vector<32x1xf32>
    %167 = tpu.concatenate %163, %166 in 1 : vector<32x1xf32>, vector<32x1xf32> -> vector<32x2xf32>
    %cst_24 = arith.constant dense<0.000000e+00> : vector<32x2xf32>
    %168 = tpu.matmul %3, %167, %cst_24 {dimension_numbers = #tpu.dot_dimension_numbers<[1], [0], [0], [1], [0, 0, 1, 1], [], []>} : vector<32x32xf32>, vector<32x2xf32>, vector<32x2xf32> -> vector<32x2xf32>
    %169 = vector.extract_strided_slice %168 {offsets = [0, 0], sizes = [32, 1], strides = [1, 1]} : vector<32x2xf32> to vector<32x1xf32>
    %170 = vector.extract_strided_slice %168 {offsets = [0, 1], sizes = [32, 1], strides = [1, 1]} : vector<32x2xf32> to vector<32x1xf32>
    %171 = arith.mulf %169, %169 : vector<32x1xf32>
    %172 = arith.subf %170, %171 : vector<32x1xf32>
    %cst_25 = arith.constant 0.000000e+00 : f32
    %173 = vector.broadcast %cst_25 : f32 to vector<32x1xf32>
    %174 = arith.maximumf %172, %173 : vector<32x1xf32>
    %175 = vector.broadcast %169 : vector<32x1xf32> to vector<32x256xf32>
    %176 = arith.subf %161, %175 : vector<32x256xf32>
    %cst_26 = arith.constant 9.99999974E-6 : f32
    %177 = vector.broadcast %cst_26 : f32 to vector<32x1xf32>
    %178 = arith.addf %174, %177 : vector<32x1xf32>
    %179 = math.rsqrt %178 : vector<32x1xf32>
    %180 = vector.broadcast %179 : vector<32x1xf32> to vector<32x256xf32>
    %181 = arith.mulf %176, %180 : vector<32x256xf32>
    %182 = vector.broadcast %9 : vector<32x1xf32> to vector<32x256xf32>
    %183 = arith.mulf %181, %182 : vector<32x256xf32>
    %184 = vector.broadcast %10 : vector<32x1xf32> to vector<32x256xf32>
    %185 = arith.addf %183, %184 : vector<32x256xf32>
    %186 = arith.negf %185 : vector<32x256xf32>
    %187 = math.exp %186 : vector<32x256xf32>
    %cst_27 = arith.constant 1.000000e+00 : f32
    %188 = vector.broadcast %cst_27 : f32 to vector<32x256xf32>
    %189 = arith.addf %188, %187 : vector<32x256xf32>
    %190 = arith.divf %188, %189 : vector<32x256xf32>
    %191 = arith.mulf %185, %190 : vector<32x256xf32>
    %192 = vector.extract_strided_slice %63 {offsets = [32, 0], sizes = [32, 256], strides = [1, 1]} : vector<64x256xf32> to vector<32x256xf32>
    %193 = vector.broadcast %11 : vector<32x1xf32> to vector<32x256xf32>
    %194 = arith.addf %192, %193 : vector<32x256xf32>
    %195 = arith.addf %191, %194 : vector<32x256xf32>
    %c0_28 = arith.constant 0 : index
    %c0_29 = arith.constant 0 : index
    %c0_30 = arith.constant 0 : index
    %196 = vector.load %arg8[%c0_28, %c0_29, %c0_30] : memref<1x32x256xf32, #tpu.memory_space<vmem>>, vector<1x32x256xf32>
    %197 = vector.shape_cast %196 : vector<1x32x256xf32> to vector<32x256xf32>
    %198 = vector.shape_cast %195 : vector<32x256xf32> to vector<1x32x256xf32>
    tpu.vector_store %arg8[%c0_28, %c0_29, %c0_30], %198 {strides = array<i32>} : memref<1x32x256xf32, #tpu.memory_space<vmem>>, vector<1x32x256xf32>,
    return
  }
  func.func @transform_0(%arg0: i32) -> (i32, i32, i32) {
    %c0_i32 = arith.constant 0 : i32
    %c0_i32_0 = arith.constant 0 : i32
    %c0_i32_1 = arith.constant 0 : i32
    return %arg0, %c0_i32, %c0_i32_0 : i32, i32, i32
  }
  func.func @transform_1(%arg0: i32) -> (i32, i32) {
    %c0_i32 = arith.constant 0 : i32
    %c0_i32_0 = arith.constant 0 : i32
    %c0_i32_1 = arith.constant 0 : i32
    return %c0_i32, %c0_i32_0 : i32, i32
  }
  func.func @transform_2(%arg0: i32) -> (i32, i32) {
    %c0_i32 = arith.constant 0 : i32
    %c0_i32_0 = arith.constant 0 : i32
    %c0_i32_1 = arith.constant 0 : i32
    return %c0_i32, %c0_i32_0 : i32, i32
  }
  func.func @transform_3(%arg0: i32) -> (i32, i32) {
    %c0_i32 = arith.constant 0 : i32
    %c0_i32_0 = arith.constant 0 : i32
    %c0_i32_1 = arith.constant 0 : i32
    return %c0_i32, %c0_i32_0 : i32, i32
  }
  func.func @transform_4(%arg0: i32) -> (i32, i32, i32) {
    %c0_i32 = arith.constant 0 : i32
    %c0_i32_0 = arith.constant 0 : i32
    %c0_i32_1 = arith.constant 0 : i32
    %c0_i32_2 = arith.constant 0 : i32
    return %c0_i32, %c0_i32_0, %c0_i32_1 : i32, i32, i32
  }
  func.func @transform_5(%arg0: i32) -> (i32, i32) {
    %c0_i32 = arith.constant 0 : i32
    %c0_i32_0 = arith.constant 0 : i32
    %c0_i32_1 = arith.constant 0 : i32
    return %c0_i32, %c0_i32_0 : i32, i32
  }
  func.func @transform_6(%arg0: i32) -> (i32, i32) {
    %c0_i32 = arith.constant 0 : i32
    %c0_i32_0 = arith.constant 0 : i32
    %c0_i32_1 = arith.constant 0 : i32
    return %c0_i32, %c0_i32_0 : i32, i32
  }
  func.func @transform_7(%arg0: i32) -> (i32, i32, i32) {
    %c0_i32 = arith.constant 0 : i32
    %c0_i32_0 = arith.constant 0 : i32
    %c0_i32_1 = arith.constant 0 : i32
    return %arg0, %c0_i32, %c0_i32_0 : i32, i32, i32
  }
}

module attributes {stable_mosaic.version = 11 : i64} {
  func.func @block_kernel(%arg0: i32, %arg1: memref<1x8x256xf32, #tpu.memory_space<vmem>>, %arg2: memref<64x72xbf16, #tpu.memory_space<vmem>>, %arg3: memref<32x288xbf16, #tpu.memory_space<vmem>>, %arg4: memref<32x8xf32, #tpu.memory_space<vmem>>, %arg5: memref<2x32x2xf32, #tpu.memory_space<vmem>>, %arg6: memref<32x32xf32, #tpu.memory_space<vmem>>, %arg7: memref<9x256xf32, #tpu.memory_space<vmem>>, %arg8: memref<1x32x256xf32, #tpu.memory_space<vmem>>) attributes {dimension_semantics = [#tpu.dimension_semantics<parallel>], iteration_bounds = array<i64: 2>, scalar_prefetch = 0 : i64, scratch_operands = 0 : i64, tpu.core_type = #tpu.core_type<tc>, window_params = [{transform_indices = @transform_0, window_bounds = array<i64: 1, 8, 256>}, {pipeline_mode = #tpu.pipeline_mode<synchronous>, transform_indices = @transform_1, window_bounds = array<i64: 64, 72>}, {pipeline_mode = #tpu.pipeline_mode<synchronous>, transform_indices = @transform_2, window_bounds = array<i64: 32, 288>}, {pipeline_mode = #tpu.pipeline_mode<synchronous>, transform_indices = @transform_3, window_bounds = array<i64: 32, 8>}, {pipeline_mode = #tpu.pipeline_mode<synchronous>, transform_indices = @transform_4, window_bounds = array<i64: 2, 32, 2>}, {pipeline_mode = #tpu.pipeline_mode<synchronous>, transform_indices = @transform_5, window_bounds = array<i64: 32, 32>}, {pipeline_mode = #tpu.pipeline_mode<synchronous>, transform_indices = @transform_6, window_bounds = array<i64: 9, 256>}, {transform_indices = @transform_7, window_bounds = array<i64: 1, 32, 256>}]} {
    %c0 = arith.constant 0 : index
    %c0_0 = arith.constant 0 : index
    %c0_1 = arith.constant 0 : index
    %0 = vector.load %arg1[%c0, %c0_0, %c0_1] : memref<1x8x256xf32, #tpu.memory_space<vmem>>, vector<1x8x256xf32>
    %1 = vector.shape_cast %0 : vector<1x8x256xf32> to vector<8x256xf32>
    %c0_2 = arith.constant 0 : index
    %c0_3 = arith.constant 0 : index
    %2 = vector.load %arg7[%c0_2, %c0_3] : memref<9x256xf32, #tpu.memory_space<vmem>>, vector<9x256xf32>
    %c0_4 = arith.constant 0 : index
    %c0_5 = arith.constant 0 : index
    %3 = vector.load %arg6[%c0_4, %c0_5] : memref<32x32xf32, #tpu.memory_space<vmem>>, vector<32x32xf32>
    %c0_6 = arith.constant 0 : index
    %c0_7 = arith.constant 0 : index
    %4 = vector.load %arg4[%c0_6, %c0_7] : memref<32x8xf32, #tpu.memory_space<vmem>>, vector<32x8xf32>
    %5 = vector.extract_strided_slice %4 {offsets = [0, 0], sizes = [32, 1], strides = [1, 1]} : vector<32x8xf32> to vector<32x1xf32>
    %6 = vector.extract_strided_slice %4 {offsets = [0, 1], sizes = [32, 1], strides = [1, 1]} : vector<32x8xf32> to vector<32x1xf32>
    %7 = vector.extract_strided_slice %4 {offsets = [0, 2], sizes = [32, 1], strides = [1, 1]} : vector<32x8xf32> to vector<32x1xf32>
    %8 = vector.extract_strided_slice %4 {offsets = [0, 3], sizes = [32, 1], strides = [1, 1]} : vector<32x8xf32> to vector<32x1xf32>
    %9 = vector.extract_strided_slice %4 {offsets = [0, 4], sizes = [32, 1], strides = [1, 1]} : vector<32x8xf32> to vector<32x1xf32>
    %10 = vector.extract_strided_slice %4 {offsets = [0, 5], sizes = [32, 1], strides = [1, 1]} : vector<32x8xf32> to vector<32x1xf32>
    %11 = vector.extract_strided_slice %4 {offsets = [0, 6], sizes = [32, 1], strides = [1, 1]} : vector<32x8xf32> to vector<32x1xf32>
    %12 = vector.extract_strided_slice %1 {offsets = [0, 239], sizes = [8, 17], strides = [1, 1]} : vector<8x256xf32> to vector<8x17xf32>
    %13 = vector.extract_strided_slice %1 {offsets = [0, 0], sizes = [8, 239], strides = [1, 1]} : vector<8x256xf32> to vector<8x239xf32>
    %14 = tpu.concatenate %12, %13 in 1 : vector<8x17xf32>, vector<8x239xf32> -> vector<8x256xf32>
    %15 = vector.extract_strided_slice %2 {offsets = [0, 0], sizes = [1, 256], strides = [1, 1]} : vector<9x256xf32> to vector<1x256xf32>
    %16 = vector.broadcast %15 : vector<1x256xf32> to vector<8x256xf32>
    %17 = arith.mulf %14, %16 : vector<8x256xf32>
    %18 = vector.extract_strided_slice %1 {offsets = [0, 240], sizes = [8, 16], strides = [1, 1]} : vector<8x256xf32> to vector<8x16xf32>
    %19 = vector.extract_strided_slice %1 {offsets = [0, 0], sizes = [8, 240], strides = [1, 1]} : vector<8x256xf32> to vector<8x240xf32>
    %20 = tpu.concatenate %18, %19 in 1 : vector<8x16xf32>, vector<8x240xf32> -> vector<8x256xf32>
    %21 = vector.extract_strided_slice %2 {offsets = [1, 0], sizes = [1, 256], strides = [1, 1]} : vector<9x256xf32> to vector<1x256xf32>
    %22 = vector.broadcast %21 : vector<1x256xf32> to vector<8x256xf32>
    %23 = arith.mulf %20, %22 : vector<8x256xf32>
    %24 = vector.extract_strided_slice %1 {offsets = [0, 241], sizes = [8, 15], strides = [1, 1]} : vector<8x256xf32> to vector<8x15xf32>
    %25 = vector.extract_strided_slice %1 {offsets = [0, 0], sizes = [8, 241], strides = [1, 1]} : vector<8x256xf32> to vector<8x241xf32>
    %26 = tpu.concatenate %24, %25 in 1 : vector<8x15xf32>, vector<8x241xf32> -> vector<8x256xf32>
    %27 = vector.extract_strided_slice %2 {offsets = [2, 0], sizes = [1, 256], strides = [1, 1]} : vector<9x256xf32> to vector<1x256xf32>
    %28 = vector.broadcast %27 : vector<1x256xf32> to vector<8x256xf32>
    %29 = arith.mulf %26, %28 : vector<8x256xf32>
    %30 = vector.extract_strided_slice %1 {offsets = [0, 255], sizes = [8, 1], strides = [1, 1]} : vector<8x256xf32> to vector<8x1xf32>
    %31 = vector.extract_strided_slice %1 {offsets = [0, 0], sizes = [8, 255], strides = [1, 1]} : vector<8x256xf32> to vector<8x255xf32>
    %32 = tpu.concatenate %30, %31 in 1 : vector<8x1xf32>, vector<8x255xf32> -> vector<8x256xf32>
    %33 = vector.extract_strided_slice %2 {offsets = [3, 0], sizes = [1, 256], strides = [1, 1]} : vector<9x256xf32> to vector<1x256xf32>
    %34 = vector.broadcast %33 : vector<1x256xf32> to vector<8x256xf32>
    %35 = arith.mulf %32, %34 : vector<8x256xf32>
    %36 = vector.extract_strided_slice %1 {offsets = [0, 1], sizes = [8, 255], strides = [1, 1]} : vector<8x256xf32> to vector<8x255xf32>
    %37 = vector.extract_strided_slice %1 {offsets = [0, 0], sizes = [8, 1], strides = [1, 1]} : vector<8x256xf32> to vector<8x1xf32>
    %38 = tpu.concatenate %36, %37 in 1 : vector<8x255xf32>, vector<8x1xf32> -> vector<8x256xf32>
    %39 = vector.extract_strided_slice %2 {offsets = [5, 0], sizes = [1, 256], strides = [1, 1]} : vector<9x256xf32> to vector<1x256xf32>
    %40 = vector.broadcast %39 : vector<1x256xf32> to vector<8x256xf32>
    %41 = arith.mulf %38, %40 : vector<8x256xf32>
    %42 = vector.extract_strided_slice %1 {offsets = [0, 15], sizes = [8, 241], strides = [1, 1]} : vector<8x256xf32> to vector<8x241xf32>
    %43 = vector.extract_strided_slice %1 {offsets = [0, 0], sizes = [8, 15], strides = [1, 1]} : vector<8x256xf32> to vector<8x15xf32>
    %44 = tpu.concatenate %42, %43 in 1 : vector<8x241xf32>, vector<8x15xf32> -> vector<8x256xf32>
    %45 = vector.extract_strided_slice %2 {offsets = [6, 0], sizes = [1, 256], strides = [1, 1]} : vector<9x256xf32> to vector<1x256xf32>
    %46 = vector.broadcast %45 : vector<1x256xf32> to vector<8x256xf32>
    %47 = arith.mulf %44, %46 : vector<8x256xf32>
    %48 = vector.extract_strided_slice %1 {offsets = [0, 16], sizes = [8, 240], strides = [1, 1]} : vector<8x256xf32> to vector<8x240xf32>
    %49 = vector.extract_strided_slice %1 {offsets = [0, 0], sizes = [8, 16], strides = [1, 1]} : vector<8x256xf32> to vector<8x16xf32>
    %50 = tpu.concatenate %48, %49 in 1 : vector<8x240xf32>, vector<8x16xf32> -> vector<8x256xf32>
    %51 = vector.extract_strided_slice %2 {offsets = [7, 0], sizes = [1, 256], strides = [1, 1]} : vector<9x256xf32> to vector<1x256xf32>
    %52 = vector.broadcast %51 : vector<1x256xf32> to vector<8x256xf32>
    %53 = arith.mulf %50, %52 : vector<8x256xf32>
    %54 = vector.extract_strided_slice %1 {offsets = [0, 17], sizes = [8, 239], strides = [1, 1]} : vector<8x256xf32> to vector<8x239xf32>
    %55 = vector.extract_strided_slice %1 {offsets = [0, 0], sizes = [8, 17], strides = [1, 1]} : vector<8x256xf32> to vector<8x17xf32>
    %56 = tpu.concatenate %54, %55 in 1 : vector<8x239xf32>, vector<8x17xf32> -> vector<8x256xf32>
    %57 = vector.extract_strided_slice %2 {offsets = [8, 0], sizes = [1, 256], strides = [1, 1]} : vector<9x256xf32> to vector<1x256xf32>
    %58 = vector.broadcast %57 : vector<1x256xf32> to vector<8x256xf32>
    %59 = arith.mulf %56, %58 : vector<8x256xf32>
    %60 = tpu.concatenate %17, %23, %29, %35, %1, %41, %47, %53, %59 in 0 : vector<8x256xf32>, vector<8x256xf32>, vector<8x256xf32>, vector<8x256xf32>, vector<8x256xf32>, vector<8x256xf32>, vector<8x256xf32>, vector<8x256xf32>, vector<8x256xf32> -> vector<72x256xf32>
    %61 = arith.truncf %60 : vector<72x256xf32> to vector<72x256xbf16>
    %c0_8 = arith.constant 0 : index
    %c0_9 = arith.constant 0 : index
    %62 = vector.load %arg2[%c0_8, %c0_9] : memref<64x72xbf16, #tpu.memory_space<vmem>>, vector<64x72xbf16>
    %cst = arith.constant dense<0.000000e+00> : vector<64x256xf32>
    %63 = tpu.matmul %62, %61, %cst {dimension_numbers = #tpu.dot_dimension_numbers<[1], [0], [0], [1], [0, 0, 1, 1], [], []>} : vector<64x72xbf16>, vector<72x256xbf16>, vector<64x256xf32> -> vector<64x256xf32>
    %64 = vector.extract_strided_slice %63 {offsets = [0, 0], sizes = [32, 256], strides = [1, 1]} : vector<64x256xf32> to vector<32x256xf32>
    %65 = vector.broadcast %5 : vector<32x1xf32> to vector<32x256xf32>
    %66 = arith.addf %64, %65 : vector<32x256xf32>
    %cst_10 = arith.constant dense<0.000000e+00> : vector<32xf32>
    %67 = vector.multi_reduction <add>, %66, %cst_10 [1] : vector<32x256xf32> to vector<32xf32>
    %68 = vector.shape_cast %67 : vector<32xf32> to vector<32x1xf32>
    %69 = arith.mulf %66, %66 : vector<32x256xf32>
    %cst_11 = arith.constant dense<0.000000e+00> : vector<32xf32>
    %70 = vector.multi_reduction <add>, %69, %cst_11 [1] : vector<32x256xf32> to vector<32xf32>
    %71 = vector.shape_cast %70 : vector<32xf32> to vector<32x1xf32>
    %72 = tpu.concatenate %68, %71 in 1 : vector<32x1xf32>, vector<32x1xf32> -> vector<32x2xf32>
    %cst_12 = arith.constant dense<0.000000e+00> : vector<32x2xf32>
    %73 = tpu.matmul %3, %72, %cst_12 {dimension_numbers = #tpu.dot_dimension_numbers<[1], [0], [0], [1], [0, 0, 1, 1], [], []>} : vector<32x32xf32>, vector<32x2xf32>, vector<32x2xf32> -> vector<32x2xf32>
    %74 = vector.extract_strided_slice %73 {offsets = [0, 0], sizes = [32, 1], strides = [1, 1]} : vector<32x2xf32> to vector<32x1xf32>
    %75 = vector.extract_strided_slice %73 {offsets = [0, 1], sizes = [32, 1], strides = [1, 1]} : vector<32x2xf32> to vector<32x1xf32>
    %76 = arith.mulf %74, %74 : vector<32x1xf32>
    %77 = arith.subf %75, %76 : vector<32x1xf32>
    %cst_13 = arith.constant 0.000000e+00 : f32
    %78 = vector.broadcast %cst_13 : f32 to vector<32x1xf32>
    %79 = arith.maximumf %77, %78 : vector<32x1xf32>
    %80 = vector.broadcast %74 : vector<32x1xf32> to vector<32x256xf32>
    %81 = arith.subf %66, %80 : vector<32x256xf32>
    %cst_14 = arith.constant 9.99999974E-6 : f32
    %82 = vector.broadcast %cst_14 : f32 to vector<32x1xf32>
    %83 = arith.addf %79, %82 : vector<32x1xf32>
    %84 = math.rsqrt %83 : vector<32x1xf32>
    %85 = vector.broadcast %84 : vector<32x1xf32> to vector<32x256xf32>
    %86 = arith.mulf %81, %85 : vector<32x256xf32>
    %87 = vector.broadcast %6 : vector<32x1xf32> to vector<32x256xf32>
    %88 = arith.mulf %86, %87 : vector<32x256xf32>
    %89 = vector.broadcast %7 : vector<32x1xf32> to vector<32x256xf32>
    %90 = arith.addf %88, %89 : vector<32x256xf32>
    %91 = arith.negf %90 : vector<32x256xf32>
    %92 = math.exp %91 : vector<32x256xf32>
    %cst_15 = arith.constant 1.000000e+00 : f32
    %93 = vector.broadcast %cst_15 : f32 to vector<32x256xf32>
    %94 = arith.addf %93, %92 : vector<32x256xf32>
    %95 = arith.divf %93, %94 : vector<32x256xf32>
    %96 = arith.mulf %90, %95 : vector<32x256xf32>
    %97 = arith.index_cast %arg0 : i32 to index
    %c0_16 = arith.constant 0 : index
    %c0_17 = arith.constant 0 : index
    %98 = vector.load %arg5[%97, %c0_16, %c0_17] : memref<2x32x2xf32, #tpu.memory_space<vmem>>, vector<1x32x2xf32>
    %99 = vector.shape_cast %98 : vector<1x32x2xf32> to vector<32x2xf32>
    %100 = vector.extract_strided_slice %99 {offsets = [0, 0], sizes = [32, 1], strides = [1, 1]} : vector<32x2xf32> to vector<32x1xf32>
    %cst_18 = arith.constant 1.000000e+00 : f32
    %101 = vector.broadcast %cst_18 : f32 to vector<32x1xf32>
    %102 = arith.addf %101, %100 : vector<32x1xf32>
    %103 = vector.broadcast %102 : vector<32x1xf32> to vector<32x256xf32>
    %104 = arith.mulf %96, %103 : vector<32x256xf32>
    %105 = vector.extract_strided_slice %99 {offsets = [0, 1], sizes = [32, 1], strides = [1, 1]} : vector<32x2xf32> to vector<32x1xf32>
    %106 = vector.broadcast %105 : vector<32x1xf32> to vector<32x256xf32>
    %107 = arith.addf %104, %106 : vector<32x256xf32>
    %108 = vector.extract_strided_slice %107 {offsets = [0, 239], sizes = [32, 17], strides = [1, 1]} : vector<32x256xf32> to vector<32x17xf32>
    %109 = vector.extract_strided_slice %107 {offsets = [0, 0], sizes = [32, 239], strides = [1, 1]} : vector<32x256xf32> to vector<32x239xf32>
    %110 = tpu.concatenate %108, %109 in 1 : vector<32x17xf32>, vector<32x239xf32> -> vector<32x256xf32>
    %111 = vector.extract_strided_slice %2 {offsets = [0, 0], sizes = [1, 256], strides = [1, 1]} : vector<9x256xf32> to vector<1x256xf32>
    %112 = vector.broadcast %111 : vector<1x256xf32> to vector<32x256xf32>
    %113 = arith.mulf %110, %112 : vector<32x256xf32>
    %114 = vector.extract_strided_slice %107 {offsets = [0, 240], sizes = [32, 16], strides = [1, 1]} : vector<32x256xf32> to vector<32x16xf32>
    %115 = vector.extract_strided_slice %107 {offsets = [0, 0], sizes = [32, 240], strides = [1, 1]} : vector<32x256xf32> to vector<32x240xf32>
    %116 = tpu.concatenate %114, %115 in 1 : vector<32x16xf32>, vector<32x240xf32> -> vector<32x256xf32>
    %117 = vector.extract_strided_slice %2 {offsets = [1, 0], sizes = [1, 256], strides = [1, 1]} : vector<9x256xf32> to vector<1x256xf32>
    %118 = vector.broadcast %117 : vector<1x256xf32> to vector<32x256xf32>
    %119 = arith.mulf %116, %118 : vector<32x256xf32>
    %120 = vector.extract_strided_slice %107 {offsets = [0, 241], sizes = [32, 15], strides = [1, 1]} : vector<32x256xf32> to vector<32x15xf32>
    %121 = vector.extract_strided_slice %107 {offsets = [0, 0], sizes = [32, 241], strides = [1, 1]} : vector<32x256xf32> to vector<32x241xf32>
    %122 = tpu.concatenate %120, %121 in 1 : vector<32x15xf32>, vector<32x241xf32> -> vector<32x256xf32>
    %123 = vector.extract_strided_slice %2 {offsets = [2, 0], sizes = [1, 256], strides = [1, 1]} : vector<9x256xf32> to vector<1x256xf32>
    %124 = vector.broadcast %123 : vector<1x256xf32> to vector<32x256xf32>
    %125 = arith.mulf %122, %124 : vector<32x256xf32>
    %126 = vector.extract_strided_slice %107 {offsets = [0, 255], sizes = [32, 1], strides = [1, 1]} : vector<32x256xf32> to vector<32x1xf32>
    %127 = vector.extract_strided_slice %107 {offsets = [0, 0], sizes = [32, 255], strides = [1, 1]} : vector<32x256xf32> to vector<32x255xf32>
    %128 = tpu.concatenate %126, %127 in 1 : vector<32x1xf32>, vector<32x255xf32> -> vector<32x256xf32>
    %129 = vector.extract_strided_slice %2 {offsets = [3, 0], sizes = [1, 256], strides = [1, 1]} : vector<9x256xf32> to vector<1x256xf32>
    %130 = vector.broadcast %129 : vector<1x256xf32> to vector<32x256xf32>
    %131 = arith.mulf %128, %130 : vector<32x256xf32>
    %132 = vector.extract_strided_slice %107 {offsets = [0, 1], sizes = [32, 255], strides = [1, 1]} : vector<32x256xf32> to vector<32x255xf32>
    %133 = vector.extract_strided_slice %107 {offsets = [0, 0], sizes = [32, 1], strides = [1, 1]} : vector<32x256xf32> to vector<32x1xf32>
    %134 = tpu.concatenate %132, %133 in 1 : vector<32x255xf32>, vector<32x1xf32> -> vector<32x256xf32>
    %135 = vector.extract_strided_slice %2 {offsets = [5, 0], sizes = [1, 256], strides = [1, 1]} : vector<9x256xf32> to vector<1x256xf32>
    %136 = vector.broadcast %135 : vector<1x256xf32> to vector<32x256xf32>
    %137 = arith.mulf %134, %136 : vector<32x256xf32>
    %138 = vector.extract_strided_slice %107 {offsets = [0, 15], sizes = [32, 241], strides = [1, 1]} : vector<32x256xf32> to vector<32x241xf32>
    %139 = vector.extract_strided_slice %107 {offsets = [0, 0], sizes = [32, 15], strides = [1, 1]} : vector<32x256xf32> to vector<32x15xf32>
    %140 = tpu.concatenate %138, %139 in 1 : vector<32x241xf32>, vector<32x15xf32> -> vector<32x256xf32>
    %141 = vector.extract_strided_slice %2 {offsets = [6, 0], sizes = [1, 256], strides = [1, 1]} : vector<9x256xf32> to vector<1x256xf32>
    %142 = vector.broadcast %141 : vector<1x256xf32> to vector<32x256xf32>
    %143 = arith.mulf %140, %142 : vector<32x256xf32>
    %144 = vector.extract_strided_slice %107 {offsets = [0, 16], sizes = [32, 240], strides = [1, 1]} : vector<32x256xf32> to vector<32x240xf32>
    %145 = vector.extract_strided_slice %107 {offsets = [0, 0], sizes = [32, 16], strides = [1, 1]} : vector<32x256xf32> to vector<32x16xf32>
    %146 = tpu.concatenate %144, %145 in 1 : vector<32x240xf32>, vector<32x16xf32> -> vector<32x256xf32>
    %147 = vector.extract_strided_slice %2 {offsets = [7, 0], sizes = [1, 256], strides = [1, 1]} : vector<9x256xf32> to vector<1x256xf32>
    %148 = vector.broadcast %147 : vector<1x256xf32> to vector<32x256xf32>
    %149 = arith.mulf %146, %148 : vector<32x256xf32>
    %150 = vector.extract_strided_slice %107 {offsets = [0, 17], sizes = [32, 239], strides = [1, 1]} : vector<32x256xf32> to vector<32x239xf32>
    %151 = vector.extract_strided_slice %107 {offsets = [0, 0], sizes = [32, 17], strides = [1, 1]} : vector<32x256xf32> to vector<32x17xf32>
    %152 = tpu.concatenate %150, %151 in 1 : vector<32x239xf32>, vector<32x17xf32> -> vector<32x256xf32>
    %153 = vector.extract_strided_slice %2 {offsets = [8, 0], sizes = [1, 256], strides = [1, 1]} : vector<9x256xf32> to vector<1x256xf32>
    %154 = vector.broadcast %153 : vector<1x256xf32> to vector<32x256xf32>
    %155 = arith.mulf %152, %154 : vector<32x256xf32>
    %156 = tpu.concatenate %113, %119, %125, %131, %107, %137, %143, %149, %155 in 0 : vector<32x256xf32>, vector<32x256xf32>, vector<32x256xf32>, vector<32x256xf32>, vector<32x256xf32>, vector<32x256xf32>, vector<32x256xf32>, vector<32x256xf32>, vector<32x256xf32> -> vector<288x256xf32>
    %157 = arith.truncf %156 : vector<288x256xf32> to vector<288x256xbf16>
    %c0_19 = arith.constant 0 : index
    %c0_20 = arith.constant 0 : index
    %158 = vector.load %arg3[%c0_19, %c0_20] : memref<32x288xbf16, #tpu.memory_space<vmem>>, vector<32x288xbf16>
    %cst_21 = arith.constant dense<0.000000e+00> : vector<32x256xf32>
    %159 = tpu.matmul %158, %157, %cst_21 {dimension_numbers = #tpu.dot_dimension_numbers<[1], [0], [0], [1], [0, 0, 1, 1], [], []>} : vector<32x288xbf16>, vector<288x256xbf16>, vector<32x256xf32> -> vector<32x256xf32>
    %160 = vector.broadcast %8 : vector<32x1xf32> to vector<32x256xf32>
    %161 = arith.addf %159, %160 : vector<32x256xf32>
    %cst_22 = arith.constant dense<0.000000e+00> : vector<32xf32>
    %162 = vector.multi_reduction <add>, %161, %cst_22 [1] : vector<32x256xf32> to vector<32xf32>
    %163 = vector.shape_cast %162 : vector<32xf32> to vector<32x1xf32>
    %164 = arith.mulf %161, %161 : vector<32x256xf32>
    %cst_23 = arith.constant dense<0.000000e+00> : vector<32xf32>
    %165 = vector.multi_reduction <add>, %164, %cst_23 [1] : vector<32x256xf32> to vector<32xf32>
    %166 = vector.shape_cast %165 : vector<32xf32> to vector<32x1xf32>
    %167 = tpu.concatenate %163, %166 in 1 : vector<32x1xf32>, vector<32x1xf32> -> vector<32x2xf32>
    %cst_24 = arith.constant dense<0.000000e+00> : vector<32x2xf32>
    %168 = tpu.matmul %3, %167, %cst_24 {dimension_numbers = #tpu.dot_dimension_numbers<[1], [0], [0], [1], [0, 0, 1, 1], [], []>} : vector<32x32xf32>, vector<32x2xf32>, vector<32x2xf32> -> vector<32x2xf32>
    %169 = vector.extract_strided_slice %168 {offsets = [0, 0], sizes = [32, 1], strides = [1, 1]} : vector<32x2xf32> to vector<32x1xf32>
    %170 = vector.extract_strided_slice %168 {offsets = [0, 1], sizes = [32, 1], strides = [1, 1]} : vector<32x2xf32> to vector<32x1xf32>
    %171 = arith.mulf %169, %169 : vector<32x1xf32>
    %172 = arith.subf %170, %171 : vector<32x1xf32>
    %cst_25 = arith.constant 0.000000e+00 : f32
    %173 = vector.broadcast %cst_25 : f32 to vector<32x1xf32>
    %174 = arith.maximumf %172, %173 : vector<32x1xf32>
    %175 = vector.broadcast %169 : vector<32x1xf32> to vector<32x256xf32>
    %176 = arith.subf %161, %175 : vector<32x256xf32>
    %cst_26 = arith.constant 9.99999974E-6 : f32
    %177 = vector.broadcast %cst_26 : f32 to vector<32x1xf32>
    %178 = arith.addf %174, %177 : vector<32x1xf32>
    %179 = math.rsqrt %178 : vector<32x1xf32>
    %180 = vector.broadcast %179 : vector<32x1xf32> to vector<32x256xf32>
    %181 = arith.mulf %176, %180 : vector<32x256xf32>
    %182 = vector.broadcast %9 : vector<32x1xf32> to vector<32x256xf32>
    %183 = arith.mulf %181, %182 : vector<32x256xf32>
    %184 = vector.broadcast %10 : vector<32x1xf32> to vector<32x256xf32>
    %185 = arith.addf %183, %184 : vector<32x256xf32>
    %186 = arith.negf %185 : vector<32x256xf32>
    %187 = math.exp %186 : vector<32x256xf32>
    %cst_27 = arith.constant 1.000000e+00 : f32
    %188 = vector.broadcast %cst_27 : f32 to vector<32x256xf32>
    %189 = arith.addf %188, %187 : vector<32x256xf32>
    %190 = arith.divf %188, %189 : vector<32x256xf32>
    %191 = arith.mulf %185, %190 : vector<32x256xf32>
    %192 = vector.extract_strided_slice %63 {offsets = [32, 0], sizes = [32, 256], strides = [1, 1]} : vector<64x256xf32> to vector<32x256xf32>
    %193 = vector.broadcast %11 : vector<32x1xf32> to vector<32x256xf32>
    %194 = arith.addf %192, %193 : vector<32x256xf32>
    %195 = arith.addf %191, %194 : vector<32x256xf32>
    %c0_28 = arith.constant 0 : index
    %c0_29 = arith.constant 0 : index
    %c0_30 = arith.constant 0 : index
    %196 = vector.load %arg8[%c0_28, %c0_29, %c0_30] : memref<1x32x256xf32, #tpu.memory_space<vmem>>, vector<1x32x256xf32>
    %197 = vector.shape_cast %196 : vector<1x32x256xf32> to vector<32x256xf32>
    %198 = vector.shape_cast %195 : vector<32x256xf32> to vector<1x32x256xf32>
    tpu.vector_store %arg8[%c0_28, %c0_29, %c0_30], %198 {strides = array<i32>} : memref<1x32x256xf32, #tpu.memory_space<vmem>>, vector<1x32x256xf32>,
    return
  }
  func.func @transform_0(%arg0: i32) -> (i32, i32, i32) {
    %c0_i32 = arith.constant 0 : i32
    %c0_i32_0 = arith.constant 0 : i32
    %c0_i32_1 = arith.constant 0 : i32
    return %arg0, %c0_i32, %c0_i32_0 : i32, i32, i32
  }
  func.func @transform_1(%arg0: i32) -> (i32, i32) {
    %c0_i32 = arith.constant 0 : i32
    %c0_i32_0 = arith.constant 0 : i32
    %c0_i32_1 = arith.constant 0 : i32
    return %c0_i32, %c0_i32_0 : i32, i32
  }
  func.func @transform_2(%arg0: i32) -> (i32, i32) {
    %c0_i32 = arith.constant 0 : i32
    %c0_i32_0 = arith.constant 0 : i32
    %c0_i32_1 = arith.constant 0 : i32
    return %c0_i32, %c0_i32_0 : i32, i32
  }
  func.func @transform_3(%arg0: i32) -> (i32, i32) {
    %c0_i32 = arith.constant 0 : i32
    %c0_i32_0 = arith.constant 0 : i32
    %c0_i32_1 = arith.constant 0 : i32
    return %c0_i32, %c0_i32_0 : i32, i32
  }
  func.func @transform_4(%arg0: i32) -> (i32, i32, i32) {
    %c0_i32 = arith.constant 0 : i32
    %c0_i32_0 = arith.constant 0 : i32
    %c0_i32_1 = arith.constant 0 : i32
    %c0_i32_2 = arith.constant 0 : i32
    return %c0_i32, %c0_i32_0, %c0_i32_1 : i32, i32, i32
  }
  func.func @transform_5(%arg0: i32) -> (i32, i32) {
    %c0_i32 = arith.constant 0 : i32
    %c0_i32_0 = arith.constant 0 : i32
    %c0_i32_1 = arith.constant 0 : i32
    return %c0_i32, %c0_i32_0 : i32, i32
  }
  func.func @transform_6(%arg0: i32) -> (i32, i32) {
    %c0_i32 = arith.constant 0 : i32
    %c0_i32_0 = arith.constant 0 : i32
    %c0_i32_1 = arith.constant 0 : i32
    return %c0_i32, %c0_i32_0 : i32, i32
  }
  func.func @transform_7(%arg0: i32) -> (i32, i32, i32) {
    %c0_i32 = arith.constant 0 : i32
    %c0_i32_0 = arith.constant 0 : i32
    %c0_i32_1 = arith.constant 0 : i32
    return %arg0, %c0_i32, %c0_i32_0 : i32, i32, i32
  }
}

</mosaic_0001>

<bundles_post_ra>
// kernel: tpu_custom_call.1
= control target key start
LH: loop header
LB: loop body
LE: loop exit
PB: predicated region body
PF: predicated region fallthrough
CT: control target
= control target key end

     0   :  { %6 = vsyncpa [#allocation3], 0  ;;  %s106_s0 = inlined_call_operand.hbm [shape: f32[8,128], index: 0, kind: input, shape index: {}]   ;;  %s107_s1 = inlined_call_operand.hbm [shape: f32[8,128], index: 1, kind: output, shape index: {}]  }
   0x1   :  { %7 = vsyncpa [#allocation4], 0  ;;  %s87_s6 = smov [#allocation2]  }
   0x2   :  { %s14_s7 = sshll.u32 %s87_s6, 4  ;;  %s15_s7 = int_to_ptr.vmem [resolvable:$true] %s14_s7 }
   0x3   :  { %s51_s8 = scalar_lea.vmem %s15_s7, 128  ;;  %p56_p1 = scmp.lt.s32.totalorder %s15_s7, %s15_s7 }
   0x4   :  { %p52_p0 = scmp.ne.s32.totalorder %s15_s7, %s51_s8  ;;  %p57_p2 = scmp.lt.s32.totalorder %s51_s8, %s51_s8 }
   0x6   :  { %p58_p3 = por %p57_p2, %p56_p1 }
   0x8   :  { %p59_p4 = pnand %p58_p3, %p52_p0 }
   0xa   :  { %62 = shalt.err (!%p59_p4)
}
   0xb   :  { %17 = dma.hbm_to_vmem [thread:$0]  %s106_s0, 128, %s15_s7, [#allocation3]  }
   0xc   :  { %83 = dma.done.wait [#allocation3], 128  }
   0xd   :  { %84 = vsyncadd [#allocation3], 4294967168  ;;  %v21_v0 = vld [vmem:[#allocation2] sm:$0xff]  ;;  %s88_s11 = smov 3   ;;  %s89_s12 = smov [#allocation5]  }
   0xe   :  { %22 = vrot.lane.b32.xlu0 %v21_v0, %s88_s11  ;;  %s31_s13 = sshll.u32 %s89_s12, 4  ;;  %s32_s13 = int_to_ptr.vmem [resolvable:$true] %s31_s13 }
   0xf   :  { %s63_s14 = scalar_lea.vmem %s32_s13, 128  ;;  %p68_p6 = scmp.lt.s32.totalorder %s32_s13, %s32_s13 }
  0x10   :  { %p64_p5 = scmp.ne.s32.totalorder %s32_s13, %s63_s14  ;;  %p69_p7 = scmp.lt.s32.totalorder %s63_s14, %s63_s14 }
  0x12   :  { %p70_p8 = por %p69_p7, %p68_p6 }
  0x14   :  { %p71_p9 = pnand %p70_p8, %p64_p5 }
  0x80   :  { %v23_v1 = vpop.permute.xlu0 %22 }
  0x81   :  { %24 = vst [vmem:[#allocation5] sm:$0xff] %v23_v1 }
  0x82   :  { %74 = shalt.err (!%p71_p9)
}
  0x83   :  { %34 = dma.vmem_to_hbm [thread:$0]  %s32_s13, 128, %s107_s1, [#allocation4]  }
  0x84   :  { %85 = dma.done.wait [#allocation4], 128  }
  0x85   :  { %86 = vsyncadd [#allocation4], 4294967168 }
  0x86   :  { %38 = vsyncpa [#allocation3], 1 }
  0x87   :  { %39 = vsyncpa [#allocation4], 1 }

// kernel: block_forward.1
= control target key start
LH: loop header
LB: loop body
LE: loop exit
PB: predicated region body
PF: predicated region fallthrough
CT: control target
= control target key end

     0   :  { %s2304_s24 = smov 0   ;;  %s3190_s0 = inlined_call_operand.vmem [shape: f32[2,8,256], index: 0, kind: input, shape index: {}]   ;;  %s3191_s1 = inlined_call_operand.vmem [shape: bf16[64,72], index: 1, kind: input, shape index: {}]   ;;  %s3192_s2 = inlined_call_operand.vmem [shape: bf16[32,288], index: 2, kind: input, shape index: {}]   ;;  %s3193_s3 = inlined_call_operand.vmem [shape: f32[32,8], index: 3, kind: input, shape index: {}]   ;;  %s3194_s4 = inlined_call_operand.vmem [shape: f32[2,32,2], index: 4, kind: input, shape index: {}]   ;;  %s3195_s5 = inlined_call_operand.vmem [shape: f32[32,32], index: 5, kind: input, shape index: {}]   ;;  %s3196_s6 = inlined_call_operand.vmem [shape: f32[9,256], index: 6, kind: input, shape index: {}]   ;;  %s3197_s7 = inlined_call_operand.vmem [shape: f32[2,32,256], index: 7, kind: output, shape index: {}]  }
   0x1 LB: > { %s2310_s25 = sadd.s32 4294967295, %s2247_s24   ;;  %p1991_p0 = scmp.ge.s32.totalorder %s2247_s24, 1  ;;  %s2247_s24 = sphi %s2304_s24, %s17_s24  }
   0x2   : > { %p237_p1 = scmp.lt.s32.totalorder %s2247_s24, 3 }
   0x4   : > { %p238_p2 = pnand %p1991_p0, %p237_p1 }
   0x6   : > { %241 = sbr.rel (%p238_p2) target bundleno = 2177 (0x881), region = 48 }
   0xb   : > { %p269_p3 = scmp.lt.s32.totalorder %s2310_s25, 1  ;;  %s2249_s8 = smov 113   ;;  %v3200_v2 = vmov 0   ;;  %v2364_v3 = vld [vmem:[%s3193_s3 + $0x18] sm:$0xff]  ;;  %v2369_v4 = vld [vmem:[%s3193_s3 + $0x10] sm:$0xff]  ;;  %v2376_v5 = vld [vmem:[%s3193_s3] sm:$0xff]  ;;  %v306_v7 = vlaneseq }
   0xc   : > { %s2250_s9 = smov 111   ;;  %s2251_s10 = smov 112   ;;  %546 = vmatprep.mubr.bf16.mxu0 %v3200_v2  ;;  %2111 = vset.pattern.permute.xlu0 %v3200_v2  ;;  %v2381_v6 = vld [vmem:[%s3193_s3 + $0x8] sm:$0xff]  ;;  %v2391_v12 = vld [vmem:[%s3196_s6] sm:$0xff]  ;;  %vm440_vm0 = vcmask 908288   ;;  %vm400_vm1 = vcmask 924672  }
   0xd   : > { %s2316_s26 = scalar_select %p269_p3, %s2310_s25, 1  ;;  %2112 = vset.pattern.permute.xlu1 %v3200_v2  ;;  %v2385_v8 = vshrl.u32 %v306_v7, 7  ;;  %v2397_v14 = vld [vmem:[%s3196_s6 + $0x8] sm:$0xff]  ;;  %v1997_v15 = vld [vmem:[%s3196_s6 + $0x18] ss:$0 sm:$0xff]  ;;  %vm420_vm2 = vcmask 916480  }
   0xe   : > { %s2252_s11 = smov 127   ;;  %s2253_s12 = smov 15   ;;  %v1996_v16 = vld [vmem:[%s3196_s6 + $0x10] ss:$0 sm:$0xff]  ;;  %vm507_vm3 = vcmask 1043456   ;;  %vm380_vm4 = vcmask 1039360  }
   0xf   : > { %s2042_s27 = sshll.u32 %s2316_s26, 4  ;;  %s2254_s13 = smov 1   ;;  %v408_v11 = vsub.s32 6, %v2385_v8  ;;  %v428_v13 = vsub.s32 7, %v2385_v8  ;;  %v388_v20 = vsub.s32 5, %v2385_v8  ;;  %v348_v49 = vsub.s32 2, %v2385_v8 }
  0x10   : > { %s273_s30 = scalar_lea.vmem %s3190_s0, %s2042_s27  ;;  %s2256_s14 = smov 17   ;;  %v368_v52 = vsub.s32 3, %v2385_v8  ;;  %vm341_vm5 = vcmask 121856   ;;  %vm361_vm6 = vcmask 7168   ;;  %vm301_vm7 = vcmask 138240  }
  0x11   : > { %v2322_v0 = vld [vmem:[%s273_s30] sm:$0xff]  ;;  %v2324_v1 = vld [vmem:[%s273_s30 + $0x8] sm:$0xff]  ;;  %s2257_s15 = smov 16   ;;  %v2406_v17 = vrot.slane %v2391_v12, %v408_v11  ;;  %v2410_v21 = vrot.slane %v2397_v14, %v408_v11  ;;  %v2414_v23 = vrot.slane %v2391_v12, %v428_v13  ;;  %v2419_v26 = vrot.slane %v2397_v14, %v428_v13  ;;  %s2019_s27 = sshll.u32 %s2310_s25, 5 }
  0x12   : > { %396 = vrot.lane.b32.xlu1 %v2322_v0, %s2249_s8  ;;  %436 = vrot.lane.b32.xlu0 %v2322_v0, %s2250_s9  ;;  %v2423_v34 = vrot.slane %v2391_v12, %v388_v20  ;;  %v2429_v38 = vrot.slane %v2397_v14, %v388_v20  ;;  %v2443_v57 = vrot.slane %v2391_v12, %v348_v49  ;;  %vm321_vm8 = vcmask 130048   ;;  %s946_s30 = scalar_lea.vmem %s3194_s4, %s2019_s27  ;;  %s2043_s19 = sshll.u32 %s2316_s26, 6 }
  0x13   : > { %v2446_v58 = vrot.slane %v2397_v14, %v348_v49  ;;  %v2449_v59 = vrot.slane %v2391_v12, %v368_v52  ;;  %v2452_v60 = vrot.slane %v2397_v14, %v368_v52  ;;  %vm494_vm9 = vcmask 588800   ;;  %s3163_s22 = scalar_lea.vmem %s3197_s7, %s2043_s19 }
  0x14   : > { %vm651_vm10 = vcmask 261120  }
  0x16   : > { %398 = vrot.lane.b32.xlu1 %v2324_v1, %s2249_s8  ;;  %438 = vrot.lane.b32.xlu0 %v2324_v1, %s2250_s9 }
  0x1a   : > { %418 = vrot.lane.b32.xlu1 %v2324_v1, %s2251_s10  ;;  %416 = vrot.lane.b32.xlu0 %v2322_v0, %s2251_s10 }
  0x1e   : > { %378 = vrot.lane.b32.xlu1 %v2324_v1, %s2252_s11  ;;  %376 = vrot.lane.b32.xlu0 %v2322_v0, %s2252_s11 }
  0x22   : > { %339 = vrot.lane.b32.xlu1 %v2322_v0, %s2253_s12  ;;  %336 = vrot.lane.b32.xlu0 %v2324_v1, %s2253_s12 }
  0x26   : > { %359 = vrot.lane.b32.xlu1 %v2322_v0, %s2254_s13  ;;  %356 = vrot.lane.b32.xlu0 %v2324_v1, %s2254_s13 }
  0x2a   : > { %299 = vrot.lane.b32.xlu1 %v2322_v0, %s2256_s14  ;;  %295 = vrot.lane.b32.xlu0 %v2324_v1, %s2256_s14 }
  0x2e   : > { %319 = vrot.lane.b32.xlu1 %v2322_v0, %s2257_s15  ;;  %316 = vrot.lane.b32.xlu0 %v2324_v1, %s2257_s15 }
  0x32   : > { %604 = vperm.xlu0 %2111, %v2364_v3   ;;  %599 = vperm.xlu1 %2112, %v2369_v4  }
  0x36   : > { %589 = vperm.xlu0 %2111, %v2376_v5   ;;  %594 = vperm.xlu1 %2112, %v2381_v6  }
  0x84   : > { %v397_v9 = vpop.permute.xlu1 %396  ;;  %v437_v10 = vpop.permute.xlu0 %436 }
  0x88   : > { %v399_v18 = vpop.permute.xlu1 %398  ;;  %v439_v19 = vpop.permute.xlu0 %438 }
  0x89   : > { %v441_v22 = vsel %vm440_vm0, %v437_v10, %v439_v19  ;;  %v445_v24 = vsel %vm440_vm0, %v439_v19, %v437_v10  ;;  %v401_v25 = vsel %vm400_vm1, %v397_v9, %v399_v18  ;;  %v405_v29 = vsel %vm400_vm1, %v399_v18, %v397_v9 }
  0x8a   : > { %v455_v27 = vmul.f32 %v1997_v15, %v445_v24  ;;  %v454_v28 = vmul.f32 %v1996_v16, %v441_v22  ;;  %v414_v35 = vmul.f32 %v2406_v17, %v401_v25  ;;  %v415_v39 = vmul.f32 %v2410_v21, %v405_v29 }
  0x8b   : > { %v308_v9 = vsub.s32 0, %v2385_v8  ;;  %v328_v10 = vsub.s32 1, %v2385_v8 }
  0x8c   : > { %v419_v30 = vpop.permute.xlu1 %418  ;;  %v417_v31 = vpop.permute.xlu0 %416  ;;  %v465_v32 = vpack.c.bf16 %v455_v27, %v455_v27  ;;  %v464_v33 = vpack.c.bf16 %v454_v28, %v454_v28 }
  0x8d   : > { %v421_v36 = vsel %vm420_vm2, %v417_v31, %v419_v30  ;;  %v425_v37 = vsel %vm420_vm2, %v419_v30, %v417_v31  ;;  %v2465_v24 = vrot.slane %v2391_v12, %v308_v9  ;;  %v2468_v25 = vrot.slane %v2397_v14, %v308_v9 }
  0x8e   : > { %v434_v40 = vmul.f32 %v2414_v23, %v421_v36  ;;  %v435_v41 = vmul.f32 %v2419_v26, %v425_v37  ;;  %2002 = vmatprep.subr.msk.bf16.mxu0 %vm507_vm3, %v465_v32  ;;  %v509_v42 = vsel %vm507_vm3, %v464_v33, 0  ;;  %v2471_v8 = vrot.slane %v2391_v12, %v328_v10 }
  0x8f   : > { %521 = vmatpush1.bf16.msra.mxu0 %v509_v42  ;;  %v2474_v27 = vrot.slane %v2397_v14, %v328_v10 }
  0x90   : > { %v379_v43 = vpop.permute.xlu1 %378  ;;  %v377_v44 = vpop.permute.xlu0 %376  ;;  %v463_v45 = vpack.c.bf16 %v435_v41, %v415_v39  ;;  %v462_v46 = vpack.c.bf16 %v434_v40, %v414_v35  ;;  %v2139_v40 = vld [vmem:[%s3191_s1] sm:$0xff]   ;;  %v2140_v41 = vld [vmem:[%s3191_s1 + $0x8] sm:$0xff]  }
  0x91   : > { %v381_v47 = vsel %vm380_vm4, %v377_v44, %v379_v43  ;;  %v385_v48 = vsel %vm380_vm4, %v379_v43, %v377_v44 }
  0x92   : > { %v394_v50 = vmul.f32 %v2423_v34, %v381_v47  ;;  %v395_v51 = vmul.f32 %v2429_v38, %v385_v48  ;;  %522 = vmatprep.subr.bf16.mxu0 %v463_v45 }
  0x93   : > { %523 = vmatpush1.bf16.msra.mxu0 %v462_v46 }
  0x94   : > { %v340_v53 = vpop.permute.xlu1 %339  ;;  %v337_v54 = vpop.permute.xlu0 %336  ;;  %v461_v55 = vpack.c.bf16 %v395_v51, %v2324_v1  ;;  %v460_v56 = vpack.c.bf16 %v394_v50, %v2322_v0 }
  0x95   : > { %v342_v61 = vsel %vm341_vm5, %v340_v53, %v337_v54  ;;  %v345_v62 = vsel %vm341_vm5, %v337_v54, %v340_v53 }
  0x96   : > { %524 = vmatprep.subr.bf16.mxu0 %v461_v55  ;;  %v354_v11 = vmul.f32 %v2443_v57, %v345_v62  ;;  %v355_v13 = vmul.f32 %v2446_v58, %v342_v61 }
  0x97   : > { %525 = vmatpush1.bf16.msra.mxu0 %v460_v56 }
  0x98   : > { %v360_v63 = vpop.permute.xlu1 %359  ;;  %v357_v0 = vpop.permute.xlu0 %356 }
  0x99   : > { %v362_v1 = vsel %vm361_vm6, %v360_v63, %v357_v0  ;;  %v365_v7 = vsel %vm361_vm6, %v357_v0, %v360_v63 }
  0x9a   : > { %v374_v15 = vmul.f32 %v2449_v59, %v365_v7  ;;  %v375_v16 = vmul.f32 %v2452_v60, %v362_v1 }
  0x9c   : > { %v300_v18 = vpop.permute.xlu1 %299  ;;  %v296_v19 = vpop.permute.xlu0 %295  ;;  %v459_v20 = vpack.c.bf16 %v375_v16, %v355_v13  ;;  %v458_v22 = vpack.c.bf16 %v374_v15, %v354_v11  ;;  %v2141_v13 = vld [vmem:[%s3191_s1 + $0x10] sm:$0xff]  }
  0x9d   : > { %v302_v28 = vsel %vm301_vm7, %v300_v18, %v296_v19  ;;  %v305_v29 = vsel %vm301_vm7, %v296_v19, %v300_v18 }
  0x9e   : > { %526 = vmatprep.subr.bf16.mxu0 %v459_v20  ;;  %v314_v35 = vmul.f32 %v2465_v24, %v305_v29  ;;  %v315_v36 = vmul.f32 %v2468_v25, %v302_v28 }
  0x9f   : > { %527 = vmatpush1.bf16.msra.mxu0 %v458_v22 }
  0xa0   : > { %v320_v30 = vpop.permute.xlu1 %319  ;;  %v317_v31 = vpop.permute.xlu0 %316 }
  0xa1   : > { %v322_v32 = vsel %vm321_vm8, %v320_v30, %v317_v31  ;;  %v325_v33 = vsel %vm321_vm8, %v317_v31, %v320_v30 }
  0xa2   : > { %v334_v12 = vmul.f32 %v2471_v8, %v325_v33  ;;  %v335_v14 = vmul.f32 %v2474_v27, %v322_v32  ;;  %v2142_v32 = vld [vmem:[%s3191_s1 + $0x18] sm:$0xff]  }
  0xa4   : > { %v457_v37 = vpack.c.bf16 %v335_v14, %v315_v36  ;;  %v456_v39 = vpack.c.bf16 %v334_v12, %v314_v35  ;;  %v286_v36 = vld [vmem:[%s3195_s5] sm:$0xff] }
  0xa6   : > { %528 = vmatprep.subr.bf16.mxu0 %v457_v37 }
  0xa7   : > { %529 = vmatpush1.bf16.msra.mxu0 %v456_v39 }
  0xaa   : > { %2003 = vmatmul.mubr.msk.bf16.vlgmr.msra.gmra.mxu0 %vm494_vm9, %v2139_v40 }
  0xab   : > { %556 = vmatprep.mubr.bf16.mxu0 %v3200_v2 }
  0xad   : > { %v600_v46 = vpop.permute.xlu1 %599  ;;  %v605_v51 = vpop.permute.xlu0 %604 }
  0xb1   : > { %v595_v61 = vpop.permute.xlu1 %594  ;;  %v590_v11 = vpop.permute.xlu0 %589 }
  0xb2   : > { %2004 = vmatmul.mubr.msk.bf16.gmra.mxu0 %vm494_vm9, %v2140_v41 }
  0xb3   : > { %566 = vmatprep.mubr.bf16.mxu0 %v3200_v2 }
  0xba   : > { %2005 = vmatmul.mubr.msk.bf16.gmra.mxu0 %vm494_vm9, %v2141_v13 }
  0xbb   : > { %576 = vmatprep.mubr.bf16.mxu0 %v3200_v2 }
  0xc2   : > { %2006 = vmatmul.mubr.msk.bf16.gmra.mxu0 %vm494_vm9, %v2142_v32 }
  0xc3   : > { %2068 = vmatprep.mubr.msk.f32.mxu0 %vm651_vm10, %v286_v36 }
 0x16a   : > { %v548_v42 = vpop.f32.mrf.mxu0 }
 0x16b   : > { %v2526_v20 = vadd.f32 %v590_v11, %v548_v42 }
 0x16c   : > { %v550_v43 = vpop.f32.mrf.mxu0 }
 0x16d   : > { %v2519_v15 = vadd.f32 %v590_v11, %v550_v43  ;;  %v627_v31 = vmul.f32 %v2526_v20, %v2526_v20 }
 0x16e   : > { %v552_v44 = vpop.f32.mrf.mxu0 }
 0x16f   : > { %v2510_v7 = vadd.f32 %v595_v61, %v552_v44  ;;  %v628_v30 = vmul.f32 %v2519_v15, %v2519_v15  ;;  %v615_v35 = vadd.f32 %v2519_v15, %v2526_v20 }
 0x170   : > { %v554_v45 = vpop.f32.mrf.mxu0 }
 0x171   : > { %v2506_v63 = vadd.f32 %v595_v61, %v554_v45  ;;  %v629_v22 = vmul.f32 %v2510_v7, %v2510_v7  ;;  %v635_v33 = vadd.f32 %v628_v30, %v627_v31  ;;  %v2258_v30 = vmov 2  }
 0x172   : > { %v558_v47 = vpop.f32.mrf.mxu0  ;;  %v3198_v31 = vmov 1  }
 0x173   : > { %v2494_v48 = vadd.f32 %v600_v46, %v558_v47  ;;  %v630_v19 = vmul.f32 %v2506_v63, %v2506_v63  ;;  %v618_v28 = vadd.f32 %v2506_v63, %v2510_v7 }
 0x174   : > { %v560_v49 = vpop.f32.mrf.mxu0 }
 0x175   : > { %v2496_v50 = vadd.f32 %v600_v46, %v560_v49  ;;  %v631_v55 = vmul.f32 %v2494_v48, %v2494_v48  ;;  %v638_v29 = vadd.f32 %v630_v19, %v629_v22  ;;  %v287_v49 = vld [vmem:[%s3195_s5 + $0x8] sm:$0xff] }
 0x176   : > { %v562_v52 = vpop.f32.mrf.mxu0 }
 0x177   : > { %v2498_v53 = vadd.f32 %v605_v51, %v562_v52  ;;  %v621_v54 = vadd.f32 %v2496_v50, %v2494_v48  ;;  %v632_v56 = vmul.f32 %v2496_v50, %v2496_v50  ;;  %v289_v52 = vld [vmem:[%s3195_s5 + $0x18] sm:$0xff] }
 0x178   : > { %v564_v62 = vpop.f32.mrf.mxu0 }
 0x179   : > { %v2508_v0 = vadd.f32 %v605_v51, %v564_v62  ;;  %622 = vadd.xlane.f32.xlu0 %v621_v54  ;;  %v641_v1 = vadd.f32 %v632_v56, %v631_v55  ;;  %v633_v9 = vmul.f32 %v2498_v53, %v2498_v53  ;;  %v288_v51 = vld [vmem:[%s3195_s5 + $0x10] sm:$0xff] }
 0x17a   : > { %v2564_v54 = vpop.f32.mrf.mxu0 }
 0x17b   : > { %642 = vadd.xlane.f32.xlu1 %v641_v1  ;;  %v634_v10 = vmul.f32 %v2508_v0, %v2508_v0  ;;  %v624_v18 = vadd.f32 %v2508_v0, %v2498_v53  ;;  %3208 = vst [vmem:[#allocation2_spill] sm:$0xff] %v2564_v54 }
 0x17c   : > { %v2566_v55 = vpop.f32.mrf.mxu0 }
 0x17d   : > { %v644_v16 = vadd.f32 %v634_v10, %v633_v9  ;;  %3209 = vst [vmem:[#allocation3_spill] sm:$0xff] %v2566_v55 }
 0x17e   : > { %v2568_v56 = vpop.f32.mrf.mxu0 }
 0x17f   : > { %645 = vadd.xlane.f32.xlu0 %v644_v16  ;;  %625 = vadd.xlane.f32.xlu1 %v624_v18  ;;  %3210 = vst [vmem:[#allocation4_spill] sm:$0xff] %v2568_v56 }
 0x180   : > { %v2570_v61 = vpop.f32.mrf.mxu0 }
 0x181   : > { %3211 = vst [vmem:[#allocation5_spill] sm:$0xff] %v2570_v61 }
 0x182   : > { %v2572_v62 = vpop.f32.mrf.mxu0 }
 0x183   : > { %619 = vadd.xlane.f32.xlu0 %v618_v28  ;;  %639 = vadd.xlane.f32.xlu1 %v638_v29  ;;  %3212 = vst [vmem:[#allocation6_spill] sm:$0xff] %v2572_v62 }
 0x184   : > { %v2574_v1 = vpop.f32.mrf.mxu0 }
 0x185   : > { %3213 = vst [vmem:[#allocation7_spill] sm:$0xff] %v2574_v1 }
 0x186   : > { %v2576_v9 = vpop.f32.mrf.mxu0 }
 0x187   : > { %636 = vadd.xlane.f32.xlu1 %v635_v33  ;;  %616 = vadd.xlane.f32.xlu0 %v615_v35  ;;  %3214 = vst [vmem:[#allocation8_spill] sm:$0xff] %v2576_v9 }
 0x188   : > { %v2578_v10 = vpop.f32.mrf.mxu0 }
 0x189   : > { %3215 = vst [vmem:[#allocation9_spill] sm:$0xff] %v2578_v10 }
 0x202   : > { %v623_v12 = vpop.xlane.xlu0 %622 }
 0x204   : > { %v643_v14 = vpop.xlane.xlu1 %642 }
 0x205   : > { %v649_v41 = vsel %vm361_vm6, %v623_v12, %v643_v14 }
 0x208   : > { %v626_v37 = vpop.xlane.xlu1 %625  ;;  %v646_v39 = vpop.xlane.xlu0 %645 }
 0x209   : > { %v650_v40 = vsel %vm361_vm6, %v626_v37, %v646_v39 }
 0x20a   : > { %2060 = vmatprep.subr.mxu0 %v650_v40 }
 0x20b   : > { %2061 = vmatpush3.msra.mxu0 %v650_v40 }
 0x20c   : > { %v640_v42 = vpop.xlane.xlu1 %639  ;;  %2062 = vmatprep.subr.mxu0 %v649_v41  ;;  %v620_v43 = vpop.xlane.xlu0 %619 }
 0x20d   : > { %2063 = vmatpush3.msra.mxu0 %v649_v41  ;;  %v648_v44 = vsel %vm361_vm6, %v620_v43, %v640_v42 }
 0x20e   : > { %2064 = vmatprep.subr.mxu0 %v648_v44 }
 0x20f   : > { %2065 = vmatpush3.msra.mxu0 %v648_v44 }
 0x210   : > { %v637_v45 = vpop.xlane.xlu1 %636  ;;  %v617_v46 = vpop.xlane.xlu0 %616 }
 0x211   : > { %v647_v47 = vsel %vm361_vm6, %v617_v46, %v637_v45 }
 0x212   : > { %2066 = vmatprep.subr.mxu0 %v647_v47 }
 0x213   : > { %2067 = vmatpush3.msra.mxu0 %v647_v47 }
 0x214   : > { %2069 = vmatmul.mubr.msk.f32.vlgmr.msra.gmra.mxu0 %vm651_vm10, %v287_v49 }
 0x215   : > { %2071 = vmatprep.mubr.msk.f32.mxu0 %vm651_vm10, %v288_v51 }
 0x218   : > { %2072 = vmatmul.mubr.msk.f32.gmra.mxu0 %vm651_vm10, %v289_v52 }
 0x219   : > { %1552 = vmatprep.mubr.bf16.mxu0 %v3200_v2 }
 0x2d4   : > { %v2070_v11 = vpop.f32.mrf.mxu0 }
 0x2d5   : > { %v750_v29 = vmul.f32 %v2070_v11, %v2070_v11 }
 0x2d6   : > { %v730_v13 = vpop.f32.mrf.mxu0 }
 0x2d7   : > { %v749_v28 = vmul.f32 %v730_v13, %v730_v13 }
 0x2d8   : > { %v2073_v16 = vpop.f32.mrf.mxu0 }
 0x2d9   : > { %v752_v18 = vmul.f32 %v2073_v16, %v2073_v16 }
 0x2da   : > { %v740_v19 = vpop.f32.mrf.mxu0 }
 0x2db   : > { %v751_v22 = vmul.f32 %v740_v19, %v740_v19  ;;  %763 = vrot.lane.b32.xlu1 %v752_v18, %s2254_s13 }
 0x2dd   : > { %761 = vrot.lane.b32.xlu0 %v751_v22, %s2254_s13 }
 0x2df   : > { %757 = vrot.lane.b32.xlu1 %v749_v28, %s2254_s13 }
 0x2e1   : > { %759 = vrot.lane.b32.xlu0 %v750_v29, %s2254_s13  ;;  %v948_v29 = vld [vmem:[%s946_s30 + $0x8] sm:$0xff] }
 0x2e3   : > { %789 = vperm.xlu1 %2112, %v740_v19  }
 0x2e5   : > { %794 = vperm.xlu0 %2111, %v2073_v16  }
 0x2e7   : > { %779 = vperm.xlu1 %2112, %v730_v13  }
 0x2e9   : > { %2114 = vset.pattern.permute.xlu0 %v2258_v30 }
 0x2ea   : > { %874 = vperm.xlu0 %2114, %v2369_v4  }
 0x2eb   : > { %784 = vperm.xlu1 %2112, %v2070_v11  }
 0x2ee   : > { %2115 = vset.pattern.permute.xlu0 %v3198_v31 }
 0x2ef   : > { %850 = vperm.xlu0 %2115, %v2369_v4   ;;  %2113 = vset.pattern.permute.xlu1 %v3198_v31 }
 0x2f0   : > { %854 = vperm.xlu1 %2113, %v2364_v3  }
 0x34d   : > { %v764_v32 = vpop.permute.xlu1 %763 }
 0x34e   : > { %v772_v33 = vsub.f32 %v2073_v16, %v764_v32  ;;  %v950_v16 = vld [vmem:[%s946_s30 + $0x18] sm:$0xff]  ;;  %v952_v32 = vadd.f32 1.0, %v948_v29 }
 0x34f   : > { %v762_v35 = vpop.permute.xlu0 %761  ;;  %v954_v22 = vadd.f32 1.0, %v950_v16 }
 0x350   : > { %v776_v36 = vmax.f32 %v772_v33, 0.0  ;;  %v771_v45 = vsub.f32 %v740_v19, %v762_v35  ;;  %v947_v19 = vld [vmem:[%s946_s30] sm:$0xff] }
 0x351   : > { %v758_v12 = vpop.permute.xlu1 %757  ;;  %v951_v28 = vadd.f32 1.0, %v947_v19 }
 0x352   : > { %v808_v14 = vadd.f32 1e-05, %v776_v36  ;;  %v769_v37 = vsub.f32 %v730_v13, %v758_v12  ;;  %v775_v46 = vmax.f32 %v771_v45, 0.0 }
 0x353   : > { %v760_v39 = vpop.permute.xlu0 %759 }
 0x354   : > { %2151 = vrsqrt.f32 %v808_v14  ;;  %v773_v40 = vmax.f32 %v769_v37, 0.0  ;;  %v770_v41 = vsub.f32 %v2070_v11, %v760_v39  ;;  %v807_v49 = vadd.f32 1e-05, %v775_v46  ;;  %v949_v11 = vld [vmem:[%s946_s30 + $0x10] sm:$0xff] }
 0x355   : > { %v953_v13 = vadd.f32 1.0, %v949_v11 }
 0x356   : > { %v805_v42 = vadd.f32 1e-05, %v773_v40  ;;  %v774_v43 = vmax.f32 %v770_v41, 0.0 }
 0x358   : > { %2153 = vrsqrt.f32 %v805_v42  ;;  %v806_v44 = vadd.f32 1e-05, %v774_v43 }
 0x35a   : > { %2155 = vrsqrt.f32 %v806_v44 }
 0x35b   : > { %2157 = vrsqrt.f32 %v807_v49 }
 0x360   : > { %v795_v36 = vpop.permute.xlu0 %794 }
 0x361   : > { %v2152_v47 = vpop.eup %2151 }
 0x362   : > { %830 = vperm.xlu0 %2115, %v2152_v47  }
 0x365   : > { %v2154_v51 = vpop.eup %2153  ;;  %v2607_v14 = vpop.permute.xlu0 %874 }
 0x366   : > { %815 = vperm.xlu0 %2115, %v2154_v51  }
 0x367   : > { %v2156_v52 = vpop.eup %2155 }
 0x368   : > { %820 = vperm.xlu1 %2113, %v2156_v52   ;;  %v2158_v18 = vpop.eup %2157 }
 0x36a   : > { %846 = vperm.xlu0 %2115, %v2381_v6   ;;  %v2609_v39 = vpop.permute.xlu0 %850 }
 0x36c   : > { %2116 = vset.pattern.permute.xlu1 %v2258_v30 }
 0x36d   : > { %878 = vperm.xlu1 %2116, %v2364_v3  }
 0x36e   : > { %2119 = vset.pattern.permute.xlu0 %v3200_v2 }
 0x36f   : > { %967 = vperm.xlu0 %2119, %v953_v13  }
 0x371   : > { %2117 = vset.pattern.permute.xlu1 %v3198_v31 }
 0x372   : > { %842 = vperm.xlu1 %2117, %v2376_v5  }
 0x373   : > { %2122 = vset.pattern.permute.xlu0 %v3198_v31 }
 0x374   : > { %1000 = vperm.xlu0 %2122, %v950_v16  }
 0x376   : > { %825 = vperm.xlu1 %2117, %v2158_v18  }
 0x378   : > { %985 = vperm.xlu0 %2122, %v947_v19  }
 0x37a   : > { %2118 = vset.pattern.permute.xlu1 %v2258_v30  ;;  %v2605_v30 = vpop.permute.xlu1 %789 }
 0x37b   : > { %866 = vperm.xlu1 %2118, %v2376_v5  }
 0x37e   : > { %v780_v33 = vpop.permute.xlu1 %779 }
 0x37f   : > { %870 = vperm.xlu1 %2118, %v2381_v6   ;;  %v798_v44 = vsub.f32 %v2519_v15, %v780_v33  ;;  %v797_v46 = vsub.f32 %v2526_v20, %v780_v33 }
 0x382   : > { %v785_v35 = vpop.permute.xlu1 %784 }
 0x383   : > { %2120 = vset.pattern.permute.xlu1 %v3200_v2  ;;  %v799_v47 = vsub.f32 %v2510_v7, %v785_v35  ;;  %v800_v49 = vsub.f32 %v2506_v63, %v785_v35 }
 0x384   : > { %972 = vperm.xlu1 %2120, %v954_v22  }
 0x386   : > { %v855_v12 = vpop.permute.xlu1 %854 }
 0x388   : > { %2121 = vset.pattern.permute.xlu1 %v3198_v31 }
 0x389   : > { %995 = vperm.xlu1 %2121, %v949_v11  }
 0x38d   : > { %2123 = vset.pattern.permute.xlu1 %v3200_v2 }
 0x38e   : > { %957 = vperm.xlu1 %2123, %v951_v28  }
 0x392   : > { %962 = vperm.xlu1 %2123, %v952_v32  }
 0x396   : > { %2124 = vset.pattern.permute.xlu1 %v3198_v31 }
 0x397   : > { %990 = vperm.xlu1 %2124, %v948_v29  }
 0x3dd   : > { %v831_v41 = vpop.permute.xlu0 %830 }
 0x3e1   : > { %v816_v43 = vpop.permute.xlu0 %815 }
 0x3e2   : > { %v834_v51 = vmul.f32 %v816_v43, %v798_v44  ;;  %v833_v52 = vmul.f32 %v816_v43, %v797_v46 }
 0x3e3   : > { %v821_v37 = vpop.permute.xlu1 %820 }
 0x3e4   : > { %v835_v11 = vmul.f32 %v821_v37, %v799_v47  ;;  %v836_v13 = vmul.f32 %v821_v37, %v800_v49 }
 0x3e5   : > { %v847_v18 = vpop.permute.xlu0 %846 }
 0x3e6   : > { %v859_v29 = vmul.f32 %v847_v18, %v835_v11  ;;  %v860_v32 = vmul.f32 %v847_v18, %v836_v13  ;;  %v804_v11 = vsub.f32 %v2508_v0, %v795_v36 }
 0x3e8   : > { %v879_v40 = vpop.permute.xlu1 %878 }
 0x3ed   : > { %v843_v42 = vpop.permute.xlu1 %842 }
 0x3ee   : > { %v858_v16 = vmul.f32 %v843_v42, %v834_v51  ;;  %v857_v22 = vmul.f32 %v843_v42, %v833_v52 }
 0x3f1   : > { %v2612_v45 = vpop.permute.xlu1 %825 }
 0x3f6   : > { %v867_v19 = vpop.permute.xlu1 %866 }
 0x3f7   : > { %v882_v28 = vadd.f32 %v867_v19, %v858_v16  ;;  %v881_v15 = vadd.f32 %v867_v19, %v857_v22  ;;  %v840_v16 = vmul.f32 %v831_v41, %v804_v11  ;;  %v802_v22 = vsub.f32 %v2496_v50, %v2605_v30 }
 0x3f9   : > { %v2012_v31 = vmul.f32 -1.442695, %v882_v28  ;;  %v2011_v33 = vmul.f32 -1.442695, %v881_v15 }
 0x3fa   : > { %v871_v2 = vpop.permute.xlu1 %870 }
 0x3fb   : > { %v883_v1 = vadd.f32 %v871_v2, %v859_v29  ;;  %v884_v20 = vadd.f32 %v871_v2, %v860_v32  ;;  %2159 = vpow2.f32 %v2012_v31  ;;  %v803_v31 = vsub.f32 %v2498_v53, %v795_v36 }
 0x3fc   : > { %v864_v32 = vmul.f32 %v855_v12, %v840_v16  ;;  %v838_v53 = vmul.f32 %v2612_v45, %v802_v22 }
 0x3fd   : > { %v2013_v7 = vmul.f32 -1.442695, %v883_v1  ;;  %v2014_v63 = vmul.f32 -1.442695, %v884_v20  ;;  %v839_v13 = vmul.f32 %v831_v41, %v803_v31  ;;  %v801_v41 = vsub.f32 %v2494_v48, %v2605_v30 }
 0x3ff   : > { %2161 = vpow2.f32 %v2013_v7  ;;  %v2617_v35 = vpop.permute.xlu1 %972  ;;  %v863_v18 = vmul.f32 %v855_v12, %v839_v13  ;;  %v2627_v7 = vpop.permute.xlu0 %967 }
 0x400   : > { %2163 = vpow2.f32 %v2014_v63 }
 0x401   : > { %2165 = vpow2.f32 %v2011_v33  ;;  %v2625_v33 = vadd.f32 %v879_v40, %v863_v18 }
 0x403   : > { %v2017_v50 = vmul.f32 -1.442695, %v2625_v33  ;;  %v2640_v31 = vpop.permute.xlu0 %1000 }
 0x404   : > { %v2619_v51 = vpop.permute.xlu1 %995 }
 0x407   : > { %v986_v11 = vpop.permute.xlu0 %985 }
 0x408   : > { %v2160_v37 = vpop.eup %2159 }
 0x409   : > { %v914_v44 = vadd.f32 1.0, %v2160_v37  ;;  %v958_v52 = vpop.permute.xlu1 %957 }
 0x40c   : > { %v2162_v43 = vpop.eup %2161 }
 0x40d   : > { %v2164_v42 = vpop.eup %2163  ;;  %v915_v46 = vadd.f32 1.0, %v2162_v43  ;;  %v963_v19 = vpop.permute.xlu1 %962 }
 0x40e   : > { %v2166_v47 = vpop.eup %2165  ;;  %v916_v49 = vadd.f32 1.0, %v2164_v42  ;;  %v2630_v42 = vadd.f32 %v879_v40, %v864_v32 }
 0x40f   : > { %2167 = vrcp.f32 %v915_v46  ;;  %v913_v2 = vadd.f32 1.0, %v2166_v47  ;;  %v837_v46 = vmul.f32 %v2612_v45, %v801_v41  ;;  %v862_v47 = vmul.f32 %v2609_v39, %v838_v53 }
 0x410   : > { %2169 = vrcp.f32 %v916_v49  ;;  %v2018_v40 = vmul.f32 -1.442695, %v2630_v42 }
 0x411   : > { %2171 = vrcp.f32 %v914_v44  ;;  %v861_v48 = vmul.f32 %v2609_v39, %v837_v46  ;;  %v886_v30 = vadd.f32 %v2607_v14, %v862_v47 }
 0x412   : > { %2173 = vrcp.f32 %v913_v2  ;;  %v991_v36 = vpop.permute.xlu1 %990 }
 0x413   : > { %2175 = vpow2.f32 %v2017_v50  ;;  %v885_v13 = vadd.f32 %v2607_v14, %v861_v48  ;;  %v2016_v16 = vmul.f32 -1.442695, %v886_v30  ;;  %v2145_v48 = vld [vmem:[%s3192_s2 + $0x4] ss:$12 sps:$4 sm:$0xff]  }
 0x414   : > { %2177 = vpow2.f32 %v2018_v40  ;;  %1499 = vmatprep.mubr.bf16.mxu1 %v2145_v48 }
 0x415   : > { %v2015_v39 = vmul.f32 -1.442695, %v885_v13  ;;  %2179 = vpow2.f32 %v2016_v16 }
 0x417   : > { %2181 = vpow2.f32 %v2015_v39  ;;  %v2260_v39 = vmov 3  }
 0x418   : > { %2126 = vset.pattern.permute.xlu1 %v2260_v39  ;;  %2125 = vset.pattern.permute.xlu0 %v2260_v39 }
 0x41c   : > { %v2168_v29 = vpop.eup %2167 }
 0x41d   : > { %v2170_v63 = vpop.eup %2169  ;;  %v939_v37 = vmul.f32 %v2168_v29, %v883_v1 }
 0x41e   : > { %v2172_v43 = vpop.eup %2171  ;;  %v940_v0 = vmul.f32 %v2170_v63, %v884_v20 }
 0x41f   : > { %v977_v44 = vmul.f32 %v963_v19, %v939_v37  ;;  %v938_v49 = vmul.f32 %v2172_v43, %v882_v28  ;;  %v2174_v1 = vpop.eup %2173 }
 0x420   : > { %v978_v12 = vmul.f32 %v963_v19, %v940_v0  ;;  %v937_v45 = vmul.f32 %v2174_v1, %v881_v15  ;;  %v2176_v14 = vpop.eup %2175 }
 0x421   : > { %v2637_v2 = vadd.f32 %v991_v36, %v977_v44  ;;  %v976_v28 = vmul.f32 %v958_v52, %v938_v49  ;;  %v919_v22 = vadd.f32 1.0, %v2176_v14 }
 0x422   : > { %v2642_v20 = vadd.f32 %v991_v36, %v978_v12  ;;  %v975_v18 = vmul.f32 %v958_v52, %v937_v45  ;;  %v2178_v52 = vpop.eup %2177 }
 0x423   : > { %3216 = vst [vmem:[#allocation10_spill] sm:$0xff] %v2637_v2  ;;  %1287 = vrot.lane.b32.xlu0 %v2637_v2, %s2251_s10  ;;  %v2655_v19 = vadd.f32 %v986_v11, %v976_v28  ;;  %v920_v29 = vadd.f32 1.0, %v2178_v52  ;;  %2183 = vrcp.f32 %v919_v22  ;;  %v2180_v32 = vpop.eup %2179 }
 0x424   : > { %3217 = vst [vmem:[#allocation11_spill] sm:$0xff] %v2642_v20  ;;  %1153 = vrot.lane.b32.xlu1 %v2642_v20, %s2254_s13  ;;  %v2661_v15 = vadd.f32 %v986_v11, %v975_v18  ;;  %v918_v63 = vadd.f32 1.0, %v2180_v32  ;;  %v2182_v53 = vpop.eup %2181 }
 0x425   : > { %3218 = vst [vmem:[#allocation12_spill] sm:$0xff] %v2655_v19  ;;  %2185 = vrcp.f32 %v920_v29  ;;  %v917_v37 = vadd.f32 1.0, %v2182_v53 }
 0x426   : > { %3219 = vst [vmem:[#allocation13_spill] sm:$0xff] %v2661_v15  ;;  %2187 = vrcp.f32 %v918_v63  ;;  %v3221_v63 = vmov 0  }
 0x427   : > { %1243 = vrot.lane.b32.xlu0 %v2637_v2, %s2249_s8  ;;  %2189 = vrcp.f32 %v917_v37 }
 0x428   : > { %1165 = vrot.lane.b32.xlu1 %v2637_v2, %s2254_s13 }
 0x42b   : > { %1151 = vrot.lane.b32.xlu0 %v2655_v19, %s2254_s13 }
 0x42c   : > { %1109 = vrot.lane.b32.xlu1 %v2642_v20, %s2253_s12 }
 0x42f   : > { %1163 = vrot.lane.b32.xlu0 %v2661_v15, %s2254_s13 }
 0x430   : > { %1121 = vrot.lane.b32.xlu1 %v2637_v2, %s2253_s12  ;;  %v2184_v43 = vpop.eup %2183 }
 0x431   : > { %v943_v36 = vmul.f32 %v2184_v43, %v2625_v33 }
 0x432   : > { %v2186_v0 = vpop.eup %2185 }
 0x433   : > { %1107 = vrot.lane.b32.xlu0 %v2655_v19, %s2253_s12  ;;  %v944_v41 = vmul.f32 %v2186_v0, %v2630_v42  ;;  %v981_v44 = vmul.f32 %v2617_v35, %v943_v36  ;;  %v2188_v50 = vpop.eup %2187 }
 0x434   : > { %1065 = vrot.lane.b32.xlu1 %v2642_v20, %s2257_s15  ;;  %v942_v33 = vmul.f32 %v2188_v50, %v886_v30  ;;  %v2190_v46 = vpop.eup %2189 }
 0x435   : > { %v982_v12 = vmul.f32 %v2617_v35, %v944_v41  ;;  %v2704_v42 = vadd.f32 %v2640_v31, %v981_v44  ;;  %v941_v35 = vmul.f32 %v2190_v46, %v885_v13 }
 0x436   : > { %v980_v49 = vmul.f32 %v2627_v7, %v942_v33 }
 0x437   : > { %1119 = vrot.lane.b32.xlu0 %v2661_v15, %s2253_s12  ;;  %3220 = vst [vmem:[#allocation14_spill] sm:$0xff] %v2704_v42  ;;  %v2707_v47 = vadd.f32 %v2640_v31, %v982_v12  ;;  %v979_v1 = vmul.f32 %v2627_v7, %v941_v35 }
 0x438   : > { %1077 = vrot.lane.b32.xlu1 %v2637_v2, %s2257_s15  ;;  %v2720_v40 = vadd.f32 %v2619_v51, %v980_v49 }
 0x439   : > { %v2727_v31 = vadd.f32 %v2619_v51, %v979_v1 }
 0x43b   : > { %1063 = vrot.lane.b32.xlu0 %v2655_v19, %s2257_s15 }
 0x43c   : > { %1017 = vrot.lane.b32.xlu1 %v2642_v20, %s2256_s14 }
 0x43f   : > { %1075 = vrot.lane.b32.xlu0 %v2661_v15, %s2257_s15 }
 0x440   : > { %1033 = vrot.lane.b32.xlu1 %v2637_v2, %s2256_s14 }
 0x443   : > { %1015 = vrot.lane.b32.xlu0 %v2655_v19, %s2256_s14 }
 0x444   : > { %1289 = vrot.lane.b32.xlu1 %v2642_v20, %s2251_s10 }
 0x447   : > { %1031 = vrot.lane.b32.xlu0 %v2661_v15, %s2256_s14 }
 0x448   : > { %1245 = vrot.lane.b32.xlu1 %v2642_v20, %s2249_s8 }
 0x44b   : > { %1283 = vrot.lane.b32.xlu0 %v2661_v15, %s2251_s10 }
 0x44c   : > { %1285 = vrot.lane.b32.xlu1 %v2655_v19, %s2251_s10 }
 0x44f   : > { %1239 = vrot.lane.b32.xlu0 %v2661_v15, %s2249_s8 }
 0x450   : > { %1241 = vrot.lane.b32.xlu1 %v2655_v19, %s2249_s8 }
 0x453   : > { %1295 = vrot.lane.b32.xlu0 %v2704_v42, %s2251_s10 }
 0x454   : > { %1157 = vrot.lane.b32.xlu1 %v2707_v47, %s2254_s13 }
 0x457   : > { %1251 = vrot.lane.b32.xlu0 %v2704_v42, %s2249_s8 }
 0x458   : > { %1169 = vrot.lane.b32.xlu1 %v2704_v42, %s2254_s13 }
 0x45b   : > { %1155 = vrot.lane.b32.xlu0 %v2720_v40, %s2254_s13 }
 0x45c   : > { %1113 = vrot.lane.b32.xlu1 %v2707_v47, %s2253_s12 }
 0x45f   : > { %1167 = vrot.lane.b32.xlu0 %v2727_v31, %s2254_s13 }
 0x460   : > { %1125 = vrot.lane.b32.xlu1 %v2704_v42, %s2253_s12 }
 0x463   : > { %1111 = vrot.lane.b32.xlu0 %v2720_v40, %s2253_s12 }
 0x464   : > { %1069 = vrot.lane.b32.xlu1 %v2707_v47, %s2257_s15 }
 0x467   : > { %1123 = vrot.lane.b32.xlu0 %v2727_v31, %s2253_s12 }
 0x468   : > { %1081 = vrot.lane.b32.xlu1 %v2704_v42, %s2257_s15 }
 0x46b   : > { %1067 = vrot.lane.b32.xlu0 %v2720_v40, %s2257_s15 }
 0x46c   : > { %1021 = vrot.lane.b32.xlu1 %v2707_v47, %s2256_s14 }
 0x46f   : > { %1079 = vrot.lane.b32.xlu0 %v2727_v31, %s2257_s15 }
 0x470   : > { %1037 = vrot.lane.b32.xlu1 %v2704_v42, %s2256_s14 }
 0x473   : > { %1019 = vrot.lane.b32.xlu0 %v2720_v40, %s2256_s14 }
 0x474   : > { %1297 = vrot.lane.b32.xlu1 %v2707_v47, %s2251_s10 }
 0x477   : > { %1035 = vrot.lane.b32.xlu0 %v2727_v31, %s2256_s14 }
 0x478   : > { %1253 = vrot.lane.b32.xlu1 %v2707_v47, %s2249_s8 }
 0x47b   : > { %1207 = vrot.lane.b32.xlu0 %v2704_v42, %s2252_s11 }
 0x47c   : > { %1209 = vrot.lane.b32.xlu1 %v2707_v47, %s2252_s11 }
 0x47f   : > { %1291 = vrot.lane.b32.xlu0 %v2727_v31, %s2251_s10 }
 0x480   : > { %1293 = vrot.lane.b32.xlu1 %v2720_v40, %s2251_s10 }
 0x483   : > { %1195 = vrot.lane.b32.xlu0 %v2661_v15, %s2252_s11 }
 0x484   : > { %1197 = vrot.lane.b32.xlu1 %v2655_v19, %s2252_s11 }
 0x487   : > { %1247 = vrot.lane.b32.xlu0 %v2727_v31, %s2249_s8 }
 0x488   : > { %1249 = vrot.lane.b32.xlu1 %v2720_v40, %s2249_s8 }
 0x48b   : > { %1199 = vrot.lane.b32.xlu0 %v2637_v2, %s2252_s11 }
 0x48c   : > { %1201 = vrot.lane.b32.xlu1 %v2642_v20, %s2252_s11 }
 0x48f   : > { %1203 = vrot.lane.b32.xlu0 %v2727_v31, %s2252_s11 }
 0x490   : > { %1205 = vrot.lane.b32.xlu1 %v2720_v40, %s2252_s11 }
 0x493   : > { %1339 = vrot.lane.b32.xlu0 %v2704_v42, %s2250_s9 }
 0x494   : > { %1341 = vrot.lane.b32.xlu1 %v2707_v47, %s2250_s9 }
 0x495   : > { %v2785_v51 = vpop.permute.xlu0 %1287 }
 0x496   : > { %v2787_v7 = vpop.permute.xlu1 %1153 }
 0x497   : > { %1327 = vrot.lane.b32.xlu0 %v2661_v15, %s2250_s9 }
 0x498   : > { %1329 = vrot.lane.b32.xlu1 %v2655_v19, %s2250_s9 }
 0x499   : > { %v1244_v30 = vpop.permute.xlu0 %1243 }
 0x49a   : > { %v1166_v45 = vpop.permute.xlu1 %1165 }
 0x49b   : > { %1335 = vrot.lane.b32.xlu0 %v2727_v31, %s2250_s9  ;;  %v1172_v62 = vsel %vm361_vm6, %v1166_v45, %v2787_v7 }
 0x49c   : > { %1337 = vrot.lane.b32.xlu1 %v2720_v40, %s2250_s9 }
 0x49d   : > { %v1152_v28 = vpop.permute.xlu0 %1151 }
 0x49e   : > { %v2800_v11 = vpop.permute.xlu1 %1109 }
 0x49f   : > { %1331 = vrot.lane.b32.xlu0 %v2637_v2, %s2250_s9 }
 0x4a0   : > { %1333 = vrot.lane.b32.xlu1 %v2642_v20, %s2250_s9 }
 0x4a1   : > { %v1164_v13 = vpop.permute.xlu0 %1163 }
 0x4a2   : > { %v2806_v16 = vpop.permute.xlu1 %1121  ;;  %v1171_v39 = vsel %vm361_vm6, %v1164_v13, %v1152_v28  ;;  %v1183_v9 = vsel %vm361_vm6, %v1152_v28, %v1164_v13  ;;  %v1190_v28 = vmul.f32 %v1172_v62, %v2452_v60 }
 0x4a3   : > { %1428 = vperm.xlu0 %2125, %v2364_v3   ;;  %v1188_v55 = vmul.f32 %v1171_v39, %v2452_v60  ;;  %v1187_v13 = vmul.f32 %v1183_v9, %v2449_v59 }
 0x4a4   : > { %1424 = vperm.xlu1 %2126, %v2369_v4  }
 0x4a5   : > { %v2808_v18 = vpop.permute.xlu0 %1107 }
 0x4a6   : > { %v2810_v14 = vpop.permute.xlu1 %1065 }
 0x4a7   : > { %1416 = vperm.xlu0 %2125, %v2376_v5  }
 0x4a8   : > { %1420 = vperm.xlu1 %2126, %v2381_v6  }
 0x4a9   : > { %v1120_v52 = vpop.permute.xlu0 %1119 }
 0x4aa   : > { %v2814_v22 = vpop.permute.xlu1 %1077 }
 0x4ab   : > { %2128 = vset.pattern.permute.xlu0 %v3221_v63 }
 0x4ac   : > { %2127 = vset.pattern.permute.xlu1 %v3221_v63 }
 0x4ad   : > { %v2818_v29 = vpop.permute.xlu0 %1063 }
 0x4ae   : > { %v2820_v32 = vpop.permute.xlu1 %1017 }
 0x4b1   : > { %v2824_v53 = vpop.permute.xlu0 %1075 }
 0x4b2   : > { %v2826_v4 = vpop.permute.xlu1 %1033 }
 0x4b5   : > { %v2828_v3 = vpop.permute.xlu0 %1015 }
 0x4b6   : > { %v2830_v37 = vpop.permute.xlu1 %1289 }
 0x4b7   : > { %v2835_v5 = vsel %vm420_vm2, %v2785_v51, %v2830_v37 }
 0x4b9   : > { %v2837_v6 = vpop.permute.xlu0 %1031 }
 0x4ba   : > { %v1246_v43 = vpop.permute.xlu1 %1245 }
 0x4bb   : > { %v2840_v0 = vsel %vm400_vm1, %v1244_v30, %v1246_v43  ;;  %v2843_v36 = vsel %vm400_vm1, %v1246_v43, %v1244_v30 }
 0x4bd   : > { %v2845_v41 = vpop.permute.xlu0 %1283 }
 0x4be   : > { %v2847_v44 = vpop.permute.xlu1 %1285 }
 0x4c1   : > { %v2849_v50 = vpop.permute.xlu0 %1239 }
 0x4c2   : > { %v2851_v12 = vpop.permute.xlu1 %1241 }
 0x4c5   : > { %v2853_v33 = vpop.permute.xlu0 %1295 }
 0x4c6   : > { %v1158_v46 = vpop.permute.xlu1 %1157 }
 0x4c9   : > { %v2855_v35 = vpop.permute.xlu0 %1251 }
 0x4ca   : > { %v1170_v49 = vpop.permute.xlu1 %1169 }
 0x4cb   : > { %v1174_v30 = vsel %vm361_vm6, %v1170_v49, %v1158_v46  ;;  %v1186_v43 = vsel %vm361_vm6, %v1158_v46, %v1170_v49  ;;  %v1184_v49 = vsel %vm361_vm6, %v2787_v7, %v1166_v45 }
 0x4cc   : > { %v1193_v63 = vmul.f32 %v1186_v43, %v2449_v59  ;;  %v1194_v46 = vmul.f32 %v1174_v30, %v2452_v60 }
 0x4cd   : > { %v1156_v1 = vpop.permute.xlu0 %1155 }
 0x4ce   : > { %v1114_v48 = vpop.permute.xlu1 %1113 }
 0x4d1   : > { %v1168_v10 = vpop.permute.xlu0 %1167 }
 0x4d2   : > { %v1126_v54 = vpop.permute.xlu1 %1125  ;;  %v1173_v61 = vsel %vm361_vm6, %v1168_v10, %v1156_v1  ;;  %v1185_v56 = vsel %vm361_vm6, %v1156_v1, %v1168_v10  ;;  %v1189_v10 = vmul.f32 %v1184_v49, %v2449_v59 }
 0x4d3   : > { %v1191_v2 = vmul.f32 %v1185_v56, %v2449_v59  ;;  %v1192_v15 = vmul.f32 %v1173_v61, %v2452_v60  ;;  %v1127_v56 = vsel %vm341_vm5, %v1120_v52, %v2808_v18  ;;  %v1384_v61 = vpack.c.bf16 %v1190_v28, %v1188_v55 }
 0x4d4   : > { %v1130_v1 = vsel %vm341_vm5, %v1126_v54, %v1114_v48  ;;  %v1142_v30 = vsel %vm341_vm5, %v1114_v48, %v1126_v54  ;;  %v1128_v60 = vsel %vm341_vm5, %v2806_v16, %v2800_v11  ;;  %v1383_v9 = vpack.c.bf16 %v1189_v10, %v1187_v13 }
 0x4d5   : > { %v1112_v39 = vpop.permute.xlu0 %1111  ;;  %v1386_v20 = vpack.c.bf16 %v1194_v46, %v1192_v15  ;;  %v1385_v19 = vpack.c.bf16 %v1193_v63, %v1191_v2  ;;  %v1139_v59 = vsel %vm341_vm5, %v2808_v18, %v1120_v52  ;;  %v1144_v2 = vmul.f32 %v1127_v56, %v2446_v58 }
 0x4d6   : > { %v1070_v42 = vpop.permute.xlu1 %1069  ;;  %v1149_v54 = vmul.f32 %v1142_v30, %v2443_v57  ;;  %v1140_v63 = vsel %vm341_vm5, %v2800_v11, %v2806_v16  ;;  %v1146_v18 = vmul.f32 %v1128_v60, %v2446_v58  ;;  %v1143_v52 = vmul.f32 %v1139_v59, %v2443_v57 }
 0x4d7   : > { %1467 = vmatprep.subr.bf16.mxu1 %v1386_v20  ;;  %v1145_v28 = vmul.f32 %v1140_v63, %v2443_v57  ;;  %v1083_v13 = vsel %vm321_vm8, %v2824_v53, %v2818_v29 }
 0x4d8   : > { %1468 = vmatpush1.bf16.msra.mxu1 %v1385_v19  ;;  %v1150_v19 = vmul.f32 %v1130_v1, %v2446_v58 }
 0x4d9   : > { %1469 = vmatprep.subr.bf16.mxu1 %v1384_v61  ;;  %v1124_v62 = vpop.permute.xlu0 %1123  ;;  %v1379_v56 = vpack.c.bf16 %v1145_v28, %v1143_v52  ;;  %v1100_v61 = vmul.f32 %v1083_v13, %v2474_v27 }
 0x4da   : > { %v1082_v15 = vpop.permute.xlu1 %1081  ;;  %v1129_v55 = vsel %vm341_vm5, %v1124_v62, %v1112_v39  ;;  %v1141_v20 = vsel %vm341_vm5, %v1112_v39, %v1124_v62  ;;  %v1380_v39 = vpack.c.bf16 %v1146_v18, %v1144_v2  ;;  %v1096_v2 = vsel %vm321_vm8, %v2810_v14, %v2814_v22 }
 0x4db   : > { %v1147_v7 = vmul.f32 %v1141_v20, %v2443_v57  ;;  %v1148_v45 = vmul.f32 %v1129_v55, %v2446_v58  ;;  %v1086_v10 = vsel %vm321_vm8, %v1082_v15, %v1070_v42  ;;  %v1098_v11 = vsel %vm321_vm8, %v1070_v42, %v1082_v15 }
 0x4dc   : > { %1470 = vmatpush1.bf16.msra.mxu1 %v1383_v9  ;;  %v1084_v58 = vsel %vm321_vm8, %v2814_v22, %v2810_v14  ;;  %v1095_v57 = vsel %vm321_vm8, %v2818_v29, %v2824_v53  ;;  %v1105_v42 = vmul.f32 %v1098_v11, %v2471_v8  ;;  %v1106_v62 = vmul.f32 %v1086_v10, %v2474_v27 }
 0x4dd   : > { %v1068_v48 = vpop.permute.xlu0 %1067  ;;  %v1382_v43 = vpack.c.bf16 %v1150_v19, %v1148_v45  ;;  %v1381_v46 = vpack.c.bf16 %v1149_v54, %v1147_v7  ;;  %v1102_v29 = vmul.f32 %v1084_v58, %v2474_v27  ;;  %v1099_v53 = vmul.f32 %v1095_v57, %v2471_v8 }
 0x4de   : > { %v1022_v49 = vpop.permute.xlu1 %1021  ;;  %v1101_v19 = vmul.f32 %v1096_v2, %v2471_v8  ;;  %v1039_v7 = vsel %vm301_vm7, %v2837_v6, %v2828_v3 }
 0x4df   : > { %1471 = vmatprep.subr.bf16.mxu1 %v1382_v43  ;;  %v1376_v45 = vpack.c.bf16 %v1102_v29, %v1100_v61  ;;  %v1056_v52 = vmul.f32 %v1039_v7, %v2468_v25 }
 0x4e0   : > { %1472 = vmatpush1.bf16.msra.mxu1 %v1381_v46  ;;  %v1375_v18 = vpack.c.bf16 %v1101_v19, %v1099_v53 }
 0x4e1   : > { %1473 = vmatprep.subr.bf16.mxu1 %v1380_v39  ;;  %v1080_v16 = vpop.permute.xlu0 %1079 }
 0x4e2   : > { %v1038_v1 = vpop.permute.xlu1 %1037  ;;  %v1085_v30 = vsel %vm321_vm8, %v1080_v16, %v1068_v48  ;;  %v1097_v60 = vsel %vm321_vm8, %v1068_v48, %v1080_v16 }
 0x4e3   : > { %v1103_v9 = vmul.f32 %v1097_v60, %v2471_v8  ;;  %v1104_v59 = vmul.f32 %v1085_v30, %v2474_v27  ;;  %v1042_v63 = vsel %vm301_vm7, %v1038_v1, %v1022_v49  ;;  %v1054_v14 = vsel %vm301_vm7, %v1022_v49, %v1038_v1 }
 0x4e4   : > { %1474 = vmatpush1.bf16.msra.mxu1 %v1379_v56  ;;  %v1040_v27 = vsel %vm301_vm7, %v2826_v4, %v2820_v32  ;;  %v1051_v8 = vsel %vm301_vm7, %v2828_v3, %v2837_v6  ;;  %v1061_v49 = vmul.f32 %v1054_v14, %v2465_v24  ;;  %v1062_v28 = vmul.f32 %v1042_v63, %v2468_v25 }
 0x4e5   : > { %v1020_v15 = vpop.permute.xlu0 %1019  ;;  %v1378_v55 = vpack.c.bf16 %v1106_v62, %v1104_v59  ;;  %v1377_v20 = vpack.c.bf16 %v1105_v42, %v1103_v9  ;;  %v1052_v3 = vsel %vm301_vm7, %v2820_v32, %v2826_v4  ;;  %v1058_v6 = vmul.f32 %v1040_v27, %v2468_v25 }
 0x4e6   : > { %v1298_v54 = vpop.permute.xlu1 %1297  ;;  %v1055_v16 = vmul.f32 %v1051_v8, %v2465_v24  ;;  %v1057_v61 = vmul.f32 %v1052_v3, %v2465_v24  ;;  %v1315_v1 = vsel %vm420_vm2, %v2847_v44, %v2845_v41  ;;  %v1316_v30 = vsel %vm420_vm2, %v2830_v37, %v2785_v51 }
 0x4e7   : > { %1475 = vmatprep.subr.bf16.mxu1 %v1378_v55  ;;  %v1372_v57 = vpack.c.bf16 %v1058_v6, %v1056_v52  ;;  %v1302_v32 = vsel %vm420_vm2, %v2853_v33, %v1298_v54  ;;  %v1320_v62 = vmul.f32 %v1315_v1, %v2419_v26  ;;  %v1322_v53 = vmul.f32 %v1316_v30, %v2419_v26 }
 0x4e8   : > { %1476 = vmatpush1.bf16.msra.mxu1 %v1377_v20  ;;  %v1371_v42 = vpack.c.bf16 %v1057_v61, %v1055_v16  ;;  %v1321_v20 = vmul.f32 %v2835_v5, %v2414_v23 }
 0x4e9   : > { %1477 = vmatprep.subr.bf16.mxu1 %v1376_v45  ;;  %v1036_v22 = vpop.permute.xlu0 %1035  ;;  %v1400_v19 = vpack.c.bf16 %v1322_v53, %v1320_v62 }
 0x4ea   : > { %v1254_v48 = vpop.permute.xlu1 %1253  ;;  %v1041_v43 = vsel %vm301_vm7, %v1036_v22, %v1020_v15  ;;  %v1053_v46 = vsel %vm301_vm7, %v1020_v15, %v1036_v22 }
 0x4eb   : > { %v1059_v13 = vmul.f32 %v1053_v46, %v2465_v24  ;;  %v1060_v39 = vmul.f32 %v1041_v43, %v2468_v25  ;;  %v1318_v25 = vsel %vm420_vm2, %v1298_v54, %v2853_v33  ;;  %v1299_v24 = vsel %vm420_vm2, %v2845_v41, %v2847_v44 }
 0x4ec   : > { %1478 = vmatpush1.bf16.msra.mxu1 %v1375_v18  ;;  %v1325_v33 = vmul.f32 %v1302_v32, %v2414_v23  ;;  %v1326_v2 = vmul.f32 %v1318_v25, %v2419_v26  ;;  %v1319_v41 = vmul.f32 %v1299_v24, %v2414_v23  ;;  %v1271_v54 = vsel %vm400_vm1, %v2851_v12, %v2849_v50 }
 0x4ed   : > { %v1208_v10 = vpop.permute.xlu0 %1207  ;;  %v1374_v11 = vpack.c.bf16 %v1062_v28, %v1060_v39  ;;  %v1373_v58 = vpack.c.bf16 %v1061_v49, %v1059_v13  ;;  %v1258_v7 = vsel %vm400_vm1, %v2855_v35, %v1254_v48  ;;  %v1276_v5 = vmul.f32 %v1271_v54, %v2410_v21 }
 0x4ee   : > { %v1210_v56 = vpop.permute.xlu1 %1209  ;;  %v1399_v14 = vpack.c.bf16 %v1321_v20, %v1319_v41  ;;  %v1281_v18 = vmul.f32 %v1258_v7, %v2406_v17  ;;  %v1278_v43 = vmul.f32 %v2843_v36, %v2410_v21  ;;  %v1277_v13 = vmul.f32 %v2840_v0, %v2406_v17  ;;  %v3224_v20 = vld [vmem:[#allocation11_spill] sm:$0xff] }
 0x4ef   : > { %1479 = vmatprep.subr.bf16.mxu1 %v1374_v11  ;;  %v1214_v28 = vsel %vm380_vm4, %v1208_v10, %v1210_v56  ;;  %v1230_v39 = vsel %vm380_vm4, %v1210_v56, %v1208_v10 }
 0x4f0   : > { %1480 = vmatpush1.bf16.msra.mxu1 %v1373_v58  ;;  %v1396_v3 = vpack.c.bf16 %v1278_v43, %v1276_v5  ;;  %v1238_v16 = vmul.f32 %v1230_v39, %v2429_v38  ;;  %v2146_v39 = vld [vmem:[%s3192_s2 + $0x8] ss:$12 sps:$4 sm:$0xff]  }
 0x4f1   : > { %1481 = vmatprep.subr.bf16.mxu1 %v1372_v57  ;;  %v1292_v4 = vpop.permute.xlu0 %1291 }
 0x4f2   : > { %v1294_v60 = vpop.permute.xlu1 %1293 }
 0x4f3   : > { %v1301_v9 = vsel %vm420_vm2, %v1292_v4, %v1294_v60  ;;  %v1317_v59 = vsel %vm420_vm2, %v1294_v60, %v1292_v4 }
 0x4f4   : > { %v1323_v29 = vmul.f32 %v1301_v9, %v2414_v23  ;;  %v1324_v51 = vmul.f32 %v1317_v59, %v2419_v26  ;;  %1482 = vmatpush1.bf16.msra.mxu1 %v1371_v42  ;;  %v1274_v26 = vsel %vm400_vm1, %v1254_v48, %v2855_v35  ;;  %v1255_v23 = vsel %vm400_vm1, %v2849_v50, %v2851_v12 }
 0x4f5   : > { %v1196_v37 = vpop.permute.xlu0 %1195  ;;  %v1282_v8 = vmul.f32 %v1274_v26, %v2410_v21  ;;  %v1275_v50 = vmul.f32 %v1255_v23, %v2406_v17 }
 0x4f6   : > { %v1198_v44 = vpop.permute.xlu1 %1197  ;;  %v1402_v15 = vpack.c.bf16 %v1326_v2, %v1324_v51  ;;  %v1401_v55 = vpack.c.bf16 %v1325_v33, %v1323_v29  ;;  %v1390_v29 = vpack.c.bf16 %v2707_v47, %v2720_v40  ;;  %v2231_v47 = vld [vmem:[%s3196_s6 + $0x10] ss:$0 sm:$0xff] }
 0x4f7   : > { %v1395_v58 = vpack.c.bf16 %v1277_v13, %v1275_v50  ;;  %v1227_v57 = vsel %vm380_vm4, %v1198_v44, %v1196_v37  ;;  %v1211_v25 = vsel %vm380_vm4, %v1196_v37, %v1198_v44  ;;  %v3222_v44 = vld [vmem:[#allocation14_spill] sm:$0xff] }
 0x4f8   : > { %1483 = vmatprep.subr.bf16.mxu1 %v1402_v15  ;;  %v1232_v4 = vmul.f32 %v1227_v57, %v2429_v38  ;;  %v1231_v9 = vmul.f32 %v1211_v25, %v2423_v34  ;;  %v1389_v15 = vpack.c.bf16 %v3222_v44, %v2727_v31 }
 0x4f9   : > { %1484 = vmatpush2.bf16.msra.mxu1 %v1401_v55  ;;  %v1248_v45 = vpop.permute.xlu0 %1247  ;;  %v3223_v55 = vld [vmem:[#allocation12_spill] sm:$0xff] }
 0x4fa   : > { %v1250_v63 = vpop.permute.xlu1 %1249  ;;  %1485 = vmatprep.subr.bf16.mxu1 %v1400_v19  ;;  %v1388_v54 = vpack.c.bf16 %v3224_v20, %v3223_v55  ;;  %v2232_v19 = vld [vmem:[%s3196_s6 + $0x18] ss:$0 sm:$0xff] }
 0x4fb   : > { %v1257_v27 = vsel %vm400_vm1, %v1248_v45, %v1250_v63  ;;  %v1273_v22 = vsel %vm400_vm1, %v1250_v63, %v1248_v45 }
 0x4fc   : > { %v1279_v35 = vmul.f32 %v1257_v27, %v2406_v17  ;;  %v1280_v52 = vmul.f32 %v1273_v22, %v2410_v21  ;;  %v1237_v21 = vmul.f32 %v1214_v28, %v2423_v34 }
 0x4fd   : > { %1486 = vmatpush2.bf16.msra.mxu1 %v1399_v14  ;;  %v1200_v48 = vpop.permute.xlu0 %1199 }
 0x4fe   : > { %v1202_v12 = vpop.permute.xlu1 %1201  ;;  %v1398_v46 = vpack.c.bf16 %v1282_v8, %v1280_v52  ;;  %v1397_v49 = vpack.c.bf16 %v1281_v18, %v1279_v35  ;;  %v3225_v8 = vld [vmem:[#allocation13_spill] sm:$0xff]  ;;  %v3226_v35 = vld [vmem:[#allocation10_spill] sm:$0xff] }
 0x4ff   : > { %v1228_v6 = vsel %vm380_vm4, %v1202_v12, %v1200_v48  ;;  %v1212_v0 = vsel %vm380_vm4, %v1200_v48, %v1202_v12  ;;  %v1387_v52 = vpack.c.bf16 %v3226_v35, %v3225_v8 }
 0x500   : > { %1487 = vmatprep.subr.bf16.mxu1 %v1398_v46  ;;  %v1234_v10 = vmul.f32 %v1228_v6, %v2429_v38  ;;  %v1233_v24 = vmul.f32 %v1212_v0, %v2423_v34  ;;  %v2143_v46 = vld [vmem:[%s3192_s2] ss:$12 sps:$4 sm:$0xff]   ;;  %v3227_v6 = vmov 0  }
 0x501   : > { %1488 = vmatpush2.bf16.msra.mxu1 %v1397_v49  ;;  %v1204_v11 = vpop.permute.xlu0 %1203  ;;  %v2147_v49 = vld [vmem:[%s3192_s2 + $0x1c] ss:$12 sps:$4 sm:$0xff]  }
 0x502   : > { %v1206_v36 = vpop.permute.xlu1 %1205  ;;  %1489 = vmatprep.subr.bf16.mxu1 %v1396_v3  ;;  %v1392_v62 = vpack.c.bf16 %v1234_v10, %v1232_v4  ;;  %v1391_v2 = vpack.c.bf16 %v1233_v24, %v1231_v9  ;;  %v2149_v3 = vld [vmem:[%s3192_s2 + $0x18] ss:$12 sps:$4 sm:$0xff]  }
 0x503   : > { %v1213_v61 = vsel %vm380_vm4, %v1204_v11, %v1206_v36  ;;  %v1229_v17 = vsel %vm380_vm4, %v1206_v36, %v1204_v11  ;;  %v2150_v11 = vld [vmem:[%s3192_s2 + $0x20] ss:$12 sps:$4 sm:$0xff]  }
 0x504   : > { %v1235_v56 = vmul.f32 %v1213_v61, %v2423_v34  ;;  %v1236_v1 = vmul.f32 %v1229_v17, %v2429_v38 }
 0x505   : > { %1490 = vmatpush2.bf16.msra.mxu1 %v1395_v58  ;;  %v1340_v32 = vpop.permute.xlu0 %1339 }
 0x506   : > { %v1342_v30 = vpop.permute.xlu1 %1341  ;;  %v1394_v60 = vpack.c.bf16 %v1238_v16, %v1236_v1  ;;  %v1393_v42 = vpack.c.bf16 %v1237_v21, %v1235_v56  ;;  %v2233_v21 = vld [vmem:[%s3195_s5] sm:$0xff] }
 0x507   : > { %v1346_v51 = vsel %vm440_vm0, %v1340_v32, %v1342_v30  ;;  %v1362_v38 = vsel %vm440_vm0, %v1342_v30, %v1340_v32 }
 0x508   : > { %1491 = vmatprep.subr.bf16.mxu1 %v1394_v60  ;;  %v1369_v40 = vmul.f32 %v2231_v47, %v1346_v51  ;;  %v1370_v7 = vmul.f32 %v2232_v19, %v1362_v38 }
 0x509   : > { %1492 = vmatpush2.bf16.msra.mxu1 %v1393_v42  ;;  %v1328_v59 = vpop.permute.xlu0 %1327 }
 0x50a   : > { %v1330_v33 = vpop.permute.xlu1 %1329  ;;  %1493 = vmatprep.subr.bf16.mxu1 %v1392_v62 }
 0x50b   : > { %v1343_v63 = vsel %vm440_vm0, %v1328_v59, %v1330_v33  ;;  %v1359_v14 = vsel %vm440_vm0, %v1330_v33, %v1328_v59 }
 0x50c   : > { %v1363_v48 = vmul.f32 %v2231_v47, %v1343_v63  ;;  %v1364_v43 = vmul.f32 %v2232_v19, %v1359_v14 }
 0x50d   : > { %1494 = vmatpush2.bf16.msra.mxu1 %v1391_v2  ;;  %v1336_v37 = vpop.permute.xlu0 %1335 }
 0x50e   : > { %v1338_v53 = vpop.permute.xlu1 %1337  ;;  %1495 = vmatprep.subr.bf16.mxu1 %v1390_v29 }
 0x50f   : > { %v1345_v41 = vsel %vm440_vm0, %v1336_v37, %v1338_v53  ;;  %v1361_v34 = vsel %vm440_vm0, %v1338_v53, %v1336_v37 }
 0x510   : > { %v1367_v26 = vmul.f32 %v2231_v47, %v1345_v41  ;;  %v1368_v45 = vmul.f32 %v2232_v19, %v1361_v34 }
 0x511   : > { %1496 = vmatpush2.bf16.msra.mxu1 %v1389_v15  ;;  %v1332_v31 = vpop.permute.xlu0 %1331 }
 0x512   : > { %v1405_v23 = vpack.c.bf16 %v1369_v40, %v1367_v26  ;;  %v1334_v5 = vpop.permute.xlu1 %1333  ;;  %1497 = vmatprep.subr.bf16.mxu1 %v1388_v54  ;;  %v1406_v27 = vpack.c.bf16 %v1370_v7, %v1368_v45 }
 0x513   : > { %v1344_v22 = vsel %vm440_vm0, %v1332_v31, %v1334_v5  ;;  %v1360_v18 = vsel %vm440_vm0, %v1334_v5, %v1332_v31 }
 0x514   : > { %v1365_v50 = vmul.f32 %v2231_v47, %v1344_v22  ;;  %v1366_v12 = vmul.f32 %v2232_v19, %v1360_v18  ;;  %1532 = vmatprep.subr.bf16.mxu0 %v1406_v27 }
 0x515   : > { %1498 = vmatpush2.bf16.msra.mxu1 %v1387_v52  ;;  %1533 = vmatpush1.bf16.msra.mxu0 %v1405_v23 }
 0x516   : > { %v1403_v28 = vpack.c.bf16 %v1365_v50, %v1363_v48  ;;  %v1404_v13 = vpack.c.bf16 %v1366_v12, %v1364_v43 }
 0x518   : > { %1534 = vmatprep.subr.bf16.mxu0 %v1404_v13  ;;  %1500 = vmatmul.mubr.bf16.vlgmr.msra.gmra.mxu1 %v2143_v46 }
 0x519   : > { %1535 = vmatpush1.bf16.msra.mxu0 %v1403_v28  ;;  %1509 = vmatprep.mubr.bf16.mxu1 %v2147_v49 }
 0x51c   : > { %2026 = vmatmul.mubr.msk.bf16.vlgmr.msra.gmra.mxu0 %vm651_vm10, %v2146_v39 }
 0x51d   : > { %1562 = vmatprep.mubr.bf16.mxu0 %v3227_v6 }
 0x51e   : > { %v1429_v4 = vpop.permute.xlu0 %1428 }
 0x51f   : > { %v1425_v0 = vpop.permute.xlu1 %1424 }
 0x520   : > { %1510 = vmatmul.mubr.bf16.gmra.mxu1 %v2149_v3 }
 0x522   : > { %v1417_v34 = vpop.permute.xlu0 %1416 }
 0x523   : > { %v1421_v2 = vpop.permute.xlu1 %1420 }
 0x524   : > { %2027 = vmatmul.mubr.msk.bf16.gmra.mxu0 %vm651_vm10, %v2150_v11 }
 0x525   : > { %2082 = vmatprep.mubr.msk.f32.mxu0 %vm651_vm10, %v2233_v21 }
 0x5d8   : > { %v1501_v36 = vpop.f32.mrf.mxu1 }
 0x5d9   : > { %v1502_v40 = vadd.f32 %v1501_v36, %v1417_v34  ;;  %v2234_v36 = vld [vmem:[%s3195_s5 + $0x8] sm:$0xff] }
 0x5da   : > { %v1503_v58 = vpop.f32.mrf.mxu1 }
 0x5db   : > { %v1504_v45 = vadd.f32 %v1503_v58, %v1417_v34  ;;  %v2235_v58 = vld [vmem:[%s3195_s5 + $0x10] sm:$0xff] }
 0x5dc   : > { %v1554_v16 = vpop.f32.mrf.mxu0  ;;  %v1505_v57 = vpop.f32.mrf.mxu1 }
 0x5dd   : > { %v1506_v55 = vadd.f32 %v1505_v57, %v1421_v2  ;;  %v3079_v5 = vadd.f32 %v1554_v16, %v1502_v40  ;;  %v2236_v16 = vld [vmem:[%s3195_s5 + $0x18] sm:$0xff] }
 0x5de   : > { %v1556_v61 = vpop.f32.mrf.mxu0  ;;  %v1507_v17 = vpop.f32.mrf.mxu1 }
 0x5df   : > { %v1508_v38 = vadd.f32 %v1507_v17, %v1421_v2  ;;  %v3073_v63 = vadd.f32 %v1556_v61, %v1504_v45  ;;  %v1585_v35 = vmul.f32 %v3079_v5, %v3079_v5 }
 0x5e0   : > { %v1558_v10 = vpop.f32.mrf.mxu0  ;;  %v1511_v56 = vpop.f32.mrf.mxu1 }
 0x5e1   : > { %v1512_v1 = vadd.f32 %v1511_v56, %v1425_v0  ;;  %v3069_v7 = vadd.f32 %v1558_v10, %v1506_v55  ;;  %v1586_v8 = vmul.f32 %v3073_v63, %v3073_v63  ;;  %v1573_v48 = vadd.f32 %v3073_v63, %v3079_v5 }
 0x5e2   : > { %v1560_v32 = vpop.f32.mrf.mxu0  ;;  %v1513_v25 = vpop.f32.mrf.mxu1 }
 0x5e3   : > { %v1514_v42 = vadd.f32 %v1513_v25, %v1425_v0  ;;  %v3063_v20 = vadd.f32 %v1560_v32, %v1508_v38  ;;  %v1587_v27 = vmul.f32 %v3069_v7, %v3069_v7  ;;  %v1593_v52 = vadd.f32 %v1586_v8, %v1585_v35 }
 0x5e4   : > { %v1564_v30 = vpop.f32.mrf.mxu0  ;;  %v1515_v60 = vpop.f32.mrf.mxu1  ;;  %v2261_v25 = vmov 4  }
 0x5e5   : > { %v3051_v24 = vadd.f32 %v1564_v30, %v1512_v1  ;;  %v1516_v33 = vadd.f32 %v1515_v60, %v1429_v4  ;;  %v1588_v23 = vmul.f32 %v3063_v20, %v3063_v20  ;;  %v1576_v22 = vadd.f32 %v3063_v20, %v3069_v7  ;;  %v2238_v60 = vld [vmem:[%s3193_s3] sm:$0xff] }
 0x5e6   : > { %v1566_v62 = vpop.f32.mrf.mxu0  ;;  %v1517_v9 = vpop.f32.mrf.mxu1  ;;  %v2262_v30 = vmov 5  }
 0x5e7   : > { %v3053_v59 = vadd.f32 %v1566_v62, %v1514_v42  ;;  %v1589_v29 = vmul.f32 %v3051_v24, %v3051_v24  ;;  %v1518_v53 = vadd.f32 %v1517_v9, %v1429_v4  ;;  %v1596_v18 = vadd.f32 %v1588_v23, %v1587_v27  ;;  %v2237_v4 = vld [vmem:[%s3193_s3 + $0x8] sm:$0xff]  ;;  %v2239_v62 = vld [vmem:[%s3193_s3 + $0x10] sm:$0xff]  ;;  %v2240_v9 = vld [vmem:[%s3193_s3 + $0x18] sm:$0xff] }
 0x5e8   : > { %v1568_v51 = vpop.f32.mrf.mxu0  ;;  %v3228_v42 = vmov 1  }
 0x5e9   : > { %v1590_v37 = vmul.f32 %v3053_v59, %v3053_v59  ;;  %v3059_v41 = vadd.f32 %v1568_v51, %v1516_v33  ;;  %v1579_v44 = vadd.f32 %v3053_v59, %v3051_v24 }
 0x5ea   : > { %v1570_v15 = vpop.f32.mrf.mxu0 }
 0x5eb   : > { %v3065_v54 = vadd.f32 %v1570_v15, %v1518_v53  ;;  %v1599_v47 = vadd.f32 %v1590_v37, %v1589_v29  ;;  %1580 = vadd.xlane.f32.xlu0 %v1579_v44  ;;  %v1591_v19 = vmul.f32 %v3059_v41, %v3059_v41 }
 0x5ed   : > { %v1592_v26 = vmul.f32 %v3065_v54, %v3065_v54  ;;  %1600 = vadd.xlane.f32.xlu1 %v1599_v47  ;;  %v1582_v31 = vadd.f32 %v3065_v54, %v3059_v41 }
 0x5ef   : > { %v1602_v14 = vadd.f32 %v1592_v26, %v1591_v19 }
 0x5f1   : > { %1603 = vadd.xlane.f32.xlu0 %v1602_v14  ;;  %1583 = vadd.xlane.f32.xlu1 %v1582_v31 }
 0x5f5   : > { %1577 = vadd.xlane.f32.xlu0 %v1576_v22  ;;  %1597 = vadd.xlane.f32.xlu1 %v1596_v18  ;;  %v2263_v22 = vmov 6  }
 0x5f9   : > { %1594 = vadd.xlane.f32.xlu1 %v1593_v52  ;;  %1574 = vadd.xlane.f32.xlu0 %v1573_v48 }
 0x674   : > { %v1581_v50 = vpop.xlane.xlu0 %1580 }
 0x676   : > { %v1601_v43 = vpop.xlane.xlu1 %1600 }
 0x677   : > { %v1607_v28 = vsel %vm361_vm6, %v1581_v50, %v1601_v43 }
 0x67a   : > { %v1584_v12 = vpop.xlane.xlu1 %1583  ;;  %v1604_v46 = vpop.xlane.xlu0 %1603 }
 0x67b   : > { %v1608_v49 = vsel %vm361_vm6, %v1584_v12, %v1604_v46 }
 0x67c   : > { %2074 = vmatprep.subr.mxu0 %v1608_v49 }
 0x67d   : > { %2075 = vmatpush3.msra.mxu0 %v1608_v49 }
 0x67e   : > { %v1598_v13 = vpop.xlane.xlu1 %1597  ;;  %2076 = vmatprep.subr.mxu0 %v1607_v28  ;;  %v1578_v39 = vpop.xlane.xlu0 %1577 }
 0x67f   : > { %2077 = vmatpush3.msra.mxu0 %v1607_v28  ;;  %v1606_v3 = vsel %vm361_vm6, %v1578_v39, %v1598_v13 }
 0x680   : > { %2078 = vmatprep.subr.mxu0 %v1606_v3 }
 0x681   : > { %2079 = vmatpush3.msra.mxu0 %v1606_v3 }
 0x682   : > { %v1595_v6 = vpop.xlane.xlu1 %1594  ;;  %v1575_v11 = vpop.xlane.xlu0 %1574 }
 0x683   : > { %v1605_v21 = vsel %vm361_vm6, %v1575_v11, %v1595_v6 }
 0x684   : > { %2080 = vmatprep.subr.mxu0 %v1605_v21 }
 0x685   : > { %2081 = vmatpush3.msra.mxu0 %v1605_v21 }
 0x686   : > { %2083 = vmatmul.mubr.msk.f32.vlgmr.msra.gmra.mxu0 %vm651_vm10, %v2234_v36 }
 0x687   : > { %2085 = vmatprep.mubr.msk.f32.mxu0 %vm651_vm10, %v2235_v58 }
 0x68a   : > { %2086 = vmatmul.mubr.msk.f32.gmra.mxu0 %vm651_vm10, %v2236_v16 }
 0x746   : > { %v2084_v57 = vpop.f32.mrf.mxu0 }
 0x747   : > { %v1695_v61 = vmul.f32 %v2084_v57, %v2084_v57 }
 0x748   : > { %v1675_v17 = vpop.f32.mrf.mxu0 }
 0x749   : > { %v1694_v0 = vmul.f32 %v1675_v17, %v1675_v17  ;;  %1704 = vrot.lane.b32.xlu1 %v1695_v61, %s2254_s13 }
 0x74a   : > { %v2087_v10 = vpop.f32.mrf.mxu0 }
 0x74b   : > { %1702 = vrot.lane.b32.xlu0 %v1694_v0, %s2254_s13  ;;  %v1697_v1 = vmul.f32 %v2087_v10, %v2087_v10 }
 0x74c   : > { %v1685_v56 = vpop.f32.mrf.mxu0 }
 0x74d   : > { %v1696_v32 = vmul.f32 %v1685_v56, %v1685_v56 }
 0x74f   : > { %1708 = vrot.lane.b32.xlu0 %v1697_v1, %s2254_s13  ;;  %1706 = vrot.lane.b32.xlu1 %v1696_v32, %s2254_s13 }
 0x753   : > { %1729 = vperm.xlu0 %2128, %v2084_v57   ;;  %1724 = vperm.xlu1 %2127, %v1675_v17  }
 0x757   : > { %1734 = vperm.xlu1 %2127, %v1685_v56   ;;  %2130 = vset.pattern.permute.xlu0 %v2261_v25 }
 0x758   : > { %1791 = vperm.xlu0 %2130, %v2237_v4  }
 0x75b   : > { %1739 = vperm.xlu1 %2127, %v2087_v10  }
 0x75c   : > { %2131 = vset.pattern.permute.xlu0 %v2262_v30 }
 0x75d   : > { %1811 = vperm.xlu0 %2131, %v2238_v60  }
 0x75f   : > { %2129 = vset.pattern.permute.xlu1 %v2261_v25 }
 0x760   : > { %1787 = vperm.xlu1 %2129, %v2238_v60  }
 0x761   : > { %2134 = vset.pattern.permute.xlu0 %v3228_v42 }
 0x764   : > { %1795 = vperm.xlu1 %2129, %v2239_v62  }
 0x768   : > { %1799 = vperm.xlu1 %2129, %v2240_v9  }
 0x76c   : > { %2132 = vset.pattern.permute.xlu1 %v2262_v30 }
 0x76d   : > { %1815 = vperm.xlu1 %2132, %v2237_v4  }
 0x771   : > { %2133 = vset.pattern.permute.xlu1 %v3228_v42 }
 0x7bb   : > { %v1705_v33 = vpop.permute.xlu1 %1704 }
 0x7bc   : > { %v1715_v2 = vsub.f32 %v2084_v57, %v1705_v33 }
 0x7bd   : > { %v1703_v29 = vpop.permute.xlu0 %1702 }
 0x7be   : > { %v1719_v51 = vmax.f32 %v1715_v2, 0.0  ;;  %v1714_v38 = vsub.f32 %v1675_v17, %v1703_v29 }
 0x7c0   : > { %v1751_v37 = vadd.f32 1e-05, %v1719_v51  ;;  %v1718_v53 = vmax.f32 %v1714_v38, 0.0 }
 0x7c1   : > { %v1709_v34 = vpop.permute.xlu0 %1708  ;;  %v1707_v44 = vpop.permute.xlu1 %1706 }
 0x7c2   : > { %2191 = vrsqrt.f32 %v1751_v37  ;;  %v1750_v15 = vadd.f32 1e-05, %v1718_v53  ;;  %v1717_v55 = vsub.f32 %v2087_v10, %v1709_v34  ;;  %v1716_v47 = vsub.f32 %v1685_v56, %v1707_v44 }
 0x7c4   : > { %2193 = vrsqrt.f32 %v1750_v15  ;;  %v1721_v40 = vmax.f32 %v1717_v55, 0.0  ;;  %v1720_v19 = vmax.f32 %v1716_v47, 0.0 }
 0x7c6   : > { %v1753_v26 = vadd.f32 1e-05, %v1721_v40  ;;  %v1752_v45 = vadd.f32 1e-05, %v1720_v19 }
 0x7c8   : > { %2195 = vrsqrt.f32 %v1753_v26 }
 0x7c9   : > { %2197 = vrsqrt.f32 %v1752_v45 }
 0x7ce   : > { %v1725_v18 = vpop.permute.xlu1 %1724  ;;  %v1730_v43 = vpop.permute.xlu0 %1729 }
 0x7cf   : > { %v2192_v14 = vpop.eup %2191  ;;  %v1744_v28 = vsub.f32 %v3069_v7, %v1730_v43  ;;  %v1745_v13 = vsub.f32 %v3063_v20, %v1730_v43  ;;  %v1742_v3 = vsub.f32 %v3079_v5, %v1725_v18  ;;  %v1743_v6 = vsub.f32 %v3073_v63, %v1725_v18 }
 0x7d0   : > { %1765 = vperm.xlu1 %2133, %v2192_v14  }
 0x7d1   : > { %v2194_v31 = vpop.eup %2193 }
 0x7d2   : > { %1760 = vperm.xlu0 %2134, %v2194_v31   ;;  %v1735_v8 = vpop.permute.xlu1 %1734 }
 0x7d3   : > { %v1792_v12 = vpop.permute.xlu0 %1791  ;;  %v1746_v20 = vsub.f32 %v3051_v24, %v1735_v8  ;;  %v1747_v56 = vsub.f32 %v3053_v59, %v1735_v8 }
 0x7d5   : > { %v2196_v23 = vpop.eup %2195 }
 0x7d6   : > { %v2198_v27 = vpop.eup %2197  ;;  %1775 = vperm.xlu0 %2134, %v2196_v23   ;;  %v1740_v35 = vpop.permute.xlu1 %1739 }
 0x7d7   : > { %1770 = vperm.xlu1 %2133, %v2198_v27   ;;  %v1748_v5 = vsub.f32 %v3059_v41, %v1740_v35  ;;  %v1749_v63 = vsub.f32 %v3065_v54, %v1740_v35 }
 0x7d8   : > { %v1812_v49 = vpop.permute.xlu0 %1811 }
 0x7da   : > { %2136 = vset.pattern.permute.xlu0 %v2262_v30 }
 0x7db   : > { %2135 = vset.pattern.permute.xlu1 %v2262_v30  ;;  %1823 = vperm.xlu0 %2136, %v2240_v9   ;;  %v1788_v52 = vpop.permute.xlu1 %1787 }
 0x7dc   : > { %1819 = vperm.xlu1 %2135, %v2239_v62  }
 0x7df   : > { %2138 = vset.pattern.permute.xlu0 %v2263_v22  ;;  %v1796_v48 = vpop.permute.xlu1 %1795 }
 0x7e0   : > { %2137 = vset.pattern.permute.xlu1 %v2263_v22  ;;  %1895 = vperm.xlu0 %2138, %v2237_v4  }
 0x7e1   : > { %1891 = vperm.xlu1 %2137, %v2238_v60  }
 0x7e3   : > { %v1800_v50 = vpop.permute.xlu1 %1799 }
 0x7e5   : > { %1899 = vperm.xlu1 %2137, %v2239_v62  }
 0x7e8   : > { %v1816_v46 = vpop.permute.xlu1 %1815 }
 0x7e9   : > { %1903 = vperm.xlu1 %2137, %v2240_v9  }
 0x84b   : > { %v1766_v39 = vpop.permute.xlu1 %1765 }
 0x84c   : > { %v1780_v11 = vmul.f32 %v1766_v39, %v1744_v28  ;;  %v1781_v21 = vmul.f32 %v1766_v39, %v1745_v13 }
 0x84d   : > { %v1761_v36 = vpop.permute.xlu0 %1760 }
 0x84e   : > { %v1804_v58 = vmul.f32 %v1792_v12, %v1780_v11  ;;  %v1805_v16 = vmul.f32 %v1792_v12, %v1781_v21  ;;  %v1778_v57 = vmul.f32 %v1761_v36, %v1742_v3  ;;  %v1779_v61 = vmul.f32 %v1761_v36, %v1743_v6  ;;  %v3229_v6 = vld [vmem:[#allocation4_spill] sm:$0xff] }
 0x850   : > { %v3129_v17 = vadd.f32 %v1816_v46, %v1804_v58  ;;  %v3131_v0 = vadd.f32 %v1816_v46, %v1805_v16  ;;  %v1802_v10 = vmul.f32 %v1788_v52, %v1778_v57  ;;  %v1803_v7 = vmul.f32 %v1788_v52, %v1779_v61  ;;  %v3230_v58 = vld [vmem:[#allocation5_spill] sm:$0xff] }
 0x851   : > { %v1776_v1 = vpop.permute.xlu0 %1775 }
 0x852   : > { %v2034_v32 = vmul.f32 -1.442695, %v3129_v17  ;;  %v2035_v25 = vmul.f32 -1.442695, %v3131_v0  ;;  %v3139_v4 = vadd.f32 %v1812_v49, %v1802_v10  ;;  %v3141_v30 = vadd.f32 %v1812_v49, %v1803_v7  ;;  %v1771_v60 = vpop.permute.xlu1 %1770  ;;  %v3231_v10 = vld [vmem:[#allocation2_spill] sm:$0xff] }
 0x853   : > { %v1784_v42 = vmul.f32 %v1776_v1, %v1748_v5  ;;  %v1785_v62 = vmul.f32 %v1776_v1, %v1749_v63  ;;  %v1782_v9 = vmul.f32 %v1771_v60, %v1746_v20  ;;  %v1783_v24 = vmul.f32 %v1771_v60, %v1747_v56  ;;  %v3232_v5 = vld [vmem:[#allocation3_spill] sm:$0xff] }
 0x854   : > { %2199 = vpow2.f32 %v2034_v32  ;;  %v2032_v59 = vmul.f32 -1.442695, %v3139_v4  ;;  %v2033_v41 = vmul.f32 -1.442695, %v3141_v30 }
 0x855   : > { %2201 = vpow2.f32 %v2035_v25  ;;  %v1808_v54 = vmul.f32 %v1800_v50, %v1784_v42  ;;  %v1809_v33 = vmul.f32 %v1800_v50, %v1785_v62  ;;  %v1806_v2 = vmul.f32 %v1796_v48, %v1782_v9 }
 0x856   : > { %2203 = vpow2.f32 %v2032_v59  ;;  %v1824_v29 = vpop.permute.xlu0 %1823  ;;  %v1807_v51 = vmul.f32 %v1796_v48, %v1783_v24  ;;  %v3234_v24 = vld [vmem:[#allocation9_spill] sm:$0xff] }
 0x857   : > { %2205 = vpow2.f32 %v2033_v41  ;;  %v3145_v38 = vadd.f32 %v1824_v29, %v1808_v54  ;;  %v3147_v37 = vadd.f32 %v1824_v29, %v1809_v33  ;;  %v1820_v53 = vpop.permute.xlu1 %1819  ;;  %v3235_v33 = vld [vmem:[#allocation6_spill] sm:$0xff] }
 0x858   : > { %v3149_v34 = vadd.f32 %v1820_v53, %v1806_v2  ;;  %v3151_v44 = vadd.f32 %v1820_v53, %v1807_v51 }
 0x859   : > { %v2038_v15 = vmul.f32 -1.442695, %v3145_v38  ;;  %v2039_v55 = vmul.f32 -1.442695, %v3147_v37 }
 0x85a   : > { %v2036_v47 = vmul.f32 -1.442695, %v3149_v34  ;;  %v2037_v40 = vmul.f32 -1.442695, %v3151_v44 }
 0x85b   : > { %2207 = vpow2.f32 %v2038_v15  ;;  %v1896_v49 = vpop.permute.xlu0 %1895 }
 0x85c   : > { %2209 = vpow2.f32 %v2039_v55  ;;  %v1892_v43 = vpop.permute.xlu1 %1891  ;;  %v1908_v11 = vadd.f32 %v1896_v49, %v3229_v6  ;;  %v1909_v16 = vadd.f32 %v1896_v49, %v3230_v58 }
 0x85d   : > { %2211 = vpow2.f32 %v2036_v47  ;;  %v1906_v7 = vadd.f32 %v1892_v43, %v3231_v10  ;;  %v1907_v63 = vadd.f32 %v1892_v43, %v3232_v5 }
 0x85e   : > { %2213 = vpow2.f32 %v2037_v40 }
 0x860   : > { %v1900_v28 = vpop.permute.xlu1 %1899 }
 0x861   : > { %v2200_v19 = vpop.eup %2199  ;;  %v1910_v2 = vadd.f32 %v1900_v28, %v3235_v33 }
 0x862   : > { %v2202_v26 = vpop.eup %2201  ;;  %v1860_v45 = vadd.f32 1.0, %v2200_v19 }
 0x863   : > { %v2204_v14 = vpop.eup %2203  ;;  %v1861_v31 = vadd.f32 1.0, %v2202_v26 }
 0x864   : > { %v2206_v23 = vpop.eup %2205  ;;  %2215 = vrcp.f32 %v1860_v45  ;;  %v1858_v27 = vadd.f32 1.0, %v2204_v14  ;;  %v1904_v32 = vpop.permute.xlu1 %1903 }
 0x865   : > { %2217 = vrcp.f32 %v1861_v31  ;;  %v1859_v22 = vadd.f32 1.0, %v2206_v23  ;;  %v1913_v59 = vadd.f32 %v1904_v32, %v3234_v24 }
 0x866   : > { %2219 = vrcp.f32 %v1858_v27 }
 0x867   : > { %2221 = vrcp.f32 %v1859_v22 }
 0x868   : > { %v2208_v18 = vpop.eup %2207 }
 0x869   : > { %v2210_v8 = vpop.eup %2209  ;;  %v1864_v35 = vadd.f32 1.0, %v2208_v18 }
 0x86a   : > { %v2212_v52 = vpop.eup %2211  ;;  %v1865_v48 = vadd.f32 1.0, %v2210_v8 }
 0x86b   : > { %v2214_v50 = vpop.eup %2213  ;;  %2223 = vrcp.f32 %v1864_v35  ;;  %v1862_v12 = vadd.f32 1.0, %v2212_v52 }
 0x86c   : > { %2225 = vrcp.f32 %v1865_v48  ;;  %v1863_v46 = vadd.f32 1.0, %v2214_v50 }
 0x86d   : > { %2227 = vrcp.f32 %v1862_v12 }
 0x86e   : > { %2229 = vrcp.f32 %v1863_v46 }
 0x871   : > { %v2216_v13 = vpop.eup %2215 }
 0x872   : > { %v2218_v39 = vpop.eup %2217  ;;  %v1884_v3 = vmul.f32 %v2216_v13, %v3129_v17 }
 0x873   : > { %v2220_v21 = vpop.eup %2219  ;;  %v1885_v36 = vmul.f32 %v2218_v39, %v3131_v0 }
 0x874   : > { %v2222_v57 = vpop.eup %2221  ;;  %v1916_v61 = vadd.f32 %v1908_v11, %v1884_v3  ;;  %v1882_v17 = vmul.f32 %v2220_v21, %v3139_v4  ;;  %v3233_v4 = vld [vmem:[#allocation8_spill] sm:$0xff] }
 0x875   : > { %v1917_v20 = vadd.f32 %v1909_v16, %v1885_v36  ;;  %v1883_v56 = vmul.f32 %v2222_v57, %v3141_v30  ;;  %v1912_v62 = vadd.f32 %v1904_v32, %v3233_v4 }
 0x876   : > { %1924 = vst [vmem:[%s3163_s22 + $0x10] sm:$0xff] %v1916_v61  ;;  %v1914_v1 = vadd.f32 %v1906_v7, %v1882_v17 }
 0x877   : > { %1925 = vst [vmem:[%s3163_s22 + $0x18] sm:$0xff] %v1917_v20  ;;  %v1915_v25 = vadd.f32 %v1907_v63, %v1883_v56 }
 0x878   : > { %v2224_v0 = vpop.eup %2223  ;;  %1922 = vst [vmem:[%s3163_s22] sm:$0xff] %v1914_v1 }
 0x879   : > { %v2226_v60 = vpop.eup %2225  ;;  %v1888_v42 = vmul.f32 %v2224_v0, %v3145_v38  ;;  %1923 = vst [vmem:[%s3163_s22 + $0x8] sm:$0xff] %v1915_v25  ;;  %v3236_v38 = vld [vmem:[#allocation7_spill] sm:$0xff] }
 0x87a   : > { %v2228_v30 = vpop.eup %2227  ;;  %v1889_v9 = vmul.f32 %v2226_v60, %v3147_v37  ;;  %v1911_v53 = vadd.f32 %v1900_v28, %v3236_v38 }
 0x87b   : > { %v2230_v41 = vpop.eup %2229  ;;  %v1886_v54 = vmul.f32 %v2228_v30, %v3149_v34  ;;  %v1920_v29 = vadd.f32 %v1912_v62, %v1888_v42 }
 0x87c   : > { %v1887_v51 = vmul.f32 %v2230_v41, %v3151_v44  ;;  %v1921_v15 = vadd.f32 %v1913_v59, %v1889_v9 }
 0x87d   : > { %v1918_v55 = vadd.f32 %v1910_v2, %v1886_v54  ;;  %1928 = vst [vmem:[%s3163_s22 + $0x30] sm:$0xff] %v1920_v29 }
 0x87e   : > { %v1919_v47 = vadd.f32 %v1911_v53, %v1887_v51  ;;  %1929 = vst [vmem:[%s3163_s22 + $0x38] sm:$0xff] %v1921_v15 }
 0x87f   : > { %1926 = vst [vmem:[%s3163_s22 + $0x20] sm:$0xff] %v1918_v55 }
 0x880   : > { %1927 = vst [vmem:[%s3163_s22 + $0x28] sm:$0xff] %v1919_v47 }
 0x881 PF: > { %s17_s24 = sadd.s32 1, %s2247_s24  }
 0x882   : > { %p14_p4 = scmp.ge.s32.totalorder %s17_s24, 4  }
 0x884   :  { %16 = sbr.rel (!%p14_p4) target bundleno = 1 (0x1), region = 79 }

// kernel: block_forward.1
= control target key start
LH: loop header
LB: loop body
LE: loop exit
PB: predicated region body
PF: predicated region fallthrough
CT: control target
= control target key end

     0   :  { %s2304_s24 = smov 0   ;;  %s3190_s0 = inlined_call_operand.vmem [shape: f32[2,8,256], index: 0, kind: input, shape index: {}]   ;;  %s3191_s1 = inlined_call_operand.vmem [shape: bf16[64,72], index: 1, kind: input, shape index: {}]   ;;  %s3192_s2 = inlined_call_operand.vmem [shape: bf16[32,288], index: 2, kind: input, shape index: {}]   ;;  %s3193_s3 = inlined_call_operand.vmem [shape: f32[32,8], index: 3, kind: input, shape index: {}]   ;;  %s3194_s4 = inlined_call_operand.vmem [shape: f32[2,32,2], index: 4, kind: input, shape index: {}]   ;;  %s3195_s5 = inlined_call_operand.vmem [shape: f32[32,32], index: 5, kind: input, shape index: {}]   ;;  %s3196_s6 = inlined_call_operand.vmem [shape: f32[9,256], index: 6, kind: input, shape index: {}]   ;;  %s3197_s7 = inlined_call_operand.vmem [shape: f32[2,32,256], index: 7, kind: output, shape index: {}]  }
   0x1 LB: > { %s2310_s25 = sadd.s32 4294967295, %s2247_s24   ;;  %p1991_p0 = scmp.ge.s32.totalorder %s2247_s24, 1  ;;  %s2247_s24 = sphi %s2304_s24, %s17_s24  }
   0x2   : > { %p237_p1 = scmp.lt.s32.totalorder %s2247_s24, 3 }
   0x4   : > { %p238_p2 = pnand %p1991_p0, %p237_p1 }
   0x6   : > { %241 = sbr.rel (%p238_p2) target bundleno = 2177 (0x881), region = 48 }
   0xb   : > { %p269_p3 = scmp.lt.s32.totalorder %s2310_s25, 1  ;;  %s2249_s8 = smov 113   ;;  %v3200_v2 = vmov 0   ;;  %v2364_v3 = vld [vmem:[%s3193_s3 + $0x18] sm:$0xff]  ;;  %v2369_v4 = vld [vmem:[%s3193_s3 + $0x10] sm:$0xff]  ;;  %v2376_v5 = vld [vmem:[%s3193_s3] sm:$0xff]  ;;  %v306_v7 = vlaneseq }
   0xc   : > { %s2250_s9 = smov 111   ;;  %s2251_s10 = smov 112   ;;  %546 = vmatprep.mubr.bf16.mxu0 %v3200_v2  ;;  %2111 = vset.pattern.permute.xlu0 %v3200_v2  ;;  %v2381_v6 = vld [vmem:[%s3193_s3 + $0x8] sm:$0xff]  ;;  %v2391_v12 = vld [vmem:[%s3196_s6] sm:$0xff]  ;;  %vm440_vm0 = vcmask 908288   ;;  %vm400_vm1 = vcmask 924672  }
   0xd   : > { %s2316_s26 = scalar_select %p269_p3, %s2310_s25, 1  ;;  %2112 = vset.pattern.permute.xlu1 %v3200_v2  ;;  %v2385_v8 = vshrl.u32 %v306_v7, 7  ;;  %v2397_v14 = vld [vmem:[%s3196_s6 + $0x8] sm:$0xff]  ;;  %v1997_v15 = vld [vmem:[%s3196_s6 + $0x18] ss:$0 sm:$0xff]  ;;  %vm420_vm2 = vcmask 916480  }
   0xe   : > { %s2252_s11 = smov 127   ;;  %s2253_s12 = smov 15   ;;  %v1996_v16 = vld [vmem:[%s3196_s6 + $0x10] ss:$0 sm:$0xff]  ;;  %vm507_vm3 = vcmask 1043456   ;;  %vm380_vm4 = vcmask 1039360  }
   0xf   : > { %s2042_s27 = sshll.u32 %s2316_s26, 4  ;;  %s2254_s13 = smov 1   ;;  %v408_v11 = vsub.s32 6, %v2385_v8  ;;  %v428_v13 = vsub.s32 7, %v2385_v8  ;;  %v388_v20 = vsub.s32 5, %v2385_v8  ;;  %v348_v49 = vsub.s32 2, %v2385_v8 }
  0x10   : > { %s273_s30 = scalar_lea.vmem %s3190_s0, %s2042_s27  ;;  %s2256_s14 = smov 17   ;;  %v368_v52 = vsub.s32 3, %v2385_v8  ;;  %vm341_vm5 = vcmask 121856   ;;  %vm361_vm6 = vcmask 7168   ;;  %vm301_vm7 = vcmask 138240  }
  0x11   : > { %v2322_v0 = vld [vmem:[%s273_s30] sm:$0xff]  ;;  %v2324_v1 = vld [vmem:[%s273_s30 + $0x8] sm:$0xff]  ;;  %s2257_s15 = smov 16   ;;  %v2406_v17 = vrot.slane %v2391_v12, %v408_v11  ;;  %v2410_v21 = vrot.slane %v2397_v14, %v408_v11  ;;  %v2414_v23 = vrot.slane %v2391_v12, %v428_v13  ;;  %v2419_v26 = vrot.slane %v2397_v14, %v428_v13  ;;  %s2019_s27 = sshll.u32 %s2310_s25, 5 }
  0x12   : > { %396 = vrot.lane.b32.xlu1 %v2322_v0, %s2249_s8  ;;  %436 = vrot.lane.b32.xlu0 %v2322_v0, %s2250_s9  ;;  %v2423_v34 = vrot.slane %v2391_v12, %v388_v20  ;;  %v2429_v38 = vrot.slane %v2397_v14, %v388_v20  ;;  %v2443_v57 = vrot.slane %v2391_v12, %v348_v49  ;;  %vm321_vm8 = vcmask 130048   ;;  %s946_s30 = scalar_lea.vmem %s3194_s4, %s2019_s27  ;;  %s2043_s19 = sshll.u32 %s2316_s26, 6 }
  0x13   : > { %v2446_v58 = vrot.slane %v2397_v14, %v348_v49  ;;  %v2449_v59 = vrot.slane %v2391_v12, %v368_v52  ;;  %v2452_v60 = vrot.slane %v2397_v14, %v368_v52  ;;  %vm494_vm9 = vcmask 588800   ;;  %s3163_s22 = scalar_lea.vmem %s3197_s7, %s2043_s19 }
  0x14   : > { %vm651_vm10 = vcmask 261120  }
  0x16   : > { %398 = vrot.lane.b32.xlu1 %v2324_v1, %s2249_s8  ;;  %438 = vrot.lane.b32.xlu0 %v2324_v1, %s2250_s9 }
  0x1a   : > { %418 = vrot.lane.b32.xlu1 %v2324_v1, %s2251_s10  ;;  %416 = vrot.lane.b32.xlu0 %v2322_v0, %s2251_s10 }
  0x1e   : > { %378 = vrot.lane.b32.xlu1 %v2324_v1, %s2252_s11  ;;  %376 = vrot.lane.b32.xlu0 %v2322_v0, %s2252_s11 }
  0x22   : > { %339 = vrot.lane.b32.xlu1 %v2322_v0, %s2253_s12  ;;  %336 = vrot.lane.b32.xlu0 %v2324_v1, %s2253_s12 }
  0x26   : > { %359 = vrot.lane.b32.xlu1 %v2322_v0, %s2254_s13  ;;  %356 = vrot.lane.b32.xlu0 %v2324_v1, %s2254_s13 }
  0x2a   : > { %299 = vrot.lane.b32.xlu1 %v2322_v0, %s2256_s14  ;;  %295 = vrot.lane.b32.xlu0 %v2324_v1, %s2256_s14 }
  0x2e   : > { %319 = vrot.lane.b32.xlu1 %v2322_v0, %s2257_s15  ;;  %316 = vrot.lane.b32.xlu0 %v2324_v1, %s2257_s15 }
  0x32   : > { %604 = vperm.xlu0 %2111, %v2364_v3   ;;  %599 = vperm.xlu1 %2112, %v2369_v4  }
  0x36   : > { %589 = vperm.xlu0 %2111, %v2376_v5   ;;  %594 = vperm.xlu1 %2112, %v2381_v6  }
  0x84   : > { %v397_v9 = vpop.permute.xlu1 %396  ;;  %v437_v10 = vpop.permute.xlu0 %436 }
  0x88   : > { %v399_v18 = vpop.permute.xlu1 %398  ;;  %v439_v19 = vpop.permute.xlu0 %438 }
  0x89   : > { %v441_v22 = vsel %vm440_vm0, %v437_v10, %v439_v19  ;;  %v445_v24 = vsel %vm440_vm0, %v439_v19, %v437_v10  ;;  %v401_v25 = vsel %vm400_vm1, %v397_v9, %v399_v18  ;;  %v405_v29 = vsel %vm400_vm1, %v399_v18, %v397_v9 }
  0x8a   : > { %v455_v27 = vmul.f32 %v1997_v15, %v445_v24  ;;  %v454_v28 = vmul.f32 %v1996_v16, %v441_v22  ;;  %v414_v35 = vmul.f32 %v2406_v17, %v401_v25  ;;  %v415_v39 = vmul.f32 %v2410_v21, %v405_v29 }
  0x8b   : > { %v308_v9 = vsub.s32 0, %v2385_v8  ;;  %v328_v10 = vsub.s32 1, %v2385_v8 }
  0x8c   : > { %v419_v30 = vpop.permute.xlu1 %418  ;;  %v417_v31 = vpop.permute.xlu0 %416  ;;  %v465_v32 = vpack.c.bf16 %v455_v27, %v455_v27  ;;  %v464_v33 = vpack.c.bf16 %v454_v28, %v454_v28 }
  0x8d   : > { %v421_v36 = vsel %vm420_vm2, %v417_v31, %v419_v30  ;;  %v425_v37 = vsel %vm420_vm2, %v419_v30, %v417_v31  ;;  %v2465_v24 = vrot.slane %v2391_v12, %v308_v9  ;;  %v2468_v25 = vrot.slane %v2397_v14, %v308_v9 }
  0x8e   : > { %v434_v40 = vmul.f32 %v2414_v23, %v421_v36  ;;  %v435_v41 = vmul.f32 %v2419_v26, %v425_v37  ;;  %2002 = vmatprep.subr.msk.bf16.mxu0 %vm507_vm3, %v465_v32  ;;  %v509_v42 = vsel %vm507_vm3, %v464_v33, 0  ;;  %v2471_v8 = vrot.slane %v2391_v12, %v328_v10 }
  0x8f   : > { %521 = vmatpush1.bf16.msra.mxu0 %v509_v42  ;;  %v2474_v27 = vrot.slane %v2397_v14, %v328_v10 }
  0x90   : > { %v379_v43 = vpop.permute.xlu1 %378  ;;  %v377_v44 = vpop.permute.xlu0 %376  ;;  %v463_v45 = vpack.c.bf16 %v435_v41, %v415_v39  ;;  %v462_v46 = vpack.c.bf16 %v434_v40, %v414_v35  ;;  %v2139_v40 = vld [vmem:[%s3191_s1] sm:$0xff]   ;;  %v2140_v41 = vld [vmem:[%s3191_s1 + $0x8] sm:$0xff]  }
  0x91   : > { %v381_v47 = vsel %vm380_vm4, %v377_v44, %v379_v43  ;;  %v385_v48 = vsel %vm380_vm4, %v379_v43, %v377_v44 }
  0x92   : > { %v394_v50 = vmul.f32 %v2423_v34, %v381_v47  ;;  %v395_v51 = vmul.f32 %v2429_v38, %v385_v48  ;;  %522 = vmatprep.subr.bf16.mxu0 %v463_v45 }
  0x93   : > { %523 = vmatpush1.bf16.msra.mxu0 %v462_v46 }
  0x94   : > { %v340_v53 = vpop.permute.xlu1 %339  ;;  %v337_v54 = vpop.permute.xlu0 %336  ;;  %v461_v55 = vpack.c.bf16 %v395_v51, %v2324_v1  ;;  %v460_v56 = vpack.c.bf16 %v394_v50, %v2322_v0 }
  0x95   : > { %v342_v61 = vsel %vm341_vm5, %v340_v53, %v337_v54  ;;  %v345_v62 = vsel %vm341_vm5, %v337_v54, %v340_v53 }
  0x96   : > { %524 = vmatprep.subr.bf16.mxu0 %v461_v55  ;;  %v354_v11 = vmul.f32 %v2443_v57, %v345_v62  ;;  %v355_v13 = vmul.f32 %v2446_v58, %v342_v61 }
  0x97   : > { %525 = vmatpush1.bf16.msra.mxu0 %v460_v56 }
  0x98   : > { %v360_v63 = vpop.permute.xlu1 %359  ;;  %v357_v0 = vpop.permute.xlu0 %356 }
  0x99   : > { %v362_v1 = vsel %vm361_vm6, %v360_v63, %v357_v0  ;;  %v365_v7 = vsel %vm361_vm6, %v357_v0, %v360_v63 }
  0x9a   : > { %v374_v15 = vmul.f32 %v2449_v59, %v365_v7  ;;  %v375_v16 = vmul.f32 %v2452_v60, %v362_v1 }
  0x9c   : > { %v300_v18 = vpop.permute.xlu1 %299  ;;  %v296_v19 = vpop.permute.xlu0 %295  ;;  %v459_v20 = vpack.c.bf16 %v375_v16, %v355_v13  ;;  %v458_v22 = vpack.c.bf16 %v374_v15, %v354_v11  ;;  %v2141_v13 = vld [vmem:[%s3191_s1 + $0x10] sm:$0xff]  }
  0x9d   : > { %v302_v28 = vsel %vm301_vm7, %v300_v18, %v296_v19  ;;  %v305_v29 = vsel %vm301_vm7, %v296_v19, %v300_v18 }
  0x9e   : > { %526 = vmatprep.subr.bf16.mxu0 %v459_v20  ;;  %v314_v35 = vmul.f32 %v2465_v24, %v305_v29  ;;  %v315_v36 = vmul.f32 %v2468_v25, %v302_v28 }
  0x9f   : > { %527 = vmatpush1.bf16.msra.mxu0 %v458_v22 }
  0xa0   : > { %v320_v30 = vpop.permute.xlu1 %319  ;;  %v317_v31 = vpop.permute.xlu0 %316 }
  0xa1   : > { %v322_v32 = vsel %vm321_vm8, %v320_v30, %v317_v31  ;;  %v325_v33 = vsel %vm321_vm8, %v317_v31, %v320_v30 }
  0xa2   : > { %v334_v12 = vmul.f32 %v2471_v8, %v325_v33  ;;  %v335_v14 = vmul.f32 %v2474_v27, %v322_v32  ;;  %v2142_v32 = vld [vmem:[%s3191_s1 + $0x18] sm:$0xff]  }
  0xa4   : > { %v457_v37 = vpack.c.bf16 %v335_v14, %v315_v36  ;;  %v456_v39 = vpack.c.bf16 %v334_v12, %v314_v35  ;;  %v286_v36 = vld [vmem:[%s3195_s5] sm:$0xff] }
  0xa6   : > { %528 = vmatprep.subr.bf16.mxu0 %v457_v37 }
  0xa7   : > { %529 = vmatpush1.bf16.msra.mxu0 %v456_v39 }
  0xaa   : > { %2003 = vmatmul.mubr.msk.bf16.vlgmr.msra.gmra.mxu0 %vm494_vm9, %v2139_v40 }
  0xab   : > { %556 = vmatprep.mubr.bf16.mxu0 %v3200_v2 }
  0xad   : > { %v600_v46 = vpop.permute.xlu1 %599  ;;  %v605_v51 = vpop.permute.xlu0 %604 }
  0xb1   : > { %v595_v61 = vpop.permute.xlu1 %594  ;;  %v590_v11 = vpop.permute.xlu0 %589 }
  0xb2   : > { %2004 = vmatmul.mubr.msk.bf16.gmra.mxu0 %vm494_vm9, %v2140_v41 }
  0xb3   : > { %566 = vmatprep.mubr.bf16.mxu0 %v3200_v2 }
  0xba   : > { %2005 = vmatmul.mubr.msk.bf16.gmra.mxu0 %vm494_vm9, %v2141_v13 }
  0xbb   : > { %576 = vmatprep.mubr.bf16.mxu0 %v3200_v2 }
  0xc2   : > { %2006 = vmatmul.mubr.msk.bf16.gmra.mxu0 %vm494_vm9, %v2142_v32 }
  0xc3   : > { %2068 = vmatprep.mubr.msk.f32.mxu0 %vm651_vm10, %v286_v36 }
 0x16a   : > { %v548_v42 = vpop.f32.mrf.mxu0 }
 0x16b   : > { %v2526_v20 = vadd.f32 %v590_v11, %v548_v42 }
 0x16c   : > { %v550_v43 = vpop.f32.mrf.mxu0 }
 0x16d   : > { %v2519_v15 = vadd.f32 %v590_v11, %v550_v43  ;;  %v627_v31 = vmul.f32 %v2526_v20, %v2526_v20 }
 0x16e   : > { %v552_v44 = vpop.f32.mrf.mxu0 }
 0x16f   : > { %v2510_v7 = vadd.f32 %v595_v61, %v552_v44  ;;  %v628_v30 = vmul.f32 %v2519_v15, %v2519_v15  ;;  %v615_v35 = vadd.f32 %v2519_v15, %v2526_v20 }
 0x170   : > { %v554_v45 = vpop.f32.mrf.mxu0 }
 0x171   : > { %v2506_v63 = vadd.f32 %v595_v61, %v554_v45  ;;  %v629_v22 = vmul.f32 %v2510_v7, %v2510_v7  ;;  %v635_v33 = vadd.f32 %v628_v30, %v627_v31  ;;  %v2258_v30 = vmov 2  }
 0x172   : > { %v558_v47 = vpop.f32.mrf.mxu0  ;;  %v3198_v31 = vmov 1  }
 0x173   : > { %v2494_v48 = vadd.f32 %v600_v46, %v558_v47  ;;  %v630_v19 = vmul.f32 %v2506_v63, %v2506_v63  ;;  %v618_v28 = vadd.f32 %v2506_v63, %v2510_v7 }
 0x174   : > { %v560_v49 = vpop.f32.mrf.mxu0 }
 0x175   : > { %v2496_v50 = vadd.f32 %v600_v46, %v560_v49  ;;  %v631_v55 = vmul.f32 %v2494_v48, %v2494_v48  ;;  %v638_v29 = vadd.f32 %v630_v19, %v629_v22  ;;  %v287_v49 = vld [vmem:[%s3195_s5 + $0x8] sm:$0xff] }
 0x176   : > { %v562_v52 = vpop.f32.mrf.mxu0 }
 0x177   : > { %v2498_v53 = vadd.f32 %v605_v51, %v562_v52  ;;  %v621_v54 = vadd.f32 %v2496_v50, %v2494_v48  ;;  %v632_v56 = vmul.f32 %v2496_v50, %v2496_v50  ;;  %v289_v52 = vld [vmem:[%s3195_s5 + $0x18] sm:$0xff] }
 0x178   : > { %v564_v62 = vpop.f32.mrf.mxu0 }
 0x179   : > { %v2508_v0 = vadd.f32 %v605_v51, %v564_v62  ;;  %622 = vadd.xlane.f32.xlu0 %v621_v54  ;;  %v641_v1 = vadd.f32 %v632_v56, %v631_v55  ;;  %v633_v9 = vmul.f32 %v2498_v53, %v2498_v53  ;;  %v288_v51 = vld [vmem:[%s3195_s5 + $0x10] sm:$0xff] }
 0x17a   : > { %v2564_v54 = vpop.f32.mrf.mxu0 }
 0x17b   : > { %642 = vadd.xlane.f32.xlu1 %v641_v1  ;;  %v634_v10 = vmul.f32 %v2508_v0, %v2508_v0  ;;  %v624_v18 = vadd.f32 %v2508_v0, %v2498_v53  ;;  %3208 = vst [vmem:[#allocation2_spill] sm:$0xff] %v2564_v54 }
 0x17c   : > { %v2566_v55 = vpop.f32.mrf.mxu0 }
 0x17d   : > { %v644_v16 = vadd.f32 %v634_v10, %v633_v9  ;;  %3209 = vst [vmem:[#allocation3_spill] sm:$0xff] %v2566_v55 }
 0x17e   : > { %v2568_v56 = vpop.f32.mrf.mxu0 }
 0x17f   : > { %645 = vadd.xlane.f32.xlu0 %v644_v16  ;;  %625 = vadd.xlane.f32.xlu1 %v624_v18  ;;  %3210 = vst [vmem:[#allocation4_spill] sm:$0xff] %v2568_v56 }
 0x180   : > { %v2570_v61 = vpop.f32.mrf.mxu0 }
 0x181   : > { %3211 = vst [vmem:[#allocation5_spill] sm:$0xff] %v2570_v61 }
 0x182   : > { %v2572_v62 = vpop.f32.mrf.mxu0 }
 0x183   : > { %619 = vadd.xlane.f32.xlu0 %v618_v28  ;;  %639 = vadd.xlane.f32.xlu1 %v638_v29  ;;  %3212 = vst [vmem:[#allocation6_spill] sm:$0xff] %v2572_v62 }
 0x184   : > { %v2574_v1 = vpop.f32.mrf.mxu0 }
 0x185   : > { %3213 = vst [vmem:[#allocation7_spill] sm:$0xff] %v2574_v1 }
 0x186   : > { %v2576_v9 = vpop.f32.mrf.mxu0 }
 0x187   : > { %636 = vadd.xlane.f32.xlu1 %v635_v33  ;;  %616 = vadd.xlane.f32.xlu0 %v615_v35  ;;  %3214 = vst [vmem:[#allocation8_spill] sm:$0xff] %v2576_v9 }
 0x188   : > { %v2578_v10 = vpop.f32.mrf.mxu0 }
 0x189   : > { %3215 = vst [vmem:[#allocation9_spill] sm:$0xff] %v2578_v10 }
 0x202   : > { %v623_v12 = vpop.xlane.xlu0 %622 }
 0x204   : > { %v643_v14 = vpop.xlane.xlu1 %642 }
 0x205   : > { %v649_v41 = vsel %vm361_vm6, %v623_v12, %v643_v14 }
 0x208   : > { %v626_v37 = vpop.xlane.xlu1 %625  ;;  %v646_v39 = vpop.xlane.xlu0 %645 }
 0x209   : > { %v650_v40 = vsel %vm361_vm6, %v626_v37, %v646_v39 }
 0x20a   : > { %2060 = vmatprep.subr.mxu0 %v650_v40 }
 0x20b   : > { %2061 = vmatpush3.msra.mxu0 %v650_v40 }
 0x20c   : > { %v640_v42 = vpop.xlane.xlu1 %639  ;;  %2062 = vmatprep.subr.mxu0 %v649_v41  ;;  %v620_v43 = vpop.xlane.xlu0 %619 }
 0x20d   : > { %2063 = vmatpush3.msra.mxu0 %v649_v41  ;;  %v648_v44 = vsel %vm361_vm6, %v620_v43, %v640_v42 }
 0x20e   : > { %2064 = vmatprep.subr.mxu0 %v648_v44 }
 0x20f   : > { %2065 = vmatpush3.msra.mxu0 %v648_v44 }
 0x210   : > { %v637_v45 = vpop.xlane.xlu1 %636  ;;  %v617_v46 = vpop.xlane.xlu0 %616 }
 0x211   : > { %v647_v47 = vsel %vm361_vm6, %v617_v46, %v637_v45 }
 0x212   : > { %2066 = vmatprep.subr.mxu0 %v647_v47 }
 0x213   : > { %2067 = vmatpush3.msra.mxu0 %v647_v47 }
 0x214   : > { %2069 = vmatmul.mubr.msk.f32.vlgmr.msra.gmra.mxu0 %vm651_vm10, %v287_v49 }
 0x215   : > { %2071 = vmatprep.mubr.msk.f32.mxu0 %vm651_vm10, %v288_v51 }
 0x218   : > { %2072 = vmatmul.mubr.msk.f32.gmra.mxu0 %vm651_vm10, %v289_v52 }
 0x219   : > { %1552 = vmatprep.mubr.bf16.mxu0 %v3200_v2 }
 0x2d4   : > { %v2070_v11 = vpop.f32.mrf.mxu0 }
 0x2d5   : > { %v750_v29 = vmul.f32 %v2070_v11, %v2070_v11 }
 0x2d6   : > { %v730_v13 = vpop.f32.mrf.mxu0 }
 0x2d7   : > { %v749_v28 = vmul.f32 %v730_v13, %v730_v13 }
 0x2d8   : > { %v2073_v16 = vpop.f32.mrf.mxu0 }
 0x2d9   : > { %v752_v18 = vmul.f32 %v2073_v16, %v2073_v16 }
 0x2da   : > { %v740_v19 = vpop.f32.mrf.mxu0 }
 0x2db   : > { %v751_v22 = vmul.f32 %v740_v19, %v740_v19  ;;  %763 = vrot.lane.b32.xlu1 %v752_v18, %s2254_s13 }
 0x2dd   : > { %761 = vrot.lane.b32.xlu0 %v751_v22, %s2254_s13 }
 0x2df   : > { %757 = vrot.lane.b32.xlu1 %v749_v28, %s2254_s13 }
 0x2e1   : > { %759 = vrot.lane.b32.xlu0 %v750_v29, %s2254_s13  ;;  %v948_v29 = vld [vmem:[%s946_s30 + $0x8] sm:$0xff] }
 0x2e3   : > { %789 = vperm.xlu1 %2112, %v740_v19  }
 0x2e5   : > { %794 = vperm.xlu0 %2111, %v2073_v16  }
 0x2e7   : > { %779 = vperm.xlu1 %2112, %v730_v13  }
 0x2e9   : > { %2114 = vset.pattern.permute.xlu0 %v2258_v30 }
 0x2ea   : > { %874 = vperm.xlu0 %2114, %v2369_v4  }
 0x2eb   : > { %784 = vperm.xlu1 %2112, %v2070_v11  }
 0x2ee   : > { %2115 = vset.pattern.permute.xlu0 %v3198_v31 }
 0x2ef   : > { %850 = vperm.xlu0 %2115, %v2369_v4   ;;  %2113 = vset.pattern.permute.xlu1 %v3198_v31 }
 0x2f0   : > { %854 = vperm.xlu1 %2113, %v2364_v3  }
 0x34d   : > { %v764_v32 = vpop.permute.xlu1 %763 }
 0x34e   : > { %v772_v33 = vsub.f32 %v2073_v16, %v764_v32  ;;  %v950_v16 = vld [vmem:[%s946_s30 + $0x18] sm:$0xff]  ;;  %v952_v32 = vadd.f32 1.0, %v948_v29 }
 0x34f   : > { %v762_v35 = vpop.permute.xlu0 %761  ;;  %v954_v22 = vadd.f32 1.0, %v950_v16 }
 0x350   : > { %v776_v36 = vmax.f32 %v772_v33, 0.0  ;;  %v771_v45 = vsub.f32 %v740_v19, %v762_v35  ;;  %v947_v19 = vld [vmem:[%s946_s30] sm:$0xff] }
 0x351   : > { %v758_v12 = vpop.permute.xlu1 %757  ;;  %v951_v28 = vadd.f32 1.0, %v947_v19 }
 0x352   : > { %v808_v14 = vadd.f32 1e-05, %v776_v36  ;;  %v769_v37 = vsub.f32 %v730_v13, %v758_v12  ;;  %v775_v46 = vmax.f32 %v771_v45, 0.0 }
 0x353   : > { %v760_v39 = vpop.permute.xlu0 %759 }
 0x354   : > { %2151 = vrsqrt.f32 %v808_v14  ;;  %v773_v40 = vmax.f32 %v769_v37, 0.0  ;;  %v770_v41 = vsub.f32 %v2070_v11, %v760_v39  ;;  %v807_v49 = vadd.f32 1e-05, %v775_v46  ;;  %v949_v11 = vld [vmem:[%s946_s30 + $0x10] sm:$0xff] }
 0x355   : > { %v953_v13 = vadd.f32 1.0, %v949_v11 }
 0x356   : > { %v805_v42 = vadd.f32 1e-05, %v773_v40  ;;  %v774_v43 = vmax.f32 %v770_v41, 0.0 }
 0x358   : > { %2153 = vrsqrt.f32 %v805_v42  ;;  %v806_v44 = vadd.f32 1e-05, %v774_v43 }
 0x35a   : > { %2155 = vrsqrt.f32 %v806_v44 }
 0x35b   : > { %2157 = vrsqrt.f32 %v807_v49 }
 0x360   : > { %v795_v36 = vpop.permute.xlu0 %794 }
 0x361   : > { %v2152_v47 = vpop.eup %2151 }
 0x362   : > { %830 = vperm.xlu0 %2115, %v2152_v47  }
 0x365   : > { %v2154_v51 = vpop.eup %2153  ;;  %v2607_v14 = vpop.permute.xlu0 %874 }
 0x366   : > { %815 = vperm.xlu0 %2115, %v2154_v51  }
 0x367   : > { %v2156_v52 = vpop.eup %2155 }
 0x368   : > { %820 = vperm.xlu1 %2113, %v2156_v52   ;;  %v2158_v18 = vpop.eup %2157 }
 0x36a   : > { %846 = vperm.xlu0 %2115, %v2381_v6   ;;  %v2609_v39 = vpop.permute.xlu0 %850 }
 0x36c   : > { %2116 = vset.pattern.permute.xlu1 %v2258_v30 }
 0x36d   : > { %878 = vperm.xlu1 %2116, %v2364_v3  }
 0x36e   : > { %2119 = vset.pattern.permute.xlu0 %v3200_v2 }
 0x36f   : > { %967 = vperm.xlu0 %2119, %v953_v13  }
 0x371   : > { %2117 = vset.pattern.permute.xlu1 %v3198_v31 }
 0x372   : > { %842 = vperm.xlu1 %2117, %v2376_v5  }
 0x373   : > { %2122 = vset.pattern.permute.xlu0 %v3198_v31 }
 0x374   : > { %1000 = vperm.xlu0 %2122, %v950_v16  }
 0x376   : > { %825 = vperm.xlu1 %2117, %v2158_v18  }
 0x378   : > { %985 = vperm.xlu0 %2122, %v947_v19  }
 0x37a   : > { %2118 = vset.pattern.permute.xlu1 %v2258_v30  ;;  %v2605_v30 = vpop.permute.xlu1 %789 }
 0x37b   : > { %866 = vperm.xlu1 %2118, %v2376_v5  }
 0x37e   : > { %v780_v33 = vpop.permute.xlu1 %779 }
 0x37f   : > { %870 = vperm.xlu1 %2118, %v2381_v6   ;;  %v798_v44 = vsub.f32 %v2519_v15, %v780_v33  ;;  %v797_v46 = vsub.f32 %v2526_v20, %v780_v33 }
 0x382   : > { %v785_v35 = vpop.permute.xlu1 %784 }
 0x383   : > { %2120 = vset.pattern.permute.xlu1 %v3200_v2  ;;  %v799_v47 = vsub.f32 %v2510_v7, %v785_v35  ;;  %v800_v49 = vsub.f32 %v2506_v63, %v785_v35 }
 0x384   : > { %972 = vperm.xlu1 %2120, %v954_v22  }
 0x386   : > { %v855_v12 = vpop.permute.xlu1 %854 }
 0x388   : > { %2121 = vset.pattern.permute.xlu1 %v3198_v31 }
 0x389   : > { %995 = vperm.xlu1 %2121, %v949_v11  }
 0x38d   : > { %2123 = vset.pattern.permute.xlu1 %v3200_v2 }
 0x38e   : > { %957 = vperm.xlu1 %2123, %v951_v28  }
 0x392   : > { %962 = vperm.xlu1 %2123, %v952_v32  }
 0x396   : > { %2124 = vset.pattern.permute.xlu1 %v3198_v31 }
 0x397   : > { %990 = vperm.xlu1 %2124, %v948_v29  }
 0x3dd   : > { %v831_v41 = vpop.permute.xlu0 %830 }
 0x3e1   : > { %v816_v43 = vpop.permute.xlu0 %815 }
 0x3e2   : > { %v834_v51 = vmul.f32 %v816_v43, %v798_v44  ;;  %v833_v52 = vmul.f32 %v816_v43, %v797_v46 }
 0x3e3   : > { %v821_v37 = vpop.permute.xlu1 %820 }
 0x3e4   : > { %v835_v11 = vmul.f32 %v821_v37, %v799_v47  ;;  %v836_v13 = vmul.f32 %v821_v37, %v800_v49 }
 0x3e5   : > { %v847_v18 = vpop.permute.xlu0 %846 }
 0x3e6   : > { %v859_v29 = vmul.f32 %v847_v18, %v835_v11  ;;  %v860_v32 = vmul.f32 %v847_v18, %v836_v13  ;;  %v804_v11 = vsub.f32 %v2508_v0, %v795_v36 }
 0x3e8   : > { %v879_v40 = vpop.permute.xlu1 %878 }
 0x3ed   : > { %v843_v42 = vpop.permute.xlu1 %842 }
 0x3ee   : > { %v858_v16 = vmul.f32 %v843_v42, %v834_v51  ;;  %v857_v22 = vmul.f32 %v843_v42, %v833_v52 }
 0x3f1   : > { %v2612_v45 = vpop.permute.xlu1 %825 }
 0x3f6   : > { %v867_v19 = vpop.permute.xlu1 %866 }
 0x3f7   : > { %v882_v28 = vadd.f32 %v867_v19, %v858_v16  ;;  %v881_v15 = vadd.f32 %v867_v19, %v857_v22  ;;  %v840_v16 = vmul.f32 %v831_v41, %v804_v11  ;;  %v802_v22 = vsub.f32 %v2496_v50, %v2605_v30 }
 0x3f9   : > { %v2012_v31 = vmul.f32 -1.442695, %v882_v28  ;;  %v2011_v33 = vmul.f32 -1.442695, %v881_v15 }
 0x3fa   : > { %v871_v2 = vpop.permute.xlu1 %870 }
 0x3fb   : > { %v883_v1 = vadd.f32 %v871_v2, %v859_v29  ;;  %v884_v20 = vadd.f32 %v871_v2, %v860_v32  ;;  %2159 = vpow2.f32 %v2012_v31  ;;  %v803_v31 = vsub.f32 %v2498_v53, %v795_v36 }
 0x3fc   : > { %v864_v32 = vmul.f32 %v855_v12, %v840_v16  ;;  %v838_v53 = vmul.f32 %v2612_v45, %v802_v22 }
 0x3fd   : > { %v2013_v7 = vmul.f32 -1.442695, %v883_v1  ;;  %v2014_v63 = vmul.f32 -1.442695, %v884_v20  ;;  %v839_v13 = vmul.f32 %v831_v41, %v803_v31  ;;  %v801_v41 = vsub.f32 %v2494_v48, %v2605_v30 }
 0x3ff   : > { %2161 = vpow2.f32 %v2013_v7  ;;  %v2617_v35 = vpop.permute.xlu1 %972  ;;  %v863_v18 = vmul.f32 %v855_v12, %v839_v13  ;;  %v2627_v7 = vpop.permute.xlu0 %967 }
 0x400   : > { %2163 = vpow2.f32 %v2014_v63 }
 0x401   : > { %2165 = vpow2.f32 %v2011_v33  ;;  %v2625_v33 = vadd.f32 %v879_v40, %v863_v18 }
 0x403   : > { %v2017_v50 = vmul.f32 -1.442695, %v2625_v33  ;;  %v2640_v31 = vpop.permute.xlu0 %1000 }
 0x404   : > { %v2619_v51 = vpop.permute.xlu1 %995 }
 0x407   : > { %v986_v11 = vpop.permute.xlu0 %985 }
 0x408   : > { %v2160_v37 = vpop.eup %2159 }
 0x409   : > { %v914_v44 = vadd.f32 1.0, %v2160_v37  ;;  %v958_v52 = vpop.permute.xlu1 %957 }
 0x40c   : > { %v2162_v43 = vpop.eup %2161 }
 0x40d   : > { %v2164_v42 = vpop.eup %2163  ;;  %v915_v46 = vadd.f32 1.0, %v2162_v43  ;;  %v963_v19 = vpop.permute.xlu1 %962 }
 0x40e   : > { %v2166_v47 = vpop.eup %2165  ;;  %v916_v49 = vadd.f32 1.0, %v2164_v42  ;;  %v2630_v42 = vadd.f32 %v879_v40, %v864_v32 }
 0x40f   : > { %2167 = vrcp.f32 %v915_v46  ;;  %v913_v2 = vadd.f32 1.0, %v2166_v47  ;;  %v837_v46 = vmul.f32 %v2612_v45, %v801_v41  ;;  %v862_v47 = vmul.f32 %v2609_v39, %v838_v53 }
 0x410   : > { %2169 = vrcp.f32 %v916_v49  ;;  %v2018_v40 = vmul.f32 -1.442695, %v2630_v42 }
 0x411   : > { %2171 = vrcp.f32 %v914_v44  ;;  %v861_v48 = vmul.f32 %v2609_v39, %v837_v46  ;;  %v886_v30 = vadd.f32 %v2607_v14, %v862_v47 }
 0x412   : > { %2173 = vrcp.f32 %v913_v2  ;;  %v991_v36 = vpop.permute.xlu1 %990 }
 0x413   : > { %2175 = vpow2.f32 %v2017_v50  ;;  %v885_v13 = vadd.f32 %v2607_v14, %v861_v48  ;;  %v2016_v16 = vmul.f32 -1.442695, %v886_v30  ;;  %v2145_v48 = vld [vmem:[%s3192_s2 + $0x4] ss:$12 sps:$4 sm:$0xff]  }
 0x414   : > { %2177 = vpow2.f32 %v2018_v40  ;;  %1499 = vmatprep.mubr.bf16.mxu1 %v2145_v48 }
 0x415   : > { %v2015_v39 = vmul.f32 -1.442695, %v885_v13  ;;  %2179 = vpow2.f32 %v2016_v16 }
 0x417   : > { %2181 = vpow2.f32 %v2015_v39  ;;  %v2260_v39 = vmov 3  }
 0x418   : > { %2126 = vset.pattern.permute.xlu1 %v2260_v39  ;;  %2125 = vset.pattern.permute.xlu0 %v2260_v39 }
 0x41c   : > { %v2168_v29 = vpop.eup %2167 }
 0x41d   : > { %v2170_v63 = vpop.eup %2169  ;;  %v939_v37 = vmul.f32 %v2168_v29, %v883_v1 }
 0x41e   : > { %v2172_v43 = vpop.eup %2171  ;;  %v940_v0 = vmul.f32 %v2170_v63, %v884_v20 }
 0x41f   : > { %v977_v44 = vmul.f32 %v963_v19, %v939_v37  ;;  %v938_v49 = vmul.f32 %v2172_v43, %v882_v28  ;;  %v2174_v1 = vpop.eup %2173 }
 0x420   : > { %v978_v12 = vmul.f32 %v963_v19, %v940_v0  ;;  %v937_v45 = vmul.f32 %v2174_v1, %v881_v15  ;;  %v2176_v14 = vpop.eup %2175 }
 0x421   : > { %v2637_v2 = vadd.f32 %v991_v36, %v977_v44  ;;  %v976_v28 = vmul.f32 %v958_v52, %v938_v49  ;;  %v919_v22 = vadd.f32 1.0, %v2176_v14 }
 0x422   : > { %v2642_v20 = vadd.f32 %v991_v36, %v978_v12  ;;  %v975_v18 = vmul.f32 %v958_v52, %v937_v45  ;;  %v2178_v52 = vpop.eup %2177 }
 0x423   : > { %3216 = vst [vmem:[#allocation10_spill] sm:$0xff] %v2637_v2  ;;  %1287 = vrot.lane.b32.xlu0 %v2637_v2, %s2251_s10  ;;  %v2655_v19 = vadd.f32 %v986_v11, %v976_v28  ;;  %v920_v29 = vadd.f32 1.0, %v2178_v52  ;;  %2183 = vrcp.f32 %v919_v22  ;;  %v2180_v32 = vpop.eup %2179 }
 0x424   : > { %3217 = vst [vmem:[#allocation11_spill] sm:$0xff] %v2642_v20  ;;  %1153 = vrot.lane.b32.xlu1 %v2642_v20, %s2254_s13  ;;  %v2661_v15 = vadd.f32 %v986_v11, %v975_v18  ;;  %v918_v63 = vadd.f32 1.0, %v2180_v32  ;;  %v2182_v53 = vpop.eup %2181 }
 0x425   : > { %3218 = vst [vmem:[#allocation12_spill] sm:$0xff] %v2655_v19  ;;  %2185 = vrcp.f32 %v920_v29  ;;  %v917_v37 = vadd.f32 1.0, %v2182_v53 }
 0x426   : > { %3219 = vst [vmem:[#allocation13_spill] sm:$0xff] %v2661_v15  ;;  %2187 = vrcp.f32 %v918_v63  ;;  %v3221_v63 = vmov 0  }
 0x427   : > { %1243 = vrot.lane.b32.xlu0 %v2637_v2, %s2249_s8  ;;  %2189 = vrcp.f32 %v917_v37 }
 0x428   : > { %1165 = vrot.lane.b32.xlu1 %v2637_v2, %s2254_s13 }
 0x42b   : > { %1151 = vrot.lane.b32.xlu0 %v2655_v19, %s2254_s13 }
 0x42c   : > { %1109 = vrot.lane.b32.xlu1 %v2642_v20, %s2253_s12 }
 0x42f   : > { %1163 = vrot.lane.b32.xlu0 %v2661_v15, %s2254_s13 }
 0x430   : > { %1121 = vrot.lane.b32.xlu1 %v2637_v2, %s2253_s12  ;;  %v2184_v43 = vpop.eup %2183 }
 0x431   : > { %v943_v36 = vmul.f32 %v2184_v43, %v2625_v33 }
 0x432   : > { %v2186_v0 = vpop.eup %2185 }
 0x433   : > { %1107 = vrot.lane.b32.xlu0 %v2655_v19, %s2253_s12  ;;  %v944_v41 = vmul.f32 %v2186_v0, %v2630_v42  ;;  %v981_v44 = vmul.f32 %v2617_v35, %v943_v36  ;;  %v2188_v50 = vpop.eup %2187 }
 0x434   : > { %1065 = vrot.lane.b32.xlu1 %v2642_v20, %s2257_s15  ;;  %v942_v33 = vmul.f32 %v2188_v50, %v886_v30  ;;  %v2190_v46 = vpop.eup %2189 }
 0x435   : > { %v982_v12 = vmul.f32 %v2617_v35, %v944_v41  ;;  %v2704_v42 = vadd.f32 %v2640_v31, %v981_v44  ;;  %v941_v35 = vmul.f32 %v2190_v46, %v885_v13 }
 0x436   : > { %v980_v49 = vmul.f32 %v2627_v7, %v942_v33 }
 0x437   : > { %1119 = vrot.lane.b32.xlu0 %v2661_v15, %s2253_s12  ;;  %3220 = vst [vmem:[#allocation14_spill] sm:$0xff] %v2704_v42  ;;  %v2707_v47 = vadd.f32 %v2640_v31, %v982_v12  ;;  %v979_v1 = vmul.f32 %v2627_v7, %v941_v35 }
 0x438   : > { %1077 = vrot.lane.b32.xlu1 %v2637_v2, %s2257_s15  ;;  %v2720_v40 = vadd.f32 %v2619_v51, %v980_v49 }
 0x439   : > { %v2727_v31 = vadd.f32 %v2619_v51, %v979_v1 }
 0x43b   : > { %1063 = vrot.lane.b32.xlu0 %v2655_v19, %s2257_s15 }
 0x43c   : > { %1017 = vrot.lane.b32.xlu1 %v2642_v20, %s2256_s14 }
 0x43f   : > { %1075 = vrot.lane.b32.xlu0 %v2661_v15, %s2257_s15 }
 0x440   : > { %1033 = vrot.lane.b32.xlu1 %v2637_v2, %s2256_s14 }
 0x443   : > { %1015 = vrot.lane.b32.xlu0 %v2655_v19, %s2256_s14 }
 0x444   : > { %1289 = vrot.lane.b32.xlu1 %v2642_v20, %s2251_s10 }
 0x447   : > { %1031 = vrot.lane.b32.xlu0 %v2661_v15, %s2256_s14 }
 0x448   : > { %1245 = vrot.lane.b32.xlu1 %v2642_v20, %s2249_s8 }
 0x44b   : > { %1283 = vrot.lane.b32.xlu0 %v2661_v15, %s2251_s10 }
 0x44c   : > { %1285 = vrot.lane.b32.xlu1 %v2655_v19, %s2251_s10 }
 0x44f   : > { %1239 = vrot.lane.b32.xlu0 %v2661_v15, %s2249_s8 }
 0x450   : > { %1241 = vrot.lane.b32.xlu1 %v2655_v19, %s2249_s8 }
 0x453   : > { %1295 = vrot.lane.b32.xlu0 %v2704_v42, %s2251_s10 }
 0x454   : > { %1157 = vrot.lane.b32.xlu1 %v2707_v47, %s2254_s13 }
 0x457   : > { %1251 = vrot.lane.b32.xlu0 %v2704_v42, %s2249_s8 }
 0x458   : > { %1169 = vrot.lane.b32.xlu1 %v2704_v42, %s2254_s13 }
 0x45b   : > { %1155 = vrot.lane.b32.xlu0 %v2720_v40, %s2254_s13 }
 0x45c   : > { %1113 = vrot.lane.b32.xlu1 %v2707_v47, %s2253_s12 }
 0x45f   : > { %1167 = vrot.lane.b32.xlu0 %v2727_v31, %s2254_s13 }
 0x460   : > { %1125 = vrot.lane.b32.xlu1 %v2704_v42, %s2253_s12 }
 0x463   : > { %1111 = vrot.lane.b32.xlu0 %v2720_v40, %s2253_s12 }
 0x464   : > { %1069 = vrot.lane.b32.xlu1 %v2707_v47, %s2257_s15 }
 0x467   : > { %1123 = vrot.lane.b32.xlu0 %v2727_v31, %s2253_s12 }
 0x468   : > { %1081 = vrot.lane.b32.xlu1 %v2704_v42, %s2257_s15 }
 0x46b   : > { %1067 = vrot.lane.b32.xlu0 %v2720_v40, %s2257_s15 }
 0x46c   : > { %1021 = vrot.lane.b32.xlu1 %v2707_v47, %s2256_s14 }
 0x46f   : > { %1079 = vrot.lane.b32.xlu0 %v2727_v31, %s2257_s15 }
 0x470   : > { %1037 = vrot.lane.b32.xlu1 %v2704_v42, %s2256_s14 }
 0x473   : > { %1019 = vrot.lane.b32.xlu0 %v2720_v40, %s2256_s14 }
 0x474   : > { %1297 = vrot.lane.b32.xlu1 %v2707_v47, %s2251_s10 }
 0x477   : > { %1035 = vrot.lane.b32.xlu0 %v2727_v31, %s2256_s14 }
 0x478   : > { %1253 = vrot.lane.b32.xlu1 %v2707_v47, %s2249_s8 }
 0x47b   : > { %1207 = vrot.lane.b32.xlu0 %v2704_v42, %s2252_s11 }
 0x47c   : > { %1209 = vrot.lane.b32.xlu1 %v2707_v47, %s2252_s11 }
 0x47f   : > { %1291 = vrot.lane.b32.xlu0 %v2727_v31, %s2251_s10 }
 0x480   : > { %1293 = vrot.lane.b32.xlu1 %v2720_v40, %s2251_s10 }
 0x483   : > { %1195 = vrot.lane.b32.xlu0 %v2661_v15, %s2252_s11 }
 0x484   : > { %1197 = vrot.lane.b32.xlu1 %v2655_v19, %s2252_s11 }
 0x487   : > { %1247 = vrot.lane.b32.xlu0 %v2727_v31, %s2249_s8 }
 0x488   : > { %1249 = vrot.lane.b32.xlu1 %v2720_v40, %s2249_s8 }
 0x48b   : > { %1199 = vrot.lane.b32.xlu0 %v2637_v2, %s2252_s11 }
 0x48c   : > { %1201 = vrot.lane.b32.xlu1 %v2642_v20, %s2252_s11 }
 0x48f   : > { %1203 = vrot.lane.b32.xlu0 %v2727_v31, %s2252_s11 }
 0x490   : > { %1205 = vrot.lane.b32.xlu1 %v2720_v40, %s2252_s11 }
 0x493   : > { %1339 = vrot.lane.b32.xlu0 %v2704_v42, %s2250_s9 }
 0x494   : > { %1341 = vrot.lane.b32.xlu1 %v2707_v47, %s2250_s9 }
 0x495   : > { %v2785_v51 = vpop.permute.xlu0 %1287 }
 0x496   : > { %v2787_v7 = vpop.permute.xlu1 %1153 }
 0x497   : > { %1327 = vrot.lane.b32.xlu0 %v2661_v15, %s2250_s9 }
 0x498   : > { %1329 = vrot.lane.b32.xlu1 %v2655_v19, %s2250_s9 }
 0x499   : > { %v1244_v30 = vpop.permute.xlu0 %1243 }
 0x49a   : > { %v1166_v45 = vpop.permute.xlu1 %1165 }
 0x49b   : > { %1335 = vrot.lane.b32.xlu0 %v2727_v31, %s2250_s9  ;;  %v1172_v62 = vsel %vm361_vm6, %v1166_v45, %v2787_v7 }
 0x49c   : > { %1337 = vrot.lane.b32.xlu1 %v2720_v40, %s2250_s9 }
 0x49d   : > { %v1152_v28 = vpop.permute.xlu0 %1151 }
 0x49e   : > { %v2800_v11 = vpop.permute.xlu1 %1109 }
 0x49f   : > { %1331 = vrot.lane.b32.xlu0 %v2637_v2, %s2250_s9 }
 0x4a0   : > { %1333 = vrot.lane.b32.xlu1 %v2642_v20, %s2250_s9 }
 0x4a1   : > { %v1164_v13 = vpop.permute.xlu0 %1163 }
 0x4a2   : > { %v2806_v16 = vpop.permute.xlu1 %1121  ;;  %v1171_v39 = vsel %vm361_vm6, %v1164_v13, %v1152_v28  ;;  %v1183_v9 = vsel %vm361_vm6, %v1152_v28, %v1164_v13  ;;  %v1190_v28 = vmul.f32 %v1172_v62, %v2452_v60 }
 0x4a3   : > { %1428 = vperm.xlu0 %2125, %v2364_v3   ;;  %v1188_v55 = vmul.f32 %v1171_v39, %v2452_v60  ;;  %v1187_v13 = vmul.f32 %v1183_v9, %v2449_v59 }
 0x4a4   : > { %1424 = vperm.xlu1 %2126, %v2369_v4  }
 0x4a5   : > { %v2808_v18 = vpop.permute.xlu0 %1107 }
 0x4a6   : > { %v2810_v14 = vpop.permute.xlu1 %1065 }
 0x4a7   : > { %1416 = vperm.xlu0 %2125, %v2376_v5  }
 0x4a8   : > { %1420 = vperm.xlu1 %2126, %v2381_v6  }
 0x4a9   : > { %v1120_v52 = vpop.permute.xlu0 %1119 }
 0x4aa   : > { %v2814_v22 = vpop.permute.xlu1 %1077 }
 0x4ab   : > { %2128 = vset.pattern.permute.xlu0 %v3221_v63 }
 0x4ac   : > { %2127 = vset.pattern.permute.xlu1 %v3221_v63 }
 0x4ad   : > { %v2818_v29 = vpop.permute.xlu0 %1063 }
 0x4ae   : > { %v2820_v32 = vpop.permute.xlu1 %1017 }
 0x4b1   : > { %v2824_v53 = vpop.permute.xlu0 %1075 }
 0x4b2   : > { %v2826_v4 = vpop.permute.xlu1 %1033 }
 0x4b5   : > { %v2828_v3 = vpop.permute.xlu0 %1015 }
 0x4b6   : > { %v2830_v37 = vpop.permute.xlu1 %1289 }
 0x4b7   : > { %v2835_v5 = vsel %vm420_vm2, %v2785_v51, %v2830_v37 }
 0x4b9   : > { %v2837_v6 = vpop.permute.xlu0 %1031 }
 0x4ba   : > { %v1246_v43 = vpop.permute.xlu1 %1245 }
 0x4bb   : > { %v2840_v0 = vsel %vm400_vm1, %v1244_v30, %v1246_v43  ;;  %v2843_v36 = vsel %vm400_vm1, %v1246_v43, %v1244_v30 }
 0x4bd   : > { %v2845_v41 = vpop.permute.xlu0 %1283 }
 0x4be   : > { %v2847_v44 = vpop.permute.xlu1 %1285 }
 0x4c1   : > { %v2849_v50 = vpop.permute.xlu0 %1239 }
 0x4c2   : > { %v2851_v12 = vpop.permute.xlu1 %1241 }
 0x4c5   : > { %v2853_v33 = vpop.permute.xlu0 %1295 }
 0x4c6   : > { %v1158_v46 = vpop.permute.xlu1 %1157 }
 0x4c9   : > { %v2855_v35 = vpop.permute.xlu0 %1251 }
 0x4ca   : > { %v1170_v49 = vpop.permute.xlu1 %1169 }
 0x4cb   : > { %v1174_v30 = vsel %vm361_vm6, %v1170_v49, %v1158_v46  ;;  %v1186_v43 = vsel %vm361_vm6, %v1158_v46, %v1170_v49  ;;  %v1184_v49 = vsel %vm361_vm6, %v2787_v7, %v1166_v45 }
 0x4cc   : > { %v1193_v63 = vmul.f32 %v1186_v43, %v2449_v59  ;;  %v1194_v46 = vmul.f32 %v1174_v30, %v2452_v60 }
 0x4cd   : > { %v1156_v1 = vpop.permute.xlu0 %1155 }
 0x4ce   : > { %v1114_v48 = vpop.permute.xlu1 %1113 }
 0x4d1   : > { %v1168_v10 = vpop.permute.xlu0 %1167 }
 0x4d2   : > { %v1126_v54 = vpop.permute.xlu1 %1125  ;;  %v1173_v61 = vsel %vm361_vm6, %v1168_v10, %v1156_v1  ;;  %v1185_v56 = vsel %vm361_vm6, %v1156_v1, %v1168_v10  ;;  %v1189_v10 = vmul.f32 %v1184_v49, %v2449_v59 }
 0x4d3   : > { %v1191_v2 = vmul.f32 %v1185_v56, %v2449_v59  ;;  %v1192_v15 = vmul.f32 %v1173_v61, %v2452_v60  ;;  %v1127_v56 = vsel %vm341_vm5, %v1120_v52, %v2808_v18  ;;  %v1384_v61 = vpack.c.bf16 %v1190_v28, %v1188_v55 }
 0x4d4   : > { %v1130_v1 = vsel %vm341_vm5, %v1126_v54, %v1114_v48  ;;  %v1142_v30 = vsel %vm341_vm5, %v1114_v48, %v1126_v54  ;;  %v1128_v60 = vsel %vm341_vm5, %v2806_v16, %v2800_v11  ;;  %v1383_v9 = vpack.c.bf16 %v1189_v10, %v1187_v13 }
 0x4d5   : > { %v1112_v39 = vpop.permute.xlu0 %1111  ;;  %v1386_v20 = vpack.c.bf16 %v1194_v46, %v1192_v15  ;;  %v1385_v19 = vpack.c.bf16 %v1193_v63, %v1191_v2  ;;  %v1139_v59 = vsel %vm341_vm5, %v2808_v18, %v1120_v52  ;;  %v1144_v2 = vmul.f32 %v1127_v56, %v2446_v58 }
 0x4d6   : > { %v1070_v42 = vpop.permute.xlu1 %1069  ;;  %v1149_v54 = vmul.f32 %v1142_v30, %v2443_v57  ;;  %v1140_v63 = vsel %vm341_vm5, %v2800_v11, %v2806_v16  ;;  %v1146_v18 = vmul.f32 %v1128_v60, %v2446_v58  ;;  %v1143_v52 = vmul.f32 %v1139_v59, %v2443_v57 }
 0x4d7   : > { %1467 = vmatprep.subr.bf16.mxu1 %v1386_v20  ;;  %v1145_v28 = vmul.f32 %v1140_v63, %v2443_v57  ;;  %v1083_v13 = vsel %vm321_vm8, %v2824_v53, %v2818_v29 }
 0x4d8   : > { %1468 = vmatpush1.bf16.msra.mxu1 %v1385_v19  ;;  %v1150_v19 = vmul.f32 %v1130_v1, %v2446_v58 }
 0x4d9   : > { %1469 = vmatprep.subr.bf16.mxu1 %v1384_v61  ;;  %v1124_v62 = vpop.permute.xlu0 %1123  ;;  %v1379_v56 = vpack.c.bf16 %v1145_v28, %v1143_v52  ;;  %v1100_v61 = vmul.f32 %v1083_v13, %v2474_v27 }
 0x4da   : > { %v1082_v15 = vpop.permute.xlu1 %1081  ;;  %v1129_v55 = vsel %vm341_vm5, %v1124_v62, %v1112_v39  ;;  %v1141_v20 = vsel %vm341_vm5, %v1112_v39, %v1124_v62  ;;  %v1380_v39 = vpack.c.bf16 %v1146_v18, %v1144_v2  ;;  %v1096_v2 = vsel %vm321_vm8, %v2810_v14, %v2814_v22 }
 0x4db   : > { %v1147_v7 = vmul.f32 %v1141_v20, %v2443_v57  ;;  %v1148_v45 = vmul.f32 %v1129_v55, %v2446_v58  ;;  %v1086_v10 = vsel %vm321_vm8, %v1082_v15, %v1070_v42  ;;  %v1098_v11 = vsel %vm321_vm8, %v1070_v42, %v1082_v15 }
 0x4dc   : > { %1470 = vmatpush1.bf16.msra.mxu1 %v1383_v9  ;;  %v1084_v58 = vsel %vm321_vm8, %v2814_v22, %v2810_v14  ;;  %v1095_v57 = vsel %vm321_vm8, %v2818_v29, %v2824_v53  ;;  %v1105_v42 = vmul.f32 %v1098_v11, %v2471_v8  ;;  %v1106_v62 = vmul.f32 %v1086_v10, %v2474_v27 }
 0x4dd   : > { %v1068_v48 = vpop.permute.xlu0 %1067  ;;  %v1382_v43 = vpack.c.bf16 %v1150_v19, %v1148_v45  ;;  %v1381_v46 = vpack.c.bf16 %v1149_v54, %v1147_v7  ;;  %v1102_v29 = vmul.f32 %v1084_v58, %v2474_v27  ;;  %v1099_v53 = vmul.f32 %v1095_v57, %v2471_v8 }
 0x4de   : > { %v1022_v49 = vpop.permute.xlu1 %1021  ;;  %v1101_v19 = vmul.f32 %v1096_v2, %v2471_v8  ;;  %v1039_v7 = vsel %vm301_vm7, %v2837_v6, %v2828_v3 }
 0x4df   : > { %1471 = vmatprep.subr.bf16.mxu1 %v1382_v43  ;;  %v1376_v45 = vpack.c.bf16 %v1102_v29, %v1100_v61  ;;  %v1056_v52 = vmul.f32 %v1039_v7, %v2468_v25 }
 0x4e0   : > { %1472 = vmatpush1.bf16.msra.mxu1 %v1381_v46  ;;  %v1375_v18 = vpack.c.bf16 %v1101_v19, %v1099_v53 }
 0x4e1   : > { %1473 = vmatprep.subr.bf16.mxu1 %v1380_v39  ;;  %v1080_v16 = vpop.permute.xlu0 %1079 }
 0x4e2   : > { %v1038_v1 = vpop.permute.xlu1 %1037  ;;  %v1085_v30 = vsel %vm321_vm8, %v1080_v16, %v1068_v48  ;;  %v1097_v60 = vsel %vm321_vm8, %v1068_v48, %v1080_v16 }
 0x4e3   : > { %v1103_v9 = vmul.f32 %v1097_v60, %v2471_v8  ;;  %v1104_v59 = vmul.f32 %v1085_v30, %v2474_v27  ;;  %v1042_v63 = vsel %vm301_vm7, %v1038_v1, %v1022_v49  ;;  %v1054_v14 = vsel %vm301_vm7, %v1022_v49, %v1038_v1 }
 0x4e4   : > { %1474 = vmatpush1.bf16.msra.mxu1 %v1379_v56  ;;  %v1040_v27 = vsel %vm301_vm7, %v2826_v4, %v2820_v32  ;;  %v1051_v8 = vsel %vm301_vm7, %v2828_v3, %v2837_v6  ;;  %v1061_v49 = vmul.f32 %v1054_v14, %v2465_v24  ;;  %v1062_v28 = vmul.f32 %v1042_v63, %v2468_v25 }
 0x4e5   : > { %v1020_v15 = vpop.permute.xlu0 %1019  ;;  %v1378_v55 = vpack.c.bf16 %v1106_v62, %v1104_v59  ;;  %v1377_v20 = vpack.c.bf16 %v1105_v42, %v1103_v9  ;;  %v1052_v3 = vsel %vm301_vm7, %v2820_v32, %v2826_v4  ;;  %v1058_v6 = vmul.f32 %v1040_v27, %v2468_v25 }
 0x4e6   : > { %v1298_v54 = vpop.permute.xlu1 %1297  ;;  %v1055_v16 = vmul.f32 %v1051_v8, %v2465_v24  ;;  %v1057_v61 = vmul.f32 %v1052_v3, %v2465_v24  ;;  %v1315_v1 = vsel %vm420_vm2, %v2847_v44, %v2845_v41  ;;  %v1316_v30 = vsel %vm420_vm2, %v2830_v37, %v2785_v51 }
 0x4e7   : > { %1475 = vmatprep.subr.bf16.mxu1 %v1378_v55  ;;  %v1372_v57 = vpack.c.bf16 %v1058_v6, %v1056_v52  ;;  %v1302_v32 = vsel %vm420_vm2, %v2853_v33, %v1298_v54  ;;  %v1320_v62 = vmul.f32 %v1315_v1, %v2419_v26  ;;  %v1322_v53 = vmul.f32 %v1316_v30, %v2419_v26 }
 0x4e8   : > { %1476 = vmatpush1.bf16.msra.mxu1 %v1377_v20  ;;  %v1371_v42 = vpack.c.bf16 %v1057_v61, %v1055_v16  ;;  %v1321_v20 = vmul.f32 %v2835_v5, %v2414_v23 }
 0x4e9   : > { %1477 = vmatprep.subr.bf16.mxu1 %v1376_v45  ;;  %v1036_v22 = vpop.permute.xlu0 %1035  ;;  %v1400_v19 = vpack.c.bf16 %v1322_v53, %v1320_v62 }
 0x4ea   : > { %v1254_v48 = vpop.permute.xlu1 %1253  ;;  %v1041_v43 = vsel %vm301_vm7, %v1036_v22, %v1020_v15  ;;  %v1053_v46 = vsel %vm301_vm7, %v1020_v15, %v1036_v22 }
 0x4eb   : > { %v1059_v13 = vmul.f32 %v1053_v46, %v2465_v24  ;;  %v1060_v39 = vmul.f32 %v1041_v43, %v2468_v25  ;;  %v1318_v25 = vsel %vm420_vm2, %v1298_v54, %v2853_v33  ;;  %v1299_v24 = vsel %vm420_vm2, %v2845_v41, %v2847_v44 }
 0x4ec   : > { %1478 = vmatpush1.bf16.msra.mxu1 %v1375_v18  ;;  %v1325_v33 = vmul.f32 %v1302_v32, %v2414_v23  ;;  %v1326_v2 = vmul.f32 %v1318_v25, %v2419_v26  ;;  %v1319_v41 = vmul.f32 %v1299_v24, %v2414_v23  ;;  %v1271_v54 = vsel %vm400_vm1, %v2851_v12, %v2849_v50 }
 0x4ed   : > { %v1208_v10 = vpop.permute.xlu0 %1207  ;;  %v1374_v11 = vpack.c.bf16 %v1062_v28, %v1060_v39  ;;  %v1373_v58 = vpack.c.bf16 %v1061_v49, %v1059_v13  ;;  %v1258_v7 = vsel %vm400_vm1, %v2855_v35, %v1254_v48  ;;  %v1276_v5 = vmul.f32 %v1271_v54, %v2410_v21 }
 0x4ee   : > { %v1210_v56 = vpop.permute.xlu1 %1209  ;;  %v1399_v14 = vpack.c.bf16 %v1321_v20, %v1319_v41  ;;  %v1281_v18 = vmul.f32 %v1258_v7, %v2406_v17  ;;  %v1278_v43 = vmul.f32 %v2843_v36, %v2410_v21  ;;  %v1277_v13 = vmul.f32 %v2840_v0, %v2406_v17  ;;  %v3224_v20 = vld [vmem:[#allocation11_spill] sm:$0xff] }
 0x4ef   : > { %1479 = vmatprep.subr.bf16.mxu1 %v1374_v11  ;;  %v1214_v28 = vsel %vm380_vm4, %v1208_v10, %v1210_v56  ;;  %v1230_v39 = vsel %vm380_vm4, %v1210_v56, %v1208_v10 }
 0x4f0   : > { %1480 = vmatpush1.bf16.msra.mxu1 %v1373_v58  ;;  %v1396_v3 = vpack.c.bf16 %v1278_v43, %v1276_v5  ;;  %v1238_v16 = vmul.f32 %v1230_v39, %v2429_v38  ;;  %v2146_v39 = vld [vmem:[%s3192_s2 + $0x8] ss:$12 sps:$4 sm:$0xff]  }
 0x4f1   : > { %1481 = vmatprep.subr.bf16.mxu1 %v1372_v57  ;;  %v1292_v4 = vpop.permute.xlu0 %1291 }
 0x4f2   : > { %v1294_v60 = vpop.permute.xlu1 %1293 }
 0x4f3   : > { %v1301_v9 = vsel %vm420_vm2, %v1292_v4, %v1294_v60  ;;  %v1317_v59 = vsel %vm420_vm2, %v1294_v60, %v1292_v4 }
 0x4f4   : > { %v1323_v29 = vmul.f32 %v1301_v9, %v2414_v23  ;;  %v1324_v51 = vmul.f32 %v1317_v59, %v2419_v26  ;;  %1482 = vmatpush1.bf16.msra.mxu1 %v1371_v42  ;;  %v1274_v26 = vsel %vm400_vm1, %v1254_v48, %v2855_v35  ;;  %v1255_v23 = vsel %vm400_vm1, %v2849_v50, %v2851_v12 }
 0x4f5   : > { %v1196_v37 = vpop.permute.xlu0 %1195  ;;  %v1282_v8 = vmul.f32 %v1274_v26, %v2410_v21  ;;  %v1275_v50 = vmul.f32 %v1255_v23, %v2406_v17 }
 0x4f6   : > { %v1198_v44 = vpop.permute.xlu1 %1197  ;;  %v1402_v15 = vpack.c.bf16 %v1326_v2, %v1324_v51  ;;  %v1401_v55 = vpack.c.bf16 %v1325_v33, %v1323_v29  ;;  %v1390_v29 = vpack.c.bf16 %v2707_v47, %v2720_v40  ;;  %v2231_v47 = vld [vmem:[%s3196_s6 + $0x10] ss:$0 sm:$0xff] }
 0x4f7   : > { %v1395_v58 = vpack.c.bf16 %v1277_v13, %v1275_v50  ;;  %v1227_v57 = vsel %vm380_vm4, %v1198_v44, %v1196_v37  ;;  %v1211_v25 = vsel %vm380_vm4, %v1196_v37, %v1198_v44  ;;  %v3222_v44 = vld [vmem:[#allocation14_spill] sm:$0xff] }
 0x4f8   : > { %1483 = vmatprep.subr.bf16.mxu1 %v1402_v15  ;;  %v1232_v4 = vmul.f32 %v1227_v57, %v2429_v38  ;;  %v1231_v9 = vmul.f32 %v1211_v25, %v2423_v34  ;;  %v1389_v15 = vpack.c.bf16 %v3222_v44, %v2727_v31 }
 0x4f9   : > { %1484 = vmatpush2.bf16.msra.mxu1 %v1401_v55  ;;  %v1248_v45 = vpop.permute.xlu0 %1247  ;;  %v3223_v55 = vld [vmem:[#allocation12_spill] sm:$0xff] }
 0x4fa   : > { %v1250_v63 = vpop.permute.xlu1 %1249  ;;  %1485 = vmatprep.subr.bf16.mxu1 %v1400_v19  ;;  %v1388_v54 = vpack.c.bf16 %v3224_v20, %v3223_v55  ;;  %v2232_v19 = vld [vmem:[%s3196_s6 + $0x18] ss:$0 sm:$0xff] }
 0x4fb   : > { %v1257_v27 = vsel %vm400_vm1, %v1248_v45, %v1250_v63  ;;  %v1273_v22 = vsel %vm400_vm1, %v1250_v63, %v1248_v45 }
 0x4fc   : > { %v1279_v35 = vmul.f32 %v1257_v27, %v2406_v17  ;;  %v1280_v52 = vmul.f32 %v1273_v22, %v2410_v21  ;;  %v1237_v21 = vmul.f32 %v1214_v28, %v2423_v34 }
 0x4fd   : > { %1486 = vmatpush2.bf16.msra.mxu1 %v1399_v14  ;;  %v1200_v48 = vpop.permute.xlu0 %1199 }
 0x4fe   : > { %v1202_v12 = vpop.permute.xlu1 %1201  ;;  %v1398_v46 = vpack.c.bf16 %v1282_v8, %v1280_v52  ;;  %v1397_v49 = vpack.c.bf16 %v1281_v18, %v1279_v35  ;;  %v3225_v8 = vld [vmem:[#allocation13_spill] sm:$0xff]  ;;  %v3226_v35 = vld [vmem:[#allocation10_spill] sm:$0xff] }
 0x4ff   : > { %v1228_v6 = vsel %vm380_vm4, %v1202_v12, %v1200_v48  ;;  %v1212_v0 = vsel %vm380_vm4, %v1200_v48, %v1202_v12  ;;  %v1387_v52 = vpack.c.bf16 %v3226_v35, %v3225_v8 }
 0x500   : > { %1487 = vmatprep.subr.bf16.mxu1 %v1398_v46  ;;  %v1234_v10 = vmul.f32 %v1228_v6, %v2429_v38  ;;  %v1233_v24 = vmul.f32 %v1212_v0, %v2423_v34  ;;  %v2143_v46 = vld [vmem:[%s3192_s2] ss:$12 sps:$4 sm:$0xff]   ;;  %v3227_v6 = vmov 0  }
 0x501   : > { %1488 = vmatpush2.bf16.msra.mxu1 %v1397_v49  ;;  %v1204_v11 = vpop.permute.xlu0 %1203  ;;  %v2147_v49 = vld [vmem:[%s3192_s2 + $0x1c] ss:$12 sps:$4 sm:$0xff]  }
 0x502   : > { %v1206_v36 = vpop.permute.xlu1 %1205  ;;  %1489 = vmatprep.subr.bf16.mxu1 %v1396_v3  ;;  %v1392_v62 = vpack.c.bf16 %v1234_v10, %v1232_v4  ;;  %v1391_v2 = vpack.c.bf16 %v1233_v24, %v1231_v9  ;;  %v2149_v3 = vld [vmem:[%s3192_s2 + $0x18] ss:$12 sps:$4 sm:$0xff]  }
 0x503   : > { %v1213_v61 = vsel %vm380_vm4, %v1204_v11, %v1206_v36  ;;  %v1229_v17 = vsel %vm380_vm4, %v1206_v36, %v1204_v11  ;;  %v2150_v11 = vld [vmem:[%s3192_s2 + $0x20] ss:$12 sps:$4 sm:$0xff]  }
 0x504   : > { %v1235_v56 = vmul.f32 %v1213_v61, %v2423_v34  ;;  %v1236_v1 = vmul.f32 %v1229_v17, %v2429_v38 }
 0x505   : > { %1490 = vmatpush2.bf16.msra.mxu1 %v1395_v58  ;;  %v1340_v32 = vpop.permute.xlu0 %1339 }
 0x506   : > { %v1342_v30 = vpop.permute.xlu1 %1341  ;;  %v1394_v60 = vpack.c.bf16 %v1238_v16, %v1236_v1  ;;  %v1393_v42 = vpack.c.bf16 %v1237_v21, %v1235_v56  ;;  %v2233_v21 = vld [vmem:[%s3195_s5] sm:$0xff] }
 0x507   : > { %v1346_v51 = vsel %vm440_vm0, %v1340_v32, %v1342_v30  ;;  %v1362_v38 = vsel %vm440_vm0, %v1342_v30, %v1340_v32 }
 0x508   : > { %1491 = vmatprep.subr.bf16.mxu1 %v1394_v60  ;;  %v1369_v40 = vmul.f32 %v2231_v47, %v1346_v51  ;;  %v1370_v7 = vmul.f32 %v2232_v19, %v1362_v38 }
 0x509   : > { %1492 = vmatpush2.bf16.msra.mxu1 %v1393_v42  ;;  %v1328_v59 = vpop.permute.xlu0 %1327 }
 0x50a   : > { %v1330_v33 = vpop.permute.xlu1 %1329  ;;  %1493 = vmatprep.subr.bf16.mxu1 %v1392_v62 }
 0x50b   : > { %v1343_v63 = vsel %vm440_vm0, %v1328_v59, %v1330_v33  ;;  %v1359_v14 = vsel %vm440_vm0, %v1330_v33, %v1328_v59 }
 0x50c   : > { %v1363_v48 = vmul.f32 %v2231_v47, %v1343_v63  ;;  %v1364_v43 = vmul.f32 %v2232_v19, %v1359_v14 }
 0x50d   : > { %1494 = vmatpush2.bf16.msra.mxu1 %v1391_v2  ;;  %v1336_v37 = vpop.permute.xlu0 %1335 }
 0x50e   : > { %v1338_v53 = vpop.permute.xlu1 %1337  ;;  %1495 = vmatprep.subr.bf16.mxu1 %v1390_v29 }
 0x50f   : > { %v1345_v41 = vsel %vm440_vm0, %v1336_v37, %v1338_v53  ;;  %v1361_v34 = vsel %vm440_vm0, %v1338_v53, %v1336_v37 }
 0x510   : > { %v1367_v26 = vmul.f32 %v2231_v47, %v1345_v41  ;;  %v1368_v45 = vmul.f32 %v2232_v19, %v1361_v34 }
 0x511   : > { %1496 = vmatpush2.bf16.msra.mxu1 %v1389_v15  ;;  %v1332_v31 = vpop.permute.xlu0 %1331 }
 0x512   : > { %v1405_v23 = vpack.c.bf16 %v1369_v40, %v1367_v26  ;;  %v1334_v5 = vpop.permute.xlu1 %1333  ;;  %1497 = vmatprep.subr.bf16.mxu1 %v1388_v54  ;;  %v1406_v27 = vpack.c.bf16 %v1370_v7, %v1368_v45 }
 0x513   : > { %v1344_v22 = vsel %vm440_vm0, %v1332_v31, %v1334_v5  ;;  %v1360_v18 = vsel %vm440_vm0, %v1334_v5, %v1332_v31 }
 0x514   : > { %v1365_v50 = vmul.f32 %v2231_v47, %v1344_v22  ;;  %v1366_v12 = vmul.f32 %v2232_v19, %v1360_v18  ;;  %1532 = vmatprep.subr.bf16.mxu0 %v1406_v27 }
 0x515   : > { %1498 = vmatpush2.bf16.msra.mxu1 %v1387_v52  ;;  %1533 = vmatpush1.bf16.msra.mxu0 %v1405_v23 }
 0x516   : > { %v1403_v28 = vpack.c.bf16 %v1365_v50, %v1363_v48  ;;  %v1404_v13 = vpack.c.bf16 %v1366_v12, %v1364_v43 }
 0x518   : > { %1534 = vmatprep.subr.bf16.mxu0 %v1404_v13  ;;  %1500 = vmatmul.mubr.bf16.vlgmr.msra.gmra.mxu1 %v2143_v46 }
 0x519   : > { %1535 = vmatpush1.bf16.msra.mxu0 %v1403_v28  ;;  %1509 = vmatprep.mubr.bf16.mxu1 %v2147_v49 }
 0x51c   : > { %2026 = vmatmul.mubr.msk.bf16.vlgmr.msra.gmra.mxu0 %vm651_vm10, %v2146_v39 }
 0x51d   : > { %1562 = vmatprep.mubr.bf16.mxu0 %v3227_v6 }
 0x51e   : > { %v1429_v4 = vpop.permute.xlu0 %1428 }
 0x51f   : > { %v1425_v0 = vpop.permute.xlu1 %1424 }
 0x520   : > { %1510 = vmatmul.mubr.bf16.gmra.mxu1 %v2149_v3 }
 0x522   : > { %v1417_v34 = vpop.permute.xlu0 %1416 }
 0x523   : > { %v1421_v2 = vpop.permute.xlu1 %1420 }
 0x524   : > { %2027 = vmatmul.mubr.msk.bf16.gmra.mxu0 %vm651_vm10, %v2150_v11 }
 0x525   : > { %2082 = vmatprep.mubr.msk.f32.mxu0 %vm651_vm10, %v2233_v21 }
 0x5d8   : > { %v1501_v36 = vpop.f32.mrf.mxu1 }
 0x5d9   : > { %v1502_v40 = vadd.f32 %v1501_v36, %v1417_v34  ;;  %v2234_v36 = vld [vmem:[%s3195_s5 + $0x8] sm:$0xff] }
 0x5da   : > { %v1503_v58 = vpop.f32.mrf.mxu1 }
 0x5db   : > { %v1504_v45 = vadd.f32 %v1503_v58, %v1417_v34  ;;  %v2235_v58 = vld [vmem:[%s3195_s5 + $0x10] sm:$0xff] }
 0x5dc   : > { %v1554_v16 = vpop.f32.mrf.mxu0  ;;  %v1505_v57 = vpop.f32.mrf.mxu1 }
 0x5dd   : > { %v1506_v55 = vadd.f32 %v1505_v57, %v1421_v2  ;;  %v3079_v5 = vadd.f32 %v1554_v16, %v1502_v40  ;;  %v2236_v16 = vld [vmem:[%s3195_s5 + $0x18] sm:$0xff] }
 0x5de   : > { %v1556_v61 = vpop.f32.mrf.mxu0  ;;  %v1507_v17 = vpop.f32.mrf.mxu1 }
 0x5df   : > { %v1508_v38 = vadd.f32 %v1507_v17, %v1421_v2  ;;  %v3073_v63 = vadd.f32 %v1556_v61, %v1504_v45  ;;  %v1585_v35 = vmul.f32 %v3079_v5, %v3079_v5 }
 0x5e0   : > { %v1558_v10 = vpop.f32.mrf.mxu0  ;;  %v1511_v56 = vpop.f32.mrf.mxu1 }
 0x5e1   : > { %v1512_v1 = vadd.f32 %v1511_v56, %v1425_v0  ;;  %v3069_v7 = vadd.f32 %v1558_v10, %v1506_v55  ;;  %v1586_v8 = vmul.f32 %v3073_v63, %v3073_v63  ;;  %v1573_v48 = vadd.f32 %v3073_v63, %v3079_v5 }
 0x5e2   : > { %v1560_v32 = vpop.f32.mrf.mxu0  ;;  %v1513_v25 = vpop.f32.mrf.mxu1 }
 0x5e3   : > { %v1514_v42 = vadd.f32 %v1513_v25, %v1425_v0  ;;  %v3063_v20 = vadd.f32 %v1560_v32, %v1508_v38  ;;  %v1587_v27 = vmul.f32 %v3069_v7, %v3069_v7  ;;  %v1593_v52 = vadd.f32 %v1586_v8, %v1585_v35 }
 0x5e4   : > { %v1564_v30 = vpop.f32.mrf.mxu0  ;;  %v1515_v60 = vpop.f32.mrf.mxu1  ;;  %v2261_v25 = vmov 4  }
 0x5e5   : > { %v3051_v24 = vadd.f32 %v1564_v30, %v1512_v1  ;;  %v1516_v33 = vadd.f32 %v1515_v60, %v1429_v4  ;;  %v1588_v23 = vmul.f32 %v3063_v20, %v3063_v20  ;;  %v1576_v22 = vadd.f32 %v3063_v20, %v3069_v7  ;;  %v2238_v60 = vld [vmem:[%s3193_s3] sm:$0xff] }
 0x5e6   : > { %v1566_v62 = vpop.f32.mrf.mxu0  ;;  %v1517_v9 = vpop.f32.mrf.mxu1  ;;  %v2262_v30 = vmov 5  }
 0x5e7   : > { %v3053_v59 = vadd.f32 %v1566_v62, %v1514_v42  ;;  %v1589_v29 = vmul.f32 %v3051_v24, %v3051_v24  ;;  %v1518_v53 = vadd.f32 %v1517_v9, %v1429_v4  ;;  %v1596_v18 = vadd.f32 %v1588_v23, %v1587_v27  ;;  %v2237_v4 = vld [vmem:[%s3193_s3 + $0x8] sm:$0xff]  ;;  %v2239_v62 = vld [vmem:[%s3193_s3 + $0x10] sm:$0xff]  ;;  %v2240_v9 = vld [vmem:[%s3193_s3 + $0x18] sm:$0xff] }
 0x5e8   : > { %v1568_v51 = vpop.f32.mrf.mxu0  ;;  %v3228_v42 = vmov 1  }
 0x5e9   : > { %v1590_v37 = vmul.f32 %v3053_v59, %v3053_v59  ;;  %v3059_v41 = vadd.f32 %v1568_v51, %v1516_v33  ;;  %v1579_v44 = vadd.f32 %v3053_v59, %v3051_v24 }
 0x5ea   : > { %v1570_v15 = vpop.f32.mrf.mxu0 }
 0x5eb   : > { %v3065_v54 = vadd.f32 %v1570_v15, %v1518_v53  ;;  %v1599_v47 = vadd.f32 %v1590_v37, %v1589_v29  ;;  %1580 = vadd.xlane.f32.xlu0 %v1579_v44  ;;  %v1591_v19 = vmul.f32 %v3059_v41, %v3059_v41 }
 0x5ed   : > { %v1592_v26 = vmul.f32 %v3065_v54, %v3065_v54  ;;  %1600 = vadd.xlane.f32.xlu1 %v1599_v47  ;;  %v1582_v31 = vadd.f32 %v3065_v54, %v3059_v41 }
 0x5ef   : > { %v1602_v14 = vadd.f32 %v1592_v26, %v1591_v19 }
 0x5f1   : > { %1603 = vadd.xlane.f32.xlu0 %v1602_v14  ;;  %1583 = vadd.xlane.f32.xlu1 %v1582_v31 }
 0x5f5   : > { %1577 = vadd.xlane.f32.xlu0 %v1576_v22  ;;  %1597 = vadd.xlane.f32.xlu1 %v1596_v18  ;;  %v2263_v22 = vmov 6  }
 0x5f9   : > { %1594 = vadd.xlane.f32.xlu1 %v1593_v52  ;;  %1574 = vadd.xlane.f32.xlu0 %v1573_v48 }
 0x674   : > { %v1581_v50 = vpop.xlane.xlu0 %1580 }
 0x676   : > { %v1601_v43 = vpop.xlane.xlu1 %1600 }
 0x677   : > { %v1607_v28 = vsel %vm361_vm6, %v1581_v50, %v1601_v43 }
 0x67a   : > { %v1584_v12 = vpop.xlane.xlu1 %1583  ;;  %v1604_v46 = vpop.xlane.xlu0 %1603 }
 0x67b   : > { %v1608_v49 = vsel %vm361_vm6, %v1584_v12, %v1604_v46 }
 0x67c   : > { %2074 = vmatprep.subr.mxu0 %v1608_v49 }
 0x67d   : > { %2075 = vmatpush3.msra.mxu0 %v1608_v49 }
 0x67e   : > { %v1598_v13 = vpop.xlane.xlu1 %1597  ;;  %2076 = vmatprep.subr.mxu0 %v1607_v28  ;;  %v1578_v39 = vpop.xlane.xlu0 %1577 }
 0x67f   : > { %2077 = vmatpush3.msra.mxu0 %v1607_v28  ;;  %v1606_v3 = vsel %vm361_vm6, %v1578_v39, %v1598_v13 }
 0x680   : > { %2078 = vmatprep.subr.mxu0 %v1606_v3 }
 0x681   : > { %2079 = vmatpush3.msra.mxu0 %v1606_v3 }
 0x682   : > { %v1595_v6 = vpop.xlane.xlu1 %1594  ;;  %v1575_v11 = vpop.xlane.xlu0 %1574 }
 0x683   : > { %v1605_v21 = vsel %vm361_vm6, %v1575_v11, %v1595_v6 }
 0x684   : > { %2080 = vmatprep.subr.mxu0 %v1605_v21 }
 0x685   : > { %2081 = vmatpush3.msra.mxu0 %v1605_v21 }
 0x686   : > { %2083 = vmatmul.mubr.msk.f32.vlgmr.msra.gmra.mxu0 %vm651_vm10, %v2234_v36 }
 0x687   : > { %2085 = vmatprep.mubr.msk.f32.mxu0 %vm651_vm10, %v2235_v58 }
 0x68a   : > { %2086 = vmatmul.mubr.msk.f32.gmra.mxu0 %vm651_vm10, %v2236_v16 }
 0x746   : > { %v2084_v57 = vpop.f32.mrf.mxu0 }
 0x747   : > { %v1695_v61 = vmul.f32 %v2084_v57, %v2084_v57 }
 0x748   : > { %v1675_v17 = vpop.f32.mrf.mxu0 }
 0x749   : > { %v1694_v0 = vmul.f32 %v1675_v17, %v1675_v17  ;;  %1704 = vrot.lane.b32.xlu1 %v1695_v61, %s2254_s13 }
 0x74a   : > { %v2087_v10 = vpop.f32.mrf.mxu0 }
 0x74b   : > { %1702 = vrot.lane.b32.xlu0 %v1694_v0, %s2254_s13  ;;  %v1697_v1 = vmul.f32 %v2087_v10, %v2087_v10 }
 0x74c   : > { %v1685_v56 = vpop.f32.mrf.mxu0 }
 0x74d   : > { %v1696_v32 = vmul.f32 %v1685_v56, %v1685_v56 }
 0x74f   : > { %1708 = vrot.lane.b32.xlu0 %v1697_v1, %s2254_s13  ;;  %1706 = vrot.lane.b32.xlu1 %v1696_v32, %s2254_s13 }
 0x753   : > { %1729 = vperm.xlu0 %2128, %v2084_v57   ;;  %1724 = vperm.xlu1 %2127, %v1675_v17  }
 0x757   : > { %1734 = vperm.xlu1 %2127, %v1685_v56   ;;  %2130 = vset.pattern.permute.xlu0 %v2261_v25 }
 0x758   : > { %1791 = vperm.xlu0 %2130, %v2237_v4  }
 0x75b   : > { %1739 = vperm.xlu1 %2127, %v2087_v10  }
 0x75c   : > { %2131 = vset.pattern.permute.xlu0 %v2262_v30 }
 0x75d   : > { %1811 = vperm.xlu0 %2131, %v2238_v60  }
 0x75f   : > { %2129 = vset.pattern.permute.xlu1 %v2261_v25 }
 0x760   : > { %1787 = vperm.xlu1 %2129, %v2238_v60  }
 0x761   : > { %2134 = vset.pattern.permute.xlu0 %v3228_v42 }
 0x764   : > { %1795 = vperm.xlu1 %2129, %v2239_v62  }
 0x768   : > { %1799 = vperm.xlu1 %2129, %v2240_v9  }
 0x76c   : > { %2132 = vset.pattern.permute.xlu1 %v2262_v30 }
 0x76d   : > { %1815 = vperm.xlu1 %2132, %v2237_v4  }
 0x771   : > { %2133 = vset.pattern.permute.xlu1 %v3228_v42 }
 0x7bb   : > { %v1705_v33 = vpop.permute.xlu1 %1704 }
 0x7bc   : > { %v1715_v2 = vsub.f32 %v2084_v57, %v1705_v33 }
 0x7bd   : > { %v1703_v29 = vpop.permute.xlu0 %1702 }
 0x7be   : > { %v1719_v51 = vmax.f32 %v1715_v2, 0.0  ;;  %v1714_v38 = vsub.f32 %v1675_v17, %v1703_v29 }
 0x7c0   : > { %v1751_v37 = vadd.f32 1e-05, %v1719_v51  ;;  %v1718_v53 = vmax.f32 %v1714_v38, 0.0 }
 0x7c1   : > { %v1709_v34 = vpop.permute.xlu0 %1708  ;;  %v1707_v44 = vpop.permute.xlu1 %1706 }
 0x7c2   : > { %2191 = vrsqrt.f32 %v1751_v37  ;;  %v1750_v15 = vadd.f32 1e-05, %v1718_v53  ;;  %v1717_v55 = vsub.f32 %v2087_v10, %v1709_v34  ;;  %v1716_v47 = vsub.f32 %v1685_v56, %v1707_v44 }
 0x7c4   : > { %2193 = vrsqrt.f32 %v1750_v15  ;;  %v1721_v40 = vmax.f32 %v1717_v55, 0.0  ;;  %v1720_v19 = vmax.f32 %v1716_v47, 0.0 }
 0x7c6   : > { %v1753_v26 = vadd.f32 1e-05, %v1721_v40  ;;  %v1752_v45 = vadd.f32 1e-05, %v1720_v19 }
 0x7c8   : > { %2195 = vrsqrt.f32 %v1753_v26 }
 0x7c9   : > { %2197 = vrsqrt.f32 %v1752_v45 }
 0x7ce   : > { %v1725_v18 = vpop.permute.xlu1 %1724  ;;  %v1730_v43 = vpop.permute.xlu0 %1729 }
 0x7cf   : > { %v2192_v14 = vpop.eup %2191  ;;  %v1744_v28 = vsub.f32 %v3069_v7, %v1730_v43  ;;  %v1745_v13 = vsub.f32 %v3063_v20, %v1730_v43  ;;  %v1742_v3 = vsub.f32 %v3079_v5, %v1725_v18  ;;  %v1743_v6 = vsub.f32 %v3073_v63, %v1725_v18 }
 0x7d0   : > { %1765 = vperm.xlu1 %2133, %v2192_v14  }
 0x7d1   : > { %v2194_v31 = vpop.eup %2193 }
 0x7d2   : > { %1760 = vperm.xlu0 %2134, %v2194_v31   ;;  %v1735_v8 = vpop.permute.xlu1 %1734 }
 0x7d3   : > { %v1792_v12 = vpop.permute.xlu0 %1791  ;;  %v1746_v20 = vsub.f32 %v3051_v24, %v1735_v8  ;;  %v1747_v56 = vsub.f32 %v3053_v59, %v1735_v8 }
 0x7d5   : > { %v2196_v23 = vpop.eup %2195 }
 0x7d6   : > { %v2198_v27 = vpop.eup %2197  ;;  %1775 = vperm.xlu0 %2134, %v2196_v23   ;;  %v1740_v35 = vpop.permute.xlu1 %1739 }
 0x7d7   : > { %1770 = vperm.xlu1 %2133, %v2198_v27   ;;  %v1748_v5 = vsub.f32 %v3059_v41, %v1740_v35  ;;  %v1749_v63 = vsub.f32 %v3065_v54, %v1740_v35 }
 0x7d8   : > { %v1812_v49 = vpop.permute.xlu0 %1811 }
 0x7da   : > { %2136 = vset.pattern.permute.xlu0 %v2262_v30 }
 0x7db   : > { %2135 = vset.pattern.permute.xlu1 %v2262_v30  ;;  %1823 = vperm.xlu0 %2136, %v2240_v9   ;;  %v1788_v52 = vpop.permute.xlu1 %1787 }
 0x7dc   : > { %1819 = vperm.xlu1 %2135, %v2239_v62  }
 0x7df   : > { %2138 = vset.pattern.permute.xlu0 %v2263_v22  ;;  %v1796_v48 = vpop.permute.xlu1 %1795 }
 0x7e0   : > { %2137 = vset.pattern.permute.xlu1 %v2263_v22  ;;  %1895 = vperm.xlu0 %2138, %v2237_v4  }
 0x7e1   : > { %1891 = vperm.xlu1 %2137, %v2238_v60  }
 0x7e3   : > { %v1800_v50 = vpop.permute.xlu1 %1799 }
 0x7e5   : > { %1899 = vperm.xlu1 %2137, %v2239_v62  }
 0x7e8   : > { %v1816_v46 = vpop.permute.xlu1 %1815 }
 0x7e9   : > { %1903 = vperm.xlu1 %2137, %v2240_v9  }
 0x84b   : > { %v1766_v39 = vpop.permute.xlu1 %1765 }
 0x84c   : > { %v1780_v11 = vmul.f32 %v1766_v39, %v1744_v28  ;;  %v1781_v21 = vmul.f32 %v1766_v39, %v1745_v13 }
 0x84d   : > { %v1761_v36 = vpop.permute.xlu0 %1760 }
 0x84e   : > { %v1804_v58 = vmul.f32 %v1792_v12, %v1780_v11  ;;  %v1805_v16 = vmul.f32 %v1792_v12, %v1781_v21  ;;  %v1778_v57 = vmul.f32 %v1761_v36, %v1742_v3  ;;  %v1779_v61 = vmul.f32 %v1761_v36, %v1743_v6  ;;  %v3229_v6 = vld [vmem:[#allocation4_spill] sm:$0xff] }
 0x850   : > { %v3129_v17 = vadd.f32 %v1816_v46, %v1804_v58  ;;  %v3131_v0 = vadd.f32 %v1816_v46, %v1805_v16  ;;  %v1802_v10 = vmul.f32 %v1788_v52, %v1778_v57  ;;  %v1803_v7 = vmul.f32 %v1788_v52, %v1779_v61  ;;  %v3230_v58 = vld [vmem:[#allocation5_spill] sm:$0xff] }
 0x851   : > { %v1776_v1 = vpop.permute.xlu0 %1775 }
 0x852   : > { %v2034_v32 = vmul.f32 -1.442695, %v3129_v17  ;;  %v2035_v25 = vmul.f32 -1.442695, %v3131_v0  ;;  %v3139_v4 = vadd.f32 %v1812_v49, %v1802_v10  ;;  %v3141_v30 = vadd.f32 %v1812_v49, %v1803_v7  ;;  %v1771_v60 = vpop.permute.xlu1 %1770  ;;  %v3231_v10 = vld [vmem:[#allocation2_spill] sm:$0xff] }
 0x853   : > { %v1784_v42 = vmul.f32 %v1776_v1, %v1748_v5  ;;  %v1785_v62 = vmul.f32 %v1776_v1, %v1749_v63  ;;  %v1782_v9 = vmul.f32 %v1771_v60, %v1746_v20  ;;  %v1783_v24 = vmul.f32 %v1771_v60, %v1747_v56  ;;  %v3232_v5 = vld [vmem:[#allocation3_spill] sm:$0xff] }
 0x854   : > { %2199 = vpow2.f32 %v2034_v32  ;;  %v2032_v59 = vmul.f32 -1.442695, %v3139_v4  ;;  %v2033_v41 = vmul.f32 -1.442695, %v3141_v30 }
 0x855   : > { %2201 = vpow2.f32 %v2035_v25  ;;  %v1808_v54 = vmul.f32 %v1800_v50, %v1784_v42  ;;  %v1809_v33 = vmul.f32 %v1800_v50, %v1785_v62  ;;  %v1806_v2 = vmul.f32 %v1796_v48, %v1782_v9 }
 0x856   : > { %2203 = vpow2.f32 %v2032_v59  ;;  %v1824_v29 = vpop.permute.xlu0 %1823  ;;  %v1807_v51 = vmul.f32 %v1796_v48, %v1783_v24  ;;  %v3234_v24 = vld [vmem:[#allocation9_spill] sm:$0xff] }
 0x857   : > { %2205 = vpow2.f32 %v2033_v41  ;;  %v3145_v38 = vadd.f32 %v1824_v29, %v1808_v54  ;;  %v3147_v37 = vadd.f32 %v1824_v29, %v1809_v33  ;;  %v1820_v53 = vpop.permute.xlu1 %1819  ;;  %v3235_v33 = vld [vmem:[#allocation6_spill] sm:$0xff] }
 0x858   : > { %v3149_v34 = vadd.f32 %v1820_v53, %v1806_v2  ;;  %v3151_v44 = vadd.f32 %v1820_v53, %v1807_v51 }
 0x859   : > { %v2038_v15 = vmul.f32 -1.442695, %v3145_v38  ;;  %v2039_v55 = vmul.f32 -1.442695, %v3147_v37 }
 0x85a   : > { %v2036_v47 = vmul.f32 -1.442695, %v3149_v34  ;;  %v2037_v40 = vmul.f32 -1.442695, %v3151_v44 }
 0x85b   : > { %2207 = vpow2.f32 %v2038_v15  ;;  %v1896_v49 = vpop.permute.xlu0 %1895 }
 0x85c   : > { %2209 = vpow2.f32 %v2039_v55  ;;  %v1892_v43 = vpop.permute.xlu1 %1891  ;;  %v1908_v11 = vadd.f32 %v1896_v49, %v3229_v6  ;;  %v1909_v16 = vadd.f32 %v1896_v49, %v3230_v58 }
 0x85d   : > { %2211 = vpow2.f32 %v2036_v47  ;;  %v1906_v7 = vadd.f32 %v1892_v43, %v3231_v10  ;;  %v1907_v63 = vadd.f32 %v1892_v43, %v3232_v5 }
 0x85e   : > { %2213 = vpow2.f32 %v2037_v40 }
 0x860   : > { %v1900_v28 = vpop.permute.xlu1 %1899 }
 0x861   : > { %v2200_v19 = vpop.eup %2199  ;;  %v1910_v2 = vadd.f32 %v1900_v28, %v3235_v33 }
 0x862   : > { %v2202_v26 = vpop.eup %2201  ;;  %v1860_v45 = vadd.f32 1.0, %v2200_v19 }
 0x863   : > { %v2204_v14 = vpop.eup %2203  ;;  %v1861_v31 = vadd.f32 1.0, %v2202_v26 }
 0x864   : > { %v2206_v23 = vpop.eup %2205  ;;  %2215 = vrcp.f32 %v1860_v45  ;;  %v1858_v27 = vadd.f32 1.0, %v2204_v14  ;;  %v1904_v32 = vpop.permute.xlu1 %1903 }
 0x865   : > { %2217 = vrcp.f32 %v1861_v31  ;;  %v1859_v22 = vadd.f32 1.0, %v2206_v23  ;;  %v1913_v59 = vadd.f32 %v1904_v32, %v3234_v24 }
 0x866   : > { %2219 = vrcp.f32 %v1858_v27 }
 0x867   : > { %2221 = vrcp.f32 %v1859_v22 }
 0x868   : > { %v2208_v18 = vpop.eup %2207 }
 0x869   : > { %v2210_v8 = vpop.eup %2209  ;;  %v1864_v35 = vadd.f32 1.0, %v2208_v18 }
 0x86a   : > { %v2212_v52 = vpop.eup %2211  ;;  %v1865_v48 = vadd.f32 1.0, %v2210_v8 }
 0x86b   : > { %v2214_v50 = vpop.eup %2213  ;;  %2223 = vrcp.f32 %v1864_v35  ;;  %v1862_v12 = vadd.f32 1.0, %v2212_v52 }
 0x86c   : > { %2225 = vrcp.f32 %v1865_v48  ;;  %v1863_v46 = vadd.f32 1.0, %v2214_v50 }
 0x86d   : > { %2227 = vrcp.f32 %v1862_v12 }
 0x86e   : > { %2229 = vrcp.f32 %v1863_v46 }
 0x871   : > { %v2216_v13 = vpop.eup %2215 }
 0x872   : > { %v2218_v39 = vpop.eup %2217  ;;  %v1884_v3 = vmul.f32 %v2216_v13, %v3129_v17 }
 0x873   : > { %v2220_v21 = vpop.eup %2219  ;;  %v1885_v36 = vmul.f32 %v2218_v39, %v3131_v0 }
 0x874   : > { %v2222_v57 = vpop.eup %2221  ;;  %v1916_v61 = vadd.f32 %v1908_v11, %v1884_v3  ;;  %v1882_v17 = vmul.f32 %v2220_v21, %v3139_v4  ;;  %v3233_v4 = vld [vmem:[#allocation8_spill] sm:$0xff] }
 0x875   : > { %v1917_v20 = vadd.f32 %v1909_v16, %v1885_v36  ;;  %v1883_v56 = vmul.f32 %v2222_v57, %v3141_v30  ;;  %v1912_v62 = vadd.f32 %v1904_v32, %v3233_v4 }
 0x876   : > { %1924 = vst [vmem:[%s3163_s22 + $0x10] sm:$0xff] %v1916_v61  ;;  %v1914_v1 = vadd.f32 %v1906_v7, %v1882_v17 }
 0x877   : > { %1925 = vst [vmem:[%s3163_s22 + $0x18] sm:$0xff] %v1917_v20  ;;  %v1915_v25 = vadd.f32 %v1907_v63, %v1883_v56 }
 0x878   : > { %v2224_v0 = vpop.eup %2223  ;;  %1922 = vst [vmem:[%s3163_s22] sm:$0xff] %v1914_v1 }
 0x879   : > { %v2226_v60 = vpop.eup %2225  ;;  %v1888_v42 = vmul.f32 %v2224_v0, %v3145_v38  ;;  %1923 = vst [vmem:[%s3163_s22 + $0x8] sm:$0xff] %v1915_v25  ;;  %v3236_v38 = vld [vmem:[#allocation7_spill] sm:$0xff] }
 0x87a   : > { %v2228_v30 = vpop.eup %2227  ;;  %v1889_v9 = vmul.f32 %v2226_v60, %v3147_v37  ;;  %v1911_v53 = vadd.f32 %v1900_v28, %v3236_v38 }
 0x87b   : > { %v2230_v41 = vpop.eup %2229  ;;  %v1886_v54 = vmul.f32 %v2228_v30, %v3149_v34  ;;  %v1920_v29 = vadd.f32 %v1912_v62, %v1888_v42 }
 0x87c   : > { %v1887_v51 = vmul.f32 %v2230_v41, %v3151_v44  ;;  %v1921_v15 = vadd.f32 %v1913_v59, %v1889_v9 }
 0x87d   : > { %v1918_v55 = vadd.f32 %v1910_v2, %v1886_v54  ;;  %1928 = vst [vmem:[%s3163_s22 + $0x30] sm:$0xff] %v1920_v29 }
 0x87e   : > { %v1919_v47 = vadd.f32 %v1911_v53, %v1887_v51  ;;  %1929 = vst [vmem:[%s3163_s22 + $0x38] sm:$0xff] %v1921_v15 }
 0x87f   : > { %1926 = vst [vmem:[%s3163_s22 + $0x20] sm:$0xff] %v1918_v55 }
 0x880   : > { %1927 = vst [vmem:[%s3163_s22 + $0x28] sm:$0xff] %v1919_v47 }
 0x881 PF: > { %s17_s24 = sadd.s32 1, %s2247_s24  }
 0x882   : > { %p14_p4 = scmp.ge.s32.totalorder %s17_s24, 4  }
 0x884   :  { %16 = sbr.rel (!%p14_p4) target bundleno = 1 (0x1), region = 79 }

</bundles_post_ra>
